<compile_context>
chip_gen: v7x
topology: tpu7x:2x2x1
jax: 0.10.0
libtpu: 0.0.40
codegen_flags: <defaults>
</compile_context>

<pallas_src>
import jax
import jax.numpy as jnp
from jax.experimental import pallas as pl
from jax.experimental.pallas import tpu as pltpu

H1, H2, H3 = 1024, 512, 256
P_DROP = 0.3
NEG_SLOPE = 0.2
LANE = 128
MAX_TB = 256  # batch tile cap (MXU M dimension on v6e/v7x)


def _round_up(n, m):
    return ((n + m - 1) // m) * m


def _leaky_relu(x):
    return jnp.where(x >= 0, x, NEG_SLOPE * x)


def disc_kernel(x_ref, m1_ref, m2_ref, m3_ref,
                w1_ref, b1_ref, w2_ref, b2_ref, w3_ref, b3_ref,
                w4_ref, b4_ref,
                o_ref):
    # fc1 + leaky_relu + dropout
    h = jnp.dot(x_ref[...].astype(jnp.bfloat16), w1_ref[...],
                preferred_element_type=jnp.float32) + b1_ref[...]
    h = _leaky_relu(h) * m1_ref[...]

    # fc2 + leaky_relu + dropout
    h = jnp.dot(h.astype(jnp.bfloat16), w2_ref[...],
                preferred_element_type=jnp.float32) + b2_ref[...]
    h = _leaky_relu(h) * m2_ref[...]

    # fc3 + leaky_relu + dropout
    h = jnp.dot(h.astype(jnp.bfloat16), w3_ref[...],
                preferred_element_type=jnp.float32) + b3_ref[...]
    h = _leaky_relu(h) * m3_ref[...]

    # fc4 (out_features == 1): VPU multiply + lane reduction beats an N=1 MXU
    # matmul (w4 is passed as a (1, H3) row, f32).
    z = jnp.sum(h * w4_ref[...], axis=-1, keepdims=True) + b4_ref[...]

    # sigmoid (explicit form: exp goes to the EUP slot)
    o_ref[...] = 1.0 / (1.0 + jnp.exp(-z))


def discriminator_forward(x, params, dropout_key, *, training=True, tb=None):
    """Fused forward pass of Discriminator_1024.

    x:       (B, d_in) float
    params:  (w1, b1, w2, b2, w3, b3, w4, b4) with w_k shaped (in, out),
             b_k shaped (1, out)
    """
    w1, b1, w2, b2, w3, b3, w4, b4 = params
    B, d_in = x.shape
    assert w1.shape == (d_in, H1)

    # Batch tile: fill the MXU; multiple of 8, capped at MAX_TB.
    if tb is None:
        tb = min(MAX_TB, _round_up(B, 8))
    tb = _round_up(tb, 8)
    Bp = _round_up(B, tb)

    # Pad K (784 -> 896) so the first matmul / DMA tiles are 128-lane aligned.
    Dp = _round_up(d_in, LANE)
    xp = jnp.zeros((Bp, Dp), jnp.float32).at[:B, :d_in].set(x.astype(jnp.float32))
    w1p = jnp.zeros((Dp, H1), jnp.float32).at[:d_in, :].set(w1)

    # bf16 matmul operands (f32 accumulation inside the kernel).
    w1b = w1p.astype(jnp.bfloat16)
    w2b = w2.astype(jnp.bfloat16)
    w3b = w3.astype(jnp.bfloat16)
    # fc4 stays on the f32 VPU path; store its weight as a (1, H3) row.
    w4t = jnp.reshape(w4, (1, H3)).astype(jnp.float32)
    b4r = jnp.reshape(b4, (1, 1)).astype(jnp.float32)

    # Dropout masks (inverted dropout, training-mode semantics of F.dropout).
    # Generated with jax.random in the wrapper: the stateful TPU PRNG has no
    # interpret/CPU lowering, and this keeps tiles order-independent.
    keep = 1.0 - P_DROP
    if training:
        k1, k2, k3 = jax.random.split(dropout_key, 3)
        m1 = (jax.random.uniform(k1, (Bp, H1)) >= P_DROP).astype(jnp.float32) / keep
        m2 = (jax.random.uniform(k2, (Bp, H2)) >= P_DROP).astype(jnp.float32) / keep
        m3 = (jax.random.uniform(k3, (Bp, H3)) >= P_DROP).astype(jnp.float32) / keep
    else:
        m1 = jnp.ones((Bp, H1), jnp.float32)
        m2 = jnp.ones((Bp, H2), jnp.float32)
        m3 = jnp.ones((Bp, H3), jnp.float32)

    row = lambda i: (i, 0)   # batch-tiled operands
    rep = lambda i: (0, 0)   # weights/biases: same (only) block every step

    out = pl.pallas_call(
        disc_kernel,
        out_shape=jax.ShapeDtypeStruct((Bp, 1), jnp.float32),
        grid_spec=pltpu.PrefetchScalarGridSpec(
            num_scalar_prefetch=0,
            grid=(Bp // tb,),
            in_specs=[
                pl.BlockSpec((tb, Dp), row),   # x tile
                pl.BlockSpec((tb, H1), row),   # dropout mask 1
                pl.BlockSpec((tb, H2), row),   # dropout mask 2
                pl.BlockSpec((tb, H3), row),   # dropout mask 3
                pl.BlockSpec((Dp, H1), rep),   # w1 (bf16)
                pl.BlockSpec((1, H1), rep),    # b1
                pl.BlockSpec((H1, H2), rep),   # w2 (bf16)
                pl.BlockSpec((1, H2), rep),    # b2
                pl.BlockSpec((H2, H3), rep),   # w3 (bf16)
                pl.BlockSpec((1, H3), rep),    # b3
                pl.BlockSpec((1, H3), rep),    # w4 row (f32)
                pl.BlockSpec((1, 1), rep),     # b4
            ],
            out_specs=pl.BlockSpec((tb, 1), row),
        ),
        compiler_params=pltpu.CompilerParams(
            dimension_semantics=("parallel",),   # tiles independent -> megacore OK
            vmem_limit_bytes=32 << 20,
        ),
    )(xp, m1, m2, m3, w1b, b1, w2b, b2, w3b, b3, w4t, b4r)

    return out[:B]


def init_linear(kw, kb, fan_in, fan_out):
    # PyTorch nn.Linear default init: U(-1/sqrt(fan_in), 1/sqrt(fan_in))
    bound = float(fan_in) ** -0.5
    w = jax.random.uniform(kw, (fan_in, fan_out), jnp.float32, -bound, bound)
    b = jax.random.uniform(kb, (1, fan_out), jnp.float32, -bound, bound)
    return w, b


if __name__ == "__main__":
    d_input_dim = 784   # flattened MNIST image, as implied by the module's usage
    B = 32              # small demo batch (tile adapts; cap is 256 rows)

    key = jax.random.PRNGKey(0)
    keys = jax.random.split(key, 10)

    w1, b1 = init_linear(keys[0], keys[1], d_input_dim, H1)
    w2, b2 = init_linear(keys[2], keys[3], H1, H2)
    w3, b3 = init_linear(keys[4], keys[5], H2, H3)
    w4, b4 = init_linear(keys[6], keys[7], H3, 1)
    params = (w1, b1, w2, b2, w3, b3, w4, b4)

    x = jax.random.normal(keys[8], (B, d_input_dim), dtype=jnp.float32)

    out = discriminator_forward(x, params, keys[9], training=True)
    out = jax.block_until_ready(out)

    assert out.shape == (B, 1)
    assert bool(jnp.all(jnp.isfinite(out)))
    assert bool(jnp.all((out >= 0.0) & (out <= 1.0)))
    print("KERNEL_OK")
</pallas_src>

<mosaic_0001>
module attributes {stable_mosaic.version = 11 : i64} {
  func.func @disc_kernel(%arg0: i32, %arg1: memref<32x896xf32, #tpu.memory_space<vmem>>, %arg2: memref<32x1024xf32, #tpu.memory_space<vmem>>, %arg3: memref<32x512xf32, #tpu.memory_space<vmem>>, %arg4: memref<32x256xf32, #tpu.memory_space<vmem>>, %arg5: memref<896x1024xbf16, #tpu.memory_space<vmem>>, %arg6: memref<1x1024xf32, #tpu.memory_space<vmem>>, %arg7: memref<1024x512xbf16, #tpu.memory_space<vmem>>, %arg8: memref<1x512xf32, #tpu.memory_space<vmem>>, %arg9: memref<512x256xbf16, #tpu.memory_space<vmem>>, %arg10: memref<1x256xf32, #tpu.memory_space<vmem>>, %arg11: memref<1x256xf32, #tpu.memory_space<vmem>>, %arg12: memref<1x1xf32, #tpu.memory_space<vmem>>, %arg13: memref<32x1xf32, #tpu.memory_space<vmem>>) attributes {dimension_semantics = [#tpu.dimension_semantics<parallel>], iteration_bounds = array<i64: 1>, scalar_prefetch = 0 : i64, scratch_operands = 0 : i64, tpu.core_type = #tpu.core_type<tc>, window_params = [{transform_indices = @transform_0, window_bounds = array<i64: 32, 896>}, {transform_indices = @transform_1, window_bounds = array<i64: 32, 1024>}, {transform_indices = @transform_2, window_bounds = array<i64: 32, 512>}, {transform_indices = @transform_3, window_bounds = array<i64: 32, 256>}, {pipeline_mode = #tpu.pipeline_mode<synchronous>, transform_indices = @transform_4, window_bounds = array<i64: 896, 1024>}, {pipeline_mode = #tpu.pipeline_mode<synchronous>, transform_indices = @transform_5, window_bounds = array<i64: 1, 1024>}, {pipeline_mode = #tpu.pipeline_mode<synchronous>, transform_indices = @transform_6, window_bounds = array<i64: 1024, 512>}, {pipeline_mode = #tpu.pipeline_mode<synchronous>, transform_indices = @transform_7, window_bounds = array<i64: 1, 512>}, {pipeline_mode = #tpu.pipeline_mode<synchronous>, transform_indices = @transform_8, window_bounds = array<i64: 512, 256>}, {pipeline_mode = #tpu.pipeline_mode<synchronous>, transform_indices = @transform_9, window_bounds = array<i64: 1, 256>}, {pipeline_mode = #tpu.pipeline_mode<synchronous>, transform_indices = @transform_10, window_bounds = array<i64: 1, 256>}, {pipeline_mode = #tpu.pipeline_mode<synchronous>, transform_indices = @transform_11, window_bounds = array<i64: 1, 1>}, {transform_indices = @transform_12, window_bounds = array<i64: 32, 1>}]} {
    %c0 = arith.constant 0 : index
    %c0_0 = arith.constant 0 : index
    %0 = vector.load %arg1[%c0, %c0_0] : memref<32x896xf32, #tpu.memory_space<vmem>>, vector<32x896xf32>
    %1 = arith.truncf %0 : vector<32x896xf32> to vector<32x896xbf16>
    %c0_1 = arith.constant 0 : index
    %c0_2 = arith.constant 0 : index
    %2 = vector.load %arg5[%c0_1, %c0_2] : memref<896x1024xbf16, #tpu.memory_space<vmem>>, vector<896x1024xbf16>
    %cst = arith.constant dense<0.000000e+00> : vector<32x1024xf32>
    %3 = tpu.matmul %1, %2, %cst {dimension_numbers = #tpu.dot_dimension_numbers<[1], [0], [0], [1], [0, 0, 1, 1], [], []>} : vector<32x896xbf16>, vector<896x1024xbf16>, vector<32x1024xf32> -> vector<32x1024xf32>
    %c0_3 = arith.constant 0 : index
    %c0_4 = arith.constant 0 : index
    %4 = vector.load %arg6[%c0_3, %c0_4] : memref<1x1024xf32, #tpu.memory_space<vmem>>, vector<1x1024xf32>
    %5 = vector.broadcast %4 : vector<1x1024xf32> to vector<32x1024xf32>
    %6 = arith.addf %3, %5 : vector<32x1024xf32>
    %cst_5 = arith.constant 0.000000e+00 : f32
    %7 = vector.broadcast %cst_5 : f32 to vector<32x1024xf32>
    %8 = arith.cmpf oge, %6, %7 : vector<32x1024xf32>
    %cst_6 = arith.constant 2.000000e-01 : f32
    %9 = vector.broadcast %cst_6 : f32 to vector<32x1024xf32>
    %10 = arith.mulf %9, %6 : vector<32x1024xf32>
    %11 = arith.select %8, %6, %10 : vector<32x1024xi1>, vector<32x1024xf32>
    %c0_7 = arith.constant 0 : index
    %c0_8 = arith.constant 0 : index
    %12 = vector.load %arg2[%c0_7, %c0_8] : memref<32x1024xf32, #tpu.memory_space<vmem>>, vector<32x1024xf32>
    %13 = arith.mulf %11, %12 : vector<32x1024xf32>
    %14 = arith.truncf %13 : vector<32x1024xf32> to vector<32x1024xbf16>
    %c0_9 = arith.constant 0 : index
    %c0_10 = arith.constant 0 : index
    %15 = vector.load %arg7[%c0_9, %c0_10] : memref<1024x512xbf16, #tpu.memory_space<vmem>>, vector<1024x512xbf16>
    %cst_11 = arith.constant dense<0.000000e+00> : vector<32x512xf32>
    %16 = tpu.matmul %14, %15, %cst_11 {dimension_numbers = #tpu.dot_dimension_numbers<[1], [0], [0], [1], [0, 0, 1, 1], [], []>} : vector<32x1024xbf16>, vector<1024x512xbf16>, vector<32x512xf32> -> vector<32x512xf32>
    %c0_12 = arith.constant 0 : index
    %c0_13 = arith.constant 0 : index
    %17 = vector.load %arg8[%c0_12, %c0_13] : memref<1x512xf32, #tpu.memory_space<vmem>>, vector<1x512xf32>
    %18 = vector.broadcast %17 : vector<1x512xf32> to vector<32x512xf32>
    %19 = arith.addf %16, %18 : vector<32x512xf32>
    %cst_14 = arith.constant 0.000000e+00 : f32
    %20 = vector.broadcast %cst_14 : f32 to vector<32x512xf32>
    %21 = arith.cmpf oge, %19, %20 : vector<32x512xf32>
    %cst_15 = arith.constant 2.000000e-01 : f32
    %22 = vector.broadcast %cst_15 : f32 to vector<32x512xf32>
    %23 = arith.mulf %22, %19 : vector<32x512xf32>
    %24 = arith.select %21, %19, %23 : vector<32x512xi1>, vector<32x512xf32>
    %c0_16 = arith.constant 0 : index
    %c0_17 = arith.constant 0 : index
    %25 = vector.load %arg3[%c0_16, %c0_17] : memref<32x512xf32, #tpu.memory_space<vmem>>, vector<32x512xf32>
    %26 = arith.mulf %24, %25 : vector<32x512xf32>
    %27 = arith.truncf %26 : vector<32x512xf32> to vector<32x512xbf16>
    %c0_18 = arith.constant 0 : index
    %c0_19 = arith.constant 0 : index
    %28 = vector.load %arg9[%c0_18, %c0_19] : memref<512x256xbf16, #tpu.memory_space<vmem>>, vector<512x256xbf16>
    %cst_20 = arith.constant dense<0.000000e+00> : vector<32x256xf32>
    %29 = tpu.matmul %27, %28, %cst_20 {dimension_numbers = #tpu.dot_dimension_numbers<[1], [0], [0], [1], [0, 0, 1, 1], [], []>} : vector<32x512xbf16>, vector<512x256xbf16>, vector<32x256xf32> -> vector<32x256xf32>
    %c0_21 = arith.constant 0 : index
    %c0_22 = arith.constant 0 : index
    %30 = vector.load %arg10[%c0_21, %c0_22] : memref<1x256xf32, #tpu.memory_space<vmem>>, vector<1x256xf32>
    %31 = vector.broadcast %30 : vector<1x256xf32> to vector<32x256xf32>
    %32 = arith.addf %29, %31 : vector<32x256xf32>
    %cst_23 = arith.constant 0.000000e+00 : f32
    %33 = vector.broadcast %cst_23 : f32 to vector<32x256xf32>
    %34 = arith.cmpf oge, %32, %33 : vector<32x256xf32>
    %cst_24 = arith.constant 2.000000e-01 : f32
    %35 = vector.broadcast %cst_24 : f32 to vector<32x256xf32>
    %36 = arith.mulf %35, %32 : vector<32x256xf32>
    %37 = arith.select %34, %32, %36 : vector<32x256xi1>, vector<32x256xf32>
    %c0_25 = arith.constant 0 : index
    %c0_26 = arith.constant 0 : index
    %38 = vector.load %arg4[%c0_25, %c0_26] : memref<32x256xf32, #tpu.memory_space<vmem>>, vector<32x256xf32>
    %39 = arith.mulf %37, %38 : vector<32x256xf32>
    %c0_27 = arith.constant 0 : index
    %c0_28 = arith.constant 0 : index
    %40 = vector.load %arg11[%c0_27, %c0_28] : memref<1x256xf32, #tpu.memory_space<vmem>>, vector<1x256xf32>
    %41 = vector.broadcast %40 : vector<1x256xf32> to vector<32x256xf32>
    %42 = arith.mulf %39, %41 : vector<32x256xf32>
    %cst_29 = arith.constant dense<0.000000e+00> : vector<32xf32>
    %43 = vector.multi_reduction <add>, %42, %cst_29 [1] : vector<32x256xf32> to vector<32xf32>
    %44 = vector.shape_cast %43 : vector<32xf32> to vector<32x1xf32>
    %c0_30 = arith.constant 0 : index
    %c0_31 = arith.constant 0 : index
    %45 = vector.load %arg12[%c0_30, %c0_31] : memref<1x1xf32, #tpu.memory_space<vmem>>, vector<1x1xf32>
    %46 = vector.broadcast %45 : vector<1x1xf32> to vector<32x1xf32>
    %47 = arith.addf %44, %46 : vector<32x1xf32>
    %cst_32 = arith.constant 0.000000e+00 : f32
    %48 = vector.broadcast %cst_32 : f32 to vector<32x1xf32>
    %49 = arith.subf %48, %47 : vector<32x1xf32>
    %50 = math.exp %49 : vector<32x1xf32>
    %cst_33 = arith.constant 1.000000e+00 : f32
    %51 = vector.broadcast %cst_33 : f32 to vector<32x1xf32>
    %52 = arith.addf %51, %50 : vector<32x1xf32>
    %cst_34 = arith.constant 1.000000e+00 : f32
    %53 = vector.broadcast %cst_34 : f32 to vector<32x1xf32>
    %54 = arith.divf %53, %52 : vector<32x1xf32>
    %c0_35 = arith.constant 0 : index
    %c0_36 = arith.constant 0 : index
    %55 = vector.load %arg13[%c0_35, %c0_36] : memref<32x1xf32, #tpu.memory_space<vmem>>, vector<32x1xf32>
    tpu.vector_store %arg13[%c0_35, %c0_36], %54 {strides = array<i32>} : memref<32x1xf32, #tpu.memory_space<vmem>>, vector<32x1xf32>,
    return
  }
  func.func @transform_0(%arg0: i32) -> (i32, i32) {
    %c0_i32 = arith.constant 0 : i32
    %c0_i32_0 = arith.constant 0 : i32
    return %arg0, %c0_i32 : i32, i32
  }
  func.func @transform_1(%arg0: i32) -> (i32, i32) {
    %c0_i32 = arith.constant 0 : i32
    %c0_i32_0 = arith.constant 0 : i32
    return %arg0, %c0_i32 : i32, i32
  }
  func.func @transform_2(%arg0: i32) -> (i32, i32) {
    %c0_i32 = arith.constant 0 : i32
    %c0_i32_0 = arith.constant 0 : i32
    return %arg0, %c0_i32 : i32, i32
  }
  func.func @transform_3(%arg0: i32) -> (i32, i32) {
    %c0_i32 = arith.constant 0 : i32
    %c0_i32_0 = arith.constant 0 : i32
    return %arg0, %c0_i32 : i32, i32
  }
  func.func @transform_4(%arg0: i32) -> (i32, i32) {
    %c0_i32 = arith.constant 0 : i32
    %c0_i32_0 = arith.constant 0 : i32
    %c0_i32_1 = arith.constant 0 : i32
    return %c0_i32, %c0_i32_0 : i32, i32
  }
  func.func @transform_5(%arg0: i32) -> (i32, i32) {
    %c0_i32 = arith.constant 0 : i32
    %c0_i32_0 = arith.constant 0 : i32
    %c0_i32_1 = arith.constant 0 : i32
    return %c0_i32, %c0_i32_0 : i32, i32
  }
  func.func @transform_6(%arg0: i32) -> (i32, i32) {
    %c0_i32 = arith.constant 0 : i32
    %c0_i32_0 = arith.constant 0 : i32
    %c0_i32_1 = arith.constant 0 : i32
    return %c0_i32, %c0_i32_0 : i32, i32
  }
  func.func @transform_7(%arg0: i32) -> (i32, i32) {
    %c0_i32 = arith.constant 0 : i32
    %c0_i32_0 = arith.constant 0 : i32
    %c0_i32_1 = arith.constant 0 : i32
    return %c0_i32, %c0_i32_0 : i32, i32
  }
  func.func @transform_8(%arg0: i32) -> (i32, i32) {
    %c0_i32 = arith.constant 0 : i32
    %c0_i32_0 = arith.constant 0 : i32
    %c0_i32_1 = arith.constant 0 : i32
    return %c0_i32, %c0_i32_0 : i32, i32
  }
  func.func @transform_9(%arg0: i32) -> (i32, i32) {
    %c0_i32 = arith.constant 0 : i32
    %c0_i32_0 = arith.constant 0 : i32
    %c0_i32_1 = arith.constant 0 : i32
    return %c0_i32, %c0_i32_0 : i32, i32
  }
  func.func @transform_10(%arg0: i32) -> (i32, i32) {
    %c0_i32 = arith.constant 0 : i32
    %c0_i32_0 = arith.constant 0 : i32
    %c0_i32_1 = arith.constant 0 : i32
    return %c0_i32, %c0_i32_0 : i32, i32
  }
  func.func @transform_11(%arg0: i32) -> (i32, i32) {
    %c0_i32 = arith.constant 0 : i32
    %c0_i32_0 = arith.constant 0 : i32
    %c0_i32_1 = arith.constant 0 : i32
    return %c0_i32, %c0_i32_0 : i32, i32
  }
  func.func @transform_12(%arg0: i32) -> (i32, i32) {
    %c0_i32 = arith.constant 0 : i32
    %c0_i32_0 = arith.constant 0 : i32
    return %arg0, %c0_i32 : i32, i32
  }
}

</mosaic_0001>

<bundles_post_ra>
// kernel: tpu_custom_call.1
= control target key start
LH: loop header
LB: loop body
LE: loop exit
PB: predicated region body
PF: predicated region fallthrough
CT: control target
= control target key end

     0   :  { %s8944_s0 = inlined_call_operand.hbm [shape: f32[32,896], index: 0, kind: input, shape index: {}]   ;;  %s8945_s1 = inlined_call_operand.hbm [shape: f32[32,1024], index: 1, kind: input, shape index: {}]   ;;  %s8946_s2 = inlined_call_operand.hbm [shape: f32[32,512], index: 2, kind: input, shape index: {}]   ;;  %s8947_s3 = inlined_call_operand.hbm [shape: f32[32,256], index: 3, kind: input, shape index: {}]   ;;  %s8948_s4 = inlined_call_operand.hbm [shape: bf16[896,1024], index: 4, kind: input, shape index: {}]   ;;  %s8949_s5 = inlined_call_operand.hbm [shape: f32[1,1024], index: 5, kind: input, shape index: {}]   ;;  %s8950_s6 = inlined_call_operand.hbm [shape: bf16[1024,512], index: 6, kind: input, shape index: {}]   ;;  %s8951_s7 = inlined_call_operand.hbm [shape: f32[1,512], index: 7, kind: input, shape index: {}]   ;;  %s8952_s8 = inlined_call_operand.hbm [shape: bf16[512,256], index: 8, kind: input, shape index: {}]   ;;  %s8953_s9 = inlined_call_operand.hbm [shape: f32[1,256], index: 9, kind: input, shape index: {}]   ;;  %s8954_s10 = inlined_call_operand.hbm [shape: f32[1,256], index: 10, kind: input, shape index: {}]   ;;  %s8955_s11 = inlined_call_operand.<no memory space> [shape: f32[1,1], index: 11, kind: input, shape index: {}]   ;;  %s8956_s12 = inlined_call_operand.vmem [shape: f32[32,1], index: 12, kind: output, shape index: {}]  }
   0x1   :  { %v17_v0 = vstv %s8955_s11 }
   0x2   :  { %18 = vst [vmem:[#allocation2] sm:$0x1] %v17_v0 }
   0x3   :  { %19 = vsyncpa [#allocation4], 0 }
   0x4   :  { %20 = vsyncpa [#allocation6], 0 }
   0x5   :  { %21 = vsyncpa [#allocation9], 0 }
   0x6   :  { %22 = vsyncpa [#allocation12], 0 }
   0x7   :  { %23 = vsyncpa [#allocation15], 0 }
   0x8   :  { %24 = vsyncpa [#allocation18], 0  ;;  %s8425_s23 = smov [#allocation5]   ;;  %s8171_s27 = scalar_lea.hbm %s8945_s1, 4096 }
   0x9   :  { %s42_s24 = sshll.u32 %s8425_s23, 4  ;;  %p8172_p0 = scmp.ne.s32.totalorder %s8945_s1, %s8171_s27  ;;  %s43_s24 = int_to_ptr.vmem [resolvable:$true] %s42_s24 }
   0xa   :  { %p8175_p1 = scmp.lt.u32.totalorder %s8171_s27, %s8945_s1 }
   0xc   :  { %p8177_p2 = pnand %p8175_p1, %p8172_p0 }
   0xe   :  { %8180 = shalt.err (!%p8177_p2)
}
   0xf   :  { %s8181_s13 = scalar_lea.vmem %s43_s24, 4096  ;;  %p8186_p4 = scmp.lt.s32.totalorder %s43_s24, %s43_s24 }
  0x10   :  { %p8182_p3 = scmp.ne.s32.totalorder %s43_s24, %s8181_s13  ;;  %p8187_p5 = scmp.lt.s32.totalorder %s8181_s13, %s8181_s13 }
  0x12   :  { %p8188_p6 = por %p8187_p5, %p8186_p4 }
  0x14   :  { %p8189_p7 = pnand %p8188_p6, %p8182_p3 }
  0x16   :  { %8192 = shalt.err (!%p8189_p7)
}
  0x17   :  { %s8426_s14 = smov 1024   ;;  %s8427_s15 = smov 64  }
  0x18   :  { %48 = dma.hbm_to_vmem [thread:$0]  %s8945_s1, 4096, %s43_s24, [#allocation6], %s8426_s14, %s8426_s14, %s8427_s15  }
  0x19   :  { %s8428_s18 = smov [#allocation8]   ;;  %s8193_s22 = scalar_lea.hbm %s8947_s3, 1024 }
  0x1a   :  { %s66_s19 = sshll.u32 %s8428_s18, 4  ;;  %p8194_p8 = scmp.ne.s32.totalorder %s8947_s3, %s8193_s22  ;;  %s67_s19 = int_to_ptr.vmem [resolvable:$true] %s66_s19 }
  0x1b   :  { %p8197_p9 = scmp.lt.u32.totalorder %s8193_s22, %s8947_s3 }
  0x1d   :  { %p8199_p10 = pnand %p8197_p9, %p8194_p8 }
  0x1f   :  { %8202 = shalt.err (!%p8199_p10)
}
  0x20   :  { %s8203_s28 = scalar_lea.vmem %s67_s19, 1024  ;;  %p8208_p12 = scmp.lt.s32.totalorder %s67_s19, %s67_s19 }
  0x21   :  { %p8204_p11 = scmp.ne.s32.totalorder %s67_s19, %s8203_s28  ;;  %p8209_p13 = scmp.lt.s32.totalorder %s8203_s28, %s8203_s28 }
  0x23   :  { %p8210_p0 = por %p8209_p13, %p8208_p12 }
  0x25   :  { %p8211_p1 = pnand %p8210_p0, %p8204_p11 }
  0x27   :  { %8214 = shalt.err (!%p8211_p1)
}
  0x28   :  { %s8429_s1 = smov 256   ;;  %s8430_s24 = smov 16  }
  0x29   :  { %72 = dma.hbm_to_vmem [thread:$0]  %s8947_s3, 1024, %s67_s19, [#allocation9], %s8429_s1, %s8429_s1, %s8430_s24  }
  0x2a   :  { %s8431_s11 = smov [#allocation11]   ;;  %s8432_s14 = smov [#allocation14]  }
  0x2b   :  { %s91_s13 = sshll.u32 %s8431_s11, 4  ;;  %s113_s15 = sshll.u32 %s8432_s14, 4  ;;  %s92_s13 = int_to_ptr.vmem [resolvable:$true] %s91_s13  ;;  %s114_s15 = int_to_ptr.vmem [resolvable:$true] %s113_s15 }
  0x2c   :  { %s8215_s18 = scalar_lea.hbm %s8949_s5, 128 }
  0x2d   :  { %p8216_p2 = scmp.ne.s32.totalorder %s8949_s5, %s8215_s18  ;;  %p8219_p3 = scmp.lt.u32.totalorder %s8215_s18, %s8949_s5 }
  0x2f   :  { %p8221_p4 = pnand %p8219_p3, %p8216_p2 }
  0x31   :  { %8224 = shalt.err (!%p8221_p4)
}
  0x32   :  { %s8225_s3 = scalar_lea.vmem %s92_s13, 128  ;;  %p8230_p6 = scmp.lt.s32.totalorder %s92_s13, %s92_s13 }
  0x33   :  { %p8226_p5 = scmp.ne.s32.totalorder %s92_s13, %s8225_s3  ;;  %p8231_p7 = scmp.lt.s32.totalorder %s8225_s3, %s8225_s3 }
  0x35   :  { %p8232_p8 = por %p8231_p7, %p8230_p6 }
  0x37   :  { %p8233_p9 = pnand %p8232_p8, %p8226_p5 }
  0x39   :  { %8236 = shalt.err (!%p8233_p9)
}
  0x3a   :  { %94 = dma.hbm_to_vmem [thread:$0]  %s8949_s5, 128, %s92_s13, [#allocation12]  }
  0x3b   :  { %s8237_s28 = scalar_lea.hbm %s8951_s7, 64 }
  0x3c   :  { %p8238_p10 = scmp.ne.s32.totalorder %s8951_s7, %s8237_s28  ;;  %p8241_p11 = scmp.lt.u32.totalorder %s8237_s28, %s8951_s7 }
  0x3e   :  { %p8243_p12 = pnand %p8241_p11, %p8238_p10 }
  0x40   :  { %8246 = shalt.err (!%p8243_p12)
}
  0x41   :  { %s8247_s16 = scalar_lea.vmem %s114_s15, 64  ;;  %p8252_p0 = scmp.lt.s32.totalorder %s114_s15, %s114_s15 }
  0x42   :  { %p8248_p13 = scmp.ne.s32.totalorder %s114_s15, %s8247_s16  ;;  %p8253_p1 = scmp.lt.s32.totalorder %s8247_s16, %s8247_s16 }
  0x44   :  { %p8254_p2 = por %p8253_p1, %p8252_p0 }
  0x46   :  { %p8255_p3 = pnand %p8254_p2, %p8248_p13 }
  0x48   :  { %8258 = shalt.err (!%p8255_p3)
}
  0x49   :  { %116 = dma.hbm_to_vmem [thread:$0]  %s8951_s7, 64, %s114_s15, [#allocation15]  }
  0x4a   :  { %s8433_s17 = smov [#allocation17]   ;;  %s8434_s20 = smov [#allocation3]  }
  0x4b   :  { %s135_s18 = sshll.u32 %s8433_s17, 4  ;;  %s30_s21 = sshll.u32 %s8434_s20, 4  ;;  %s136_s18 = int_to_ptr.vmem [resolvable:$true] %s135_s18  ;;  %s8566_s21 = int_to_ptr.vmem [resolvable:$true] %s30_s21 }
  0x4c   :  { %s8259_s3 = scalar_lea.hbm %s8953_s9, 32 }
  0x4d   :  { %p8260_p4 = scmp.ne.s32.totalorder %s8953_s9, %s8259_s3  ;;  %p8263_p5 = scmp.lt.u32.totalorder %s8259_s3, %s8953_s9 }
  0x4f   :  { %p8265_p6 = pnand %p8263_p5, %p8260_p4 }
  0x51   :  { %8268 = shalt.err (!%p8265_p6)
}
  0x52   :  { %s8269_s7 = scalar_lea.vmem %s136_s18, 32  ;;  %p8274_p8 = scmp.lt.s32.totalorder %s136_s18, %s136_s18 }
  0x53   :  { %p8270_p7 = scmp.ne.s32.totalorder %s136_s18, %s8269_s7  ;;  %p8275_p9 = scmp.lt.s32.totalorder %s8269_s7, %s8269_s7 }
  0x55   :  { %p8276_p10 = por %p8275_p9, %p8274_p8 }
  0x57   :  { %p8277_p11 = pnand %p8276_p10, %p8270_p7 }
  0x59   :  { %8280 = shalt.err (!%p8277_p11)
}
  0x5a   :  { %138 = dma.hbm_to_vmem [thread:$0]  %s8953_s9, 32, %s136_s18, [#allocation18]  }
  0x5b   :  { %s8281_s11 = scalar_lea.hbm %s8944_s0, 3584 }
  0x5c   :  { %p8282_p12 = scmp.ne.s32.totalorder %s8944_s0, %s8281_s11  ;;  %p8285_p13 = scmp.lt.u32.totalorder %s8281_s11, %s8944_s0 }
  0x5e   :  { %p8287_p0 = pnand %p8285_p13, %p8282_p12 }
  0x60   :  { %8290 = shalt.err (!%p8287_p0)
}
  0x61   :  { %s8291_s17 = scalar_lea.vmem %s8566_s21, 3584  ;;  %p8296_p2 = scmp.lt.s32.totalorder %s8566_s21, %s8566_s21 }
  0x62   :  { %p8292_p1 = scmp.ne.s32.totalorder %s8566_s21, %s8291_s17  ;;  %p8297_p3 = scmp.lt.s32.totalorder %s8291_s17, %s8291_s17 }
  0x64   :  { %p8298_p4 = por %p8297_p3, %p8296_p2 }
  0x66   :  { %p8299_p5 = pnand %p8298_p4, %p8292_p1 }
  0x68   :  { %8302 = shalt.err (!%p8299_p5)
}
  0x69   :  { %s8435_s9 = smov 896   ;;  %s8436_s18 = smov 56  }
  0x6a   :  { %36 = dma.hbm_to_vmem [thread:$0]  %s8944_s0, 3584, %s8566_s21, [#allocation4], %s8435_s9, %s8435_s9, %s8436_s18  }
  0x6b   :  { %s8437_s23 = smov [#allocation7]   ;;  %s8303_s26 = scalar_lea.hbm %s8946_s2, 2048 }
  0x6c   :  { %s54_s3 = sshll.u32 %s8437_s23, 4  ;;  %p8304_p6 = scmp.ne.s32.totalorder %s8946_s2, %s8303_s26  ;;  %s55_s3 = int_to_ptr.vmem [resolvable:$true] %s54_s3 }
  0x6d   :  { %p8307_p7 = scmp.lt.u32.totalorder %s8303_s26, %s8946_s2 }
  0x6f   :  { %p8309_p8 = pnand %p8307_p7, %p8304_p6 }
  0x71   :  { %8312 = shalt.err (!%p8309_p8)
}
  0x72   :  { %s8313_s29 = scalar_lea.vmem %s55_s3, 2048  ;;  %p8318_p10 = scmp.lt.s32.totalorder %s55_s3, %s55_s3 }
  0x73   :  { %p8314_p9 = scmp.ne.s32.totalorder %s55_s3, %s8313_s29  ;;  %p8319_p11 = scmp.lt.s32.totalorder %s8313_s29, %s8313_s29 }
  0x75   :  { %p8320_p12 = por %p8319_p11, %p8318_p10 }
  0x77   :  { %p8321_p13 = pnand %p8320_p12, %p8314_p9 }
  0x79   :  { %8324 = shalt.err (!%p8321_p13)
}
  0x7a   :  { %s8438_s0 = smov 512   ;;  %s8439_s21 = smov 32  }
  0x7b   :  { %60 = dma.hbm_to_vmem [thread:$0]  %s8946_s2, 2048, %s55_s3, [#allocation6], %s8438_s0, %s8438_s0, %s8439_s21  }
  0x7c   :  { %s8440_s14 = smov [#allocation10]   ;;  %s8441_s5 = smov [#allocation13]  }
  0x7d   :  { %s78_s16 = sshll.u32 %s8440_s14, 4  ;;  %s100_s13 = sshll.u32 %s8441_s5, 4  ;;  %s79_s16 = int_to_ptr.vmem [resolvable:$true] %s78_s16  ;;  %s101_s13 = int_to_ptr.vmem [resolvable:$true] %s100_s13 }
  0x7e   :  { %s8325_s18 = scalar_lea.hbm %s8948_s4, 57344 }
  0x7f   :  { %p8326_p0 = scmp.ne.s32.totalorder %s8948_s4, %s8325_s18  ;;  %p8329_p1 = scmp.lt.u32.totalorder %s8325_s18, %s8948_s4 }
  0x81   :  { %p8331_p2 = pnand %p8329_p1, %p8326_p0 }
  0x83   :  { %8334 = shalt.err (!%p8331_p2)
}
  0x84   :  { %s8335_s2 = scalar_lea.vmem %s79_s16, 57344  ;;  %p8340_p4 = scmp.lt.s32.totalorder %s79_s16, %s79_s16 }
  0x85   :  { %p8336_p3 = scmp.ne.s32.totalorder %s79_s16, %s8335_s2  ;;  %p8341_p5 = scmp.lt.s32.totalorder %s8335_s2, %s8335_s2 }
  0x87   :  { %p8342_p6 = por %p8341_p5, %p8340_p4 }
  0x89   :  { %p8343_p7 = pnand %p8342_p6, %p8336_p3 }
  0x8b   :  { %8346 = shalt.err (!%p8343_p7)
}
  0x8c   :  { %84 = dma.hbm_to_vmem [thread:$0]  %s8948_s4, 57344, %s79_s16, [#allocation9], %s8438_s0, %s8438_s0, %s8439_s21  }
  0x8d   :  { %s8347_s7 = scalar_lea.hbm %s8950_s6, 32768 }
  0x8e   :  { %p8348_p8 = scmp.ne.s32.totalorder %s8950_s6, %s8347_s7  ;;  %p8351_p9 = scmp.lt.u32.totalorder %s8347_s7, %s8950_s6 }
  0x90   :  { %p8353_p10 = pnand %p8351_p9, %p8348_p8 }
  0x92   :  { %8356 = shalt.err (!%p8353_p10)
}
  0x93   :  { %s8357_s11 = scalar_lea.vmem %s101_s13, 32768  ;;  %p8362_p12 = scmp.lt.s32.totalorder %s101_s13, %s101_s13 }
  0x94   :  { %p8358_p11 = scmp.ne.s32.totalorder %s101_s13, %s8357_s11  ;;  %p8363_p13 = scmp.lt.s32.totalorder %s8357_s11, %s8357_s11 }
  0x96   :  { %p8364_p0 = por %p8363_p13, %p8362_p12 }
  0x98   :  { %p8365_p1 = pnand %p8364_p0, %p8358_p11 }
  0x9a   :  { %8368 = shalt.err (!%p8365_p1)
}
  0x9b   :  { %106 = dma.hbm_to_vmem [thread:$0]  %s8950_s6, 32768, %s101_s13, [#allocation12], %s8429_s1, %s8429_s1, %s8430_s24  }
  0x9c   :  { %s8442_s21 = smov [#allocation16]   ;;  %s8369_s17 = scalar_lea.hbm %s8952_s8, 8192 }
  0x9d   :  { %s122_s14 = sshll.u32 %s8442_s21, 4  ;;  %p8370_p2 = scmp.ne.s32.totalorder %s8952_s8, %s8369_s17  ;;  %s123_s14 = int_to_ptr.vmem [resolvable:$true] %s122_s14 }
  0x9e   :  { %p8373_p3 = scmp.lt.u32.totalorder %s8369_s17, %s8952_s8 }
  0xa0   :  { %p8375_p4 = pnand %p8373_p3, %p8370_p2 }
  0xa2   :  { %8378 = shalt.err (!%p8375_p4)
}
  0xa3   :  { %s8379_s23 = scalar_lea.vmem %s123_s14, 8192  ;;  %p8384_p6 = scmp.lt.s32.totalorder %s123_s14, %s123_s14 }
  0xa4   :  { %p8380_p5 = scmp.ne.s32.totalorder %s123_s14, %s8379_s23  ;;  %p8385_p7 = scmp.lt.s32.totalorder %s8379_s23, %s8379_s23 }
  0xa6   :  { %p8386_p8 = por %p8385_p7, %p8384_p6 }
  0xa8   :  { %p8387_p9 = pnand %p8386_p8, %p8380_p5 }
  0xaa   :  { %8390 = shalt.err (!%p8387_p9)
}
  0xab   :  { %s8443_s6 = smov 128   ;;  %s8444_s1 = smov 8  }
  0xac   :  { %128 = dma.hbm_to_vmem [thread:$0]  %s8952_s8, 8192, %s123_s14, [#allocation15], %s8443_s6, %s8443_s6, %s8444_s1  }
  0xad   :  { %s8445_s19 = smov [#allocation19]   ;;  %s8391_s26 = scalar_lea.hbm %s8954_s10, 32 }
  0xae   :  { %s145_s2 = sshll.u32 %s8445_s19, 4  ;;  %p8392_p10 = scmp.ne.s32.totalorder %s8954_s10, %s8391_s26  ;;  %s146_s2 = int_to_ptr.vmem [resolvable:$true] %s145_s2 }
  0xaf   :  { %p8395_p11 = scmp.lt.u32.totalorder %s8391_s26, %s8954_s10 }
  0xb1   :  { %p8397_p12 = pnand %p8395_p11, %p8392_p10 }
  0xb3   :  { %8400 = shalt.err (!%p8397_p12)
}
  0xb4   :  { %s8401_s29 = scalar_lea.vmem %s146_s2, 32  ;;  %p8406_p0 = scmp.lt.s32.totalorder %s146_s2, %s146_s2 }
  0xb5   :  { %p8402_p13 = scmp.ne.s32.totalorder %s146_s2, %s8401_s29  ;;  %p8407_p1 = scmp.lt.s32.totalorder %s8401_s29, %s8401_s29 }
  0xb7   :  { %p8408_p2 = por %p8407_p1, %p8406_p0 }
  0xb9   :  { %p8409_p3 = pnand %p8408_p2, %p8402_p13 }
  0xbb   :  { %8412 = shalt.err (!%p8409_p3)
}
  0xbc   :  { %148 = dma.hbm_to_vmem [thread:$0]  %s8954_s10, 32, %s146_s2, [#allocation18]  }
  0xbd   :  { %8413 = dma.done.wait [#allocation4], 3584  }
  0xbe   :  { %8414 = vsyncadd [#allocation4], 4294963712 }
  0xbf   :  { %8415 = dma.done.wait [#allocation6], 6144  }
  0xc0   :  { %8416 = vsyncadd [#allocation6], 4294961152 }
  0xc1   :  { %8417 = dma.done.wait [#allocation9], 58368  }
  0xc2   :  { %8418 = vsyncadd [#allocation9], 4294908928 }
  0xc3   :  { %8419 = dma.done.wait [#allocation12], 32896  }
  0xc4   :  { %8420 = vsyncadd [#allocation12], 4294934400 }
  0xc5   :  { %8421 = dma.done.wait [#allocation15], 8256  }
  0xc6   :  { %8422 = vsyncadd [#allocation15], 4294959040 }
  0xc7   :  { %8423 = dma.done.wait [#allocation18], 64  }
  0xc8   :  { %8424 = vsyncadd [#allocation18], 4294967232  ;;  %v227_v1 = vld [vmem:[#allocation10] sm:$0xff]  ;;  %v186_v54 = vld [vmem:[#allocation3 + $0x8] sm:$0xff] }
  0xc9   :  { %v231_v2 = vld [vmem:[#allocation10 + $0x20] sm:$0xff]  ;;  %v188_v60 = vld [vmem:[#allocation3 + $0x18] sm:$0xff]  ;;  %v195_v63 = vld [vmem:[#allocation3 + $0x50] sm:$0xff] }
  0xca   :  { %v355_v3 = vld [vmem:[#allocation10 + $0x400] sm:$0xff]  ;;  %v6676_v4 = vcombine.high %v227_v1, %v231_v2  ;;  %v6675_v6 = vcombine.low %v227_v1, %v231_v2  ;;  %v8663_v1 = vpack.c.bf16 %v195_v63, %v188_v60 }
  0xcb   :  { %v359_v5 = vld [vmem:[#allocation10 + $0x420] sm:$0xff] }
  0xcc   :  { %v235_v7 = vld [vmem:[#allocation10 + $0x40] sm:$0xff]  ;;  %v6804_v9 = vcombine.high %v355_v3, %v359_v5  ;;  %v6803_v10 = vcombine.low %v355_v3, %v359_v5  ;;  %2957 = vmatprep.subr.bf16.mxu1 %v6676_v4  ;;  %3042 = vmatprep.mubr.bf16.mxu0 %v8663_v1 }
  0xcd   :  { %v239_v8 = vld [vmem:[#allocation10 + $0x60] sm:$0xff]  ;;  %2958 = vmatpush1.bf16.msra.mxu1 %v6675_v6 }
  0xce   :  { %v6684_v11 = vcombine.high %v235_v7, %v239_v8  ;;  %v363_v12 = vld [vmem:[#allocation10 + $0x440] sm:$0xff]  ;;  %3010 = vmatprep.subr.bf16.mxu0 %v6804_v9  ;;  %v6683_v19 = vcombine.low %v235_v7, %v239_v8 }
  0xcf   :  { %v367_v13 = vld [vmem:[#allocation10 + $0x460] sm:$0xff]  ;;  %3011 = vmatpush1.bf16.msra.mxu0 %v6803_v10 }
  0xd0   :  { %v243_v14 = vld [vmem:[#allocation10 + $0x80] sm:$0xff]  ;;  %v6812_v15 = vcombine.high %v363_v12, %v367_v13  ;;  %2959 = vmatprep.subr.bf16.mxu1 %v6684_v11  ;;  %v6811_v20 = vcombine.low %v363_v12, %v367_v13 }
  0xd1   :  { %v247_v16 = vld [vmem:[#allocation10 + $0xa0] sm:$0xff]  ;;  %2960 = vmatpush1.bf16.msra.mxu1 %v6683_v19 }
  0xd2   :  { %v371_v17 = vld [vmem:[#allocation10 + $0x480] sm:$0xff]  ;;  %v6692_v21 = vcombine.high %v243_v14, %v247_v16  ;;  %3012 = vmatprep.subr.bf16.mxu0 %v6812_v15  ;;  %v6691_v27 = vcombine.low %v243_v14, %v247_v16 }
  0xd3   :  { %v375_v18 = vld [vmem:[#allocation10 + $0x4a0] sm:$0xff]  ;;  %3013 = vmatpush1.bf16.msra.mxu0 %v6811_v20 }
  0xd4   :  { %v6820_v22 = vcombine.high %v371_v17, %v375_v18  ;;  %v251_v23 = vld [vmem:[#allocation10 + $0xc0] sm:$0xff]  ;;  %2961 = vmatprep.subr.bf16.mxu1 %v6692_v21  ;;  %v6819_v28 = vcombine.low %v371_v17, %v375_v18 }
  0xd5   :  { %v255_v24 = vld [vmem:[#allocation10 + $0xe0] sm:$0xff]  ;;  %2962 = vmatpush1.bf16.msra.mxu1 %v6691_v27 }
  0xd6   :  { %v379_v25 = vld [vmem:[#allocation10 + $0x4c0] sm:$0xff]  ;;  %v6700_v29 = vcombine.high %v251_v23, %v255_v24  ;;  %3014 = vmatprep.subr.bf16.mxu0 %v6820_v22  ;;  %v6699_v35 = vcombine.low %v251_v23, %v255_v24 }
  0xd7   :  { %v383_v26 = vld [vmem:[#allocation10 + $0x4e0] sm:$0xff]  ;;  %3015 = vmatpush1.bf16.msra.mxu0 %v6819_v28 }
  0xd8   :  { %v6828_v30 = vcombine.high %v379_v25, %v383_v26  ;;  %v259_v31 = vld [vmem:[#allocation10 + $0x100] sm:$0xff]  ;;  %2963 = vmatprep.subr.bf16.mxu1 %v6700_v29  ;;  %v6827_v36 = vcombine.low %v379_v25, %v383_v26 }
  0xd9   :  { %v263_v32 = vld [vmem:[#allocation10 + $0x120] sm:$0xff]  ;;  %2964 = vmatpush1.bf16.msra.mxu1 %v6699_v35 }
  0xda   :  { %v387_v33 = vld [vmem:[#allocation10 + $0x500] sm:$0xff]  ;;  %v6708_v37 = vcombine.high %v259_v31, %v263_v32  ;;  %3016 = vmatprep.subr.bf16.mxu0 %v6828_v30  ;;  %v6707_v43 = vcombine.low %v259_v31, %v263_v32 }
  0xdb   :  { %v391_v34 = vld [vmem:[#allocation10 + $0x520] sm:$0xff]  ;;  %3017 = vmatpush1.bf16.msra.mxu0 %v6827_v36 }
  0xdc   :  { %v6836_v38 = vcombine.high %v387_v33, %v391_v34  ;;  %v267_v39 = vld [vmem:[#allocation10 + $0x140] sm:$0xff]  ;;  %2965 = vmatprep.subr.bf16.mxu1 %v6708_v37  ;;  %v6835_v44 = vcombine.low %v387_v33, %v391_v34 }
  0xdd   :  { %v271_v40 = vld [vmem:[#allocation10 + $0x160] sm:$0xff]  ;;  %2966 = vmatpush1.bf16.msra.mxu1 %v6707_v43 }
  0xde   :  { %v395_v41 = vld [vmem:[#allocation10 + $0x540] sm:$0xff]  ;;  %v6716_v45 = vcombine.high %v267_v39, %v271_v40  ;;  %3018 = vmatprep.subr.bf16.mxu0 %v6836_v38  ;;  %v6715_v51 = vcombine.low %v267_v39, %v271_v40 }
  0xdf   :  { %v399_v42 = vld [vmem:[#allocation10 + $0x560] sm:$0xff]  ;;  %3019 = vmatpush1.bf16.msra.mxu0 %v6835_v44 }
  0xe0   :  { %v6844_v46 = vcombine.high %v395_v41, %v399_v42  ;;  %v275_v47 = vld [vmem:[#allocation10 + $0x180] sm:$0xff]  ;;  %2967 = vmatprep.subr.bf16.mxu1 %v6716_v45  ;;  %v6843_v52 = vcombine.low %v395_v41, %v399_v42 }
  0xe1   :  { %v279_v48 = vld [vmem:[#allocation10 + $0x1a0] sm:$0xff]  ;;  %2968 = vmatpush1.bf16.msra.mxu1 %v6715_v51 }
  0xe2   :  { %v403_v49 = vld [vmem:[#allocation10 + $0x580] sm:$0xff]  ;;  %v6724_v53 = vcombine.high %v275_v47, %v279_v48  ;;  %3020 = vmatprep.subr.bf16.mxu0 %v6844_v46  ;;  %v6723_v0 = vcombine.low %v275_v47, %v279_v48 }
  0xe3   :  { %v407_v50 = vld [vmem:[#allocation10 + $0x5a0] sm:$0xff]  ;;  %3021 = vmatpush1.bf16.msra.mxu0 %v6843_v52 }
  0xe4   :  { %v193_v55 = vld [vmem:[#allocation3 + $0x40] sm:$0xff]  ;;  %v6852_v56 = vcombine.high %v403_v49, %v407_v50  ;;  %2969 = vmatprep.subr.bf16.mxu1 %v6724_v53  ;;  %v6851_v2 = vcombine.low %v403_v49, %v407_v50 }
  0xe5   :  { %v283_v57 = vld [vmem:[#allocation10 + $0x1c0] sm:$0xff]  ;;  %v8660_v59 = vpack.c.bf16 %v193_v55, %v186_v54  ;;  %2970 = vmatpush1.bf16.msra.mxu1 %v6723_v0 }
  0xe6   :  { %v287_v58 = vld [vmem:[#allocation10 + $0x1e0] sm:$0xff]  ;;  %3022 = vmatprep.subr.bf16.mxu0 %v6852_v56 }
  0xe7   :  { %v411_v61 = vld [vmem:[#allocation10 + $0x5c0] sm:$0xff]  ;;  %2989 = vmatprep.mubr.bf16.mxu1 %v8660_v59  ;;  %v6732_v3 = vcombine.high %v283_v57, %v287_v58  ;;  %v6731_v9 = vcombine.low %v283_v57, %v287_v58  ;;  %3023 = vmatpush1.bf16.msra.mxu0 %v6851_v2 }
  0xe8   :  { %v415_v62 = vld [vmem:[#allocation10 + $0x5e0] sm:$0xff] }
  0xe9   :  { %v6860_v4 = vcombine.high %v411_v61, %v415_v62  ;;  %v291_v5 = vld [vmem:[#allocation10 + $0x200] sm:$0xff]  ;;  %2971 = vmatprep.subr.bf16.mxu1 %v6732_v3  ;;  %v6859_v10 = vcombine.low %v411_v61, %v415_v62 }
  0xea   :  { %v295_v6 = vld [vmem:[#allocation10 + $0x220] sm:$0xff]  ;;  %2972 = vmatpush1.bf16.msra.mxu1 %v6731_v9 }
  0xeb   :  { %v419_v7 = vld [vmem:[#allocation10 + $0x600] sm:$0xff]  ;;  %v6740_v11 = vcombine.high %v291_v5, %v295_v6  ;;  %3024 = vmatprep.subr.bf16.mxu0 %v6860_v4  ;;  %v6739_v17 = vcombine.low %v291_v5, %v295_v6 }
  0xec   :  { %v423_v8 = vld [vmem:[#allocation10 + $0x620] sm:$0xff]  ;;  %3025 = vmatpush1.bf16.msra.mxu0 %v6859_v10 }
  0xed   :  { %v6868_v12 = vcombine.high %v419_v7, %v423_v8  ;;  %v299_v13 = vld [vmem:[#allocation10 + $0x240] sm:$0xff]  ;;  %2973 = vmatprep.subr.bf16.mxu1 %v6740_v11  ;;  %v6867_v18 = vcombine.low %v419_v7, %v423_v8  ;;  %v228_v7 = vld [vmem:[#allocation10 + $0x8] sm:$0xff] }
  0xee   :  { %v303_v14 = vld [vmem:[#allocation10 + $0x260] sm:$0xff]  ;;  %2974 = vmatpush1.bf16.msra.mxu1 %v6739_v17  ;;  %v232_v8 = vld [vmem:[#allocation10 + $0x28] sm:$0xff] }
  0xef   :  { %v427_v15 = vld [vmem:[#allocation10 + $0x640] sm:$0xff]  ;;  %v6748_v19 = vcombine.high %v299_v13, %v303_v14  ;;  %3026 = vmatprep.subr.bf16.mxu0 %v6868_v12  ;;  %v6747_v25 = vcombine.low %v299_v13, %v303_v14  ;;  %v192_v13 = vld [vmem:[#allocation3 + $0x38] sm:$0xff]  ;;  %v194_v17 = vld [vmem:[#allocation3 + $0x48] sm:$0xff] }
  0xf0   :  { %v431_v16 = vld [vmem:[#allocation10 + $0x660] sm:$0xff]  ;;  %3027 = vmatpush1.bf16.msra.mxu0 %v6867_v18 }
  0xf1   :  { %v6876_v20 = vcombine.high %v427_v15, %v431_v16  ;;  %v307_v21 = vld [vmem:[#allocation10 + $0x280] sm:$0xff]  ;;  %2975 = vmatprep.subr.bf16.mxu1 %v6748_v19  ;;  %v6875_v26 = vcombine.low %v427_v15, %v431_v16  ;;  %v6678_v15 = vcombine.high %v228_v7, %v232_v8  ;;  %v187_v16 = vld [vmem:[#allocation3 + $0x10] sm:$0xff] }
  0xf2   :  { %v311_v22 = vld [vmem:[#allocation10 + $0x2a0] sm:$0xff]  ;;  %2976 = vmatpush1.bf16.msra.mxu1 %v6747_v25  ;;  %v207_v25 = vld [vmem:[#allocation3 + $0xb0] sm:$0xff] }
  0xf3   :  { %v435_v23 = vld [vmem:[#allocation10 + $0x680] sm:$0xff]  ;;  %v6756_v27 = vcombine.high %v307_v21, %v311_v22  ;;  %3028 = vmatprep.subr.bf16.mxu0 %v6876_v20  ;;  %v6755_v33 = vcombine.low %v307_v21, %v311_v22  ;;  %v236_v20 = vld [vmem:[#allocation10 + $0x48] sm:$0xff] }
  0xf4   :  { %v439_v24 = vld [vmem:[#allocation10 + $0x6a0] sm:$0xff]  ;;  %3029 = vmatpush1.bf16.msra.mxu0 %v6875_v26  ;;  %v240_v21 = vld [vmem:[#allocation10 + $0x68] sm:$0xff]  ;;  %v6677_v26 = vcombine.low %v228_v7, %v232_v8 }
  0xf5   :  { %v6884_v28 = vcombine.high %v435_v23, %v439_v24  ;;  %v315_v29 = vld [vmem:[#allocation10 + $0x2c0] sm:$0xff]  ;;  %2977 = vmatprep.subr.bf16.mxu1 %v6756_v27  ;;  %v6883_v34 = vcombine.low %v435_v23, %v439_v24  ;;  %v200_v24 = vld [vmem:[#allocation3 + $0x78] sm:$0xff]  ;;  %v8668_v27 = vpack.c.bf16 %v194_v17, %v187_v16  ;;  %v268_v8 = vld [vmem:[#allocation10 + $0x148] sm:$0xff] }
  0xf6   :  { %v319_v30 = vld [vmem:[#allocation10 + $0x2e0] sm:$0xff]  ;;  %2978 = vmatpush1.bf16.msra.mxu1 %v6755_v33  ;;  %v244_v33 = vld [vmem:[#allocation10 + $0x88] sm:$0xff] }
  0xf7   :  { %v443_v31 = vld [vmem:[#allocation10 + $0x6c0] sm:$0xff]  ;;  %v6764_v35 = vcombine.high %v315_v29, %v319_v30  ;;  %3030 = vmatprep.subr.bf16.mxu0 %v6884_v28  ;;  %v6763_v41 = vcombine.low %v315_v29, %v319_v30  ;;  %v202_v28 = vld [vmem:[#allocation3 + $0x88] sm:$0xff] }
  0xf8   :  { %v447_v32 = vld [vmem:[#allocation10 + $0x6e0] sm:$0xff]  ;;  %3031 = vmatpush1.bf16.msra.mxu0 %v6883_v34  ;;  %v248_v34 = vld [vmem:[#allocation10 + $0xa8] sm:$0xff] }
  0xf9   :  { %v6892_v36 = vcombine.high %v443_v31, %v447_v32  ;;  %v323_v37 = vld [vmem:[#allocation10 + $0x300] sm:$0xff]  ;;  %2979 = vmatprep.subr.bf16.mxu1 %v6764_v35  ;;  %v6891_v42 = vcombine.low %v443_v31, %v447_v32  ;;  %v6686_v31 = vcombine.high %v236_v20, %v240_v21  ;;  %v8670_v35 = vpack.c.bf16 %v207_v25, %v200_v24  ;;  %v280_v17 = vld [vmem:[#allocation10 + $0x1a8] sm:$0xff] }
  0xfa   :  { %v327_v38 = vld [vmem:[#allocation10 + $0x320] sm:$0xff]  ;;  %2980 = vmatpush1.bf16.msra.mxu1 %v6763_v41  ;;  %v206_v41 = vld [vmem:[#allocation3 + $0xa8] sm:$0xff] }
  0xfb   :  { %v451_v39 = vld [vmem:[#allocation10 + $0x700] sm:$0xff]  ;;  %v6772_v43 = vcombine.high %v323_v37, %v327_v38  ;;  %3032 = vmatprep.subr.bf16.mxu0 %v6892_v36  ;;  %v6771_v49 = vcombine.low %v323_v37, %v327_v38  ;;  %v284_v24 = vld [vmem:[#allocation10 + $0x1c8] sm:$0xff] }
  0xfc   :  { %v455_v40 = vld [vmem:[#allocation10 + $0x720] sm:$0xff]  ;;  %3033 = vmatpush1.bf16.msra.mxu0 %v6891_v42 }
  0xfd   :  { %v6900_v44 = vcombine.high %v451_v39, %v455_v40  ;;  %v331_v45 = vld [vmem:[#allocation10 + $0x340] sm:$0xff]  ;;  %2981 = vmatprep.subr.bf16.mxu1 %v6772_v43  ;;  %v6899_v50 = vcombine.low %v451_v39, %v455_v40  ;;  %v6685_v39 = vcombine.low %v236_v20, %v240_v21  ;;  %v199_v40 = vld [vmem:[#allocation3 + $0x70] sm:$0xff]  ;;  %v6694_v43 = vcombine.high %v244_v33, %v248_v34 }
  0xfe   :  { %v335_v46 = vld [vmem:[#allocation10 + $0x360] sm:$0xff]  ;;  %2982 = vmatpush1.bf16.msra.mxu1 %v6771_v49  ;;  %v256_v49 = vld [vmem:[#allocation10 + $0xe8] sm:$0xff] }
  0xff   :  { %v459_v47 = vld [vmem:[#allocation10 + $0x740] sm:$0xff]  ;;  %v6780_v51 = vcombine.high %v331_v45, %v335_v46  ;;  %3034 = vmatprep.subr.bf16.mxu0 %v6900_v44  ;;  %v6779_v57 = vcombine.low %v331_v45, %v335_v46  ;;  %v208_v45 = vld [vmem:[#allocation3 + $0xb8] sm:$0xff] }
 0x100   :  { %v463_v48 = vld [vmem:[#allocation10 + $0x760] sm:$0xff]  ;;  %3035 = vmatpush1.bf16.msra.mxu0 %v6899_v50 }
 0x101   :  { %v6908_v52 = vcombine.high %v459_v47, %v463_v48  ;;  %v339_v53 = vld [vmem:[#allocation10 + $0x380] sm:$0xff]  ;;  %2983 = vmatprep.subr.bf16.mxu1 %v6780_v51  ;;  %v6907_v58 = vcombine.low %v459_v47, %v463_v48  ;;  %v252_v48 = vld [vmem:[#allocation10 + $0xc8] sm:$0xff]  ;;  %v8677_v51 = vpack.c.bf16 %v206_v41, %v199_v40 }
 0x102   :  { %v343_v54 = vld [vmem:[#allocation10 + $0x3a0] sm:$0xff]  ;;  %2984 = vmatpush1.bf16.msra.mxu1 %v6779_v57  ;;  %v6702_v57 = vcombine.high %v252_v48, %v256_v49 }
 0x103   :  { %v467_v55 = vld [vmem:[#allocation10 + $0x780] sm:$0xff]  ;;  %v6788_v60 = vcombine.high %v339_v53, %v343_v54  ;;  %3036 = vmatprep.subr.bf16.mxu0 %v6908_v52  ;;  %v6787_v3 = vcombine.low %v339_v53, %v343_v54  ;;  %v190_v52 = vld [vmem:[#allocation3 + $0x28] sm:$0xff]  ;;  %v6693_v54 = vcombine.low %v244_v33, %v248_v34 }
 0x104   :  { %v471_v56 = vld [vmem:[#allocation10 + $0x7a0] sm:$0xff]  ;;  %3037 = vmatpush1.bf16.msra.mxu0 %v6907_v58  ;;  %v292_v33 = vld [vmem:[#allocation10 + $0x208] sm:$0xff] }
 0x105   :  { %v6916_v61 = vcombine.high %v467_v55, %v471_v56  ;;  %v347_v62 = vld [vmem:[#allocation10 + $0x3c0] sm:$0xff]  ;;  %2985 = vmatprep.subr.bf16.mxu1 %v6788_v60  ;;  %v6915_v4 = vcombine.low %v467_v55, %v471_v56  ;;  %v260_v60 = vld [vmem:[#allocation10 + $0x108] sm:$0xff] }
 0x106   :  { %v351_v63 = vld [vmem:[#allocation10 + $0x3e0] sm:$0xff]  ;;  %2986 = vmatpush1.bf16.msra.mxu1 %v6787_v3 }
 0x107   :  { %v475_v0 = vld [vmem:[#allocation10 + $0x7c0] sm:$0xff]  ;;  %v6796_v5 = vcombine.high %v347_v62, %v351_v63  ;;  %3038 = vmatprep.subr.bf16.mxu0 %v6916_v61  ;;  %v6795_v11 = vcombine.low %v347_v62, %v351_v63  ;;  %v264_v61 = vld [vmem:[#allocation10 + $0x128] sm:$0xff] }
 0x108   :  { %v479_v2 = vld [vmem:[#allocation10 + $0x7e0] sm:$0xff]  ;;  %3039 = vmatpush1.bf16.msra.mxu0 %v6915_v4  ;;  %v6710_v4 = vcombine.high %v260_v60, %v264_v61 }
 0x109   :  { %v6924_v6 = vcombine.high %v475_v0, %v479_v2  ;;  %v483_v9 = vld [vmem:[#allocation10 + $0x800] sm:$0xff]  ;;  %2987 = vmatprep.subr.bf16.mxu1 %v6796_v5  ;;  %v6923_v14 = vcombine.low %v475_v0, %v479_v2  ;;  %v6701_v2 = vcombine.low %v252_v48, %v256_v49 }
 0x10a   :  { %v487_v10 = vld [vmem:[#allocation10 + $0x820] sm:$0xff]  ;;  %2988 = vmatpush1.bf16.msra.mxu1 %v6795_v11 }
 0x10b   :  { %v185_v12 = vld [vmem:[#allocation3] sm:$0xff]  ;;  %3040 = vmatprep.subr.bf16.mxu0 %v6924_v6  ;;  %v6932_v18 = vcombine.high %v483_v9, %v487_v10  ;;  %v6931_v30 = vcombine.low %v483_v9, %v487_v10  ;;  %3169 = vmatprep.subr.bf16.mxu1 %v6678_v15  ;;  %v272_v9 = vld [vmem:[#allocation10 + $0x168] sm:$0xff]  ;;  %v6709_v10 = vcombine.low %v260_v60, %v264_v61 }
 0x10c   :  { %v491_v19 = vld [vmem:[#allocation10 + $0x840] sm:$0xff]  ;;  %v8666_v22 = vpack.c.bf16 %v192_v13, %v185_v12  ;;  %3041 = vmatpush1.bf16.msra.mxu0 %v6923_v14  ;;  %v6718_v12 = vcombine.high %v268_v8, %v272_v9  ;;  %v276_v15 = vld [vmem:[#allocation10 + $0x188] sm:$0xff] }
 0x10d   :  { %v495_v23 = vld [vmem:[#allocation10 + $0x860] sm:$0xff]  ;;  %3063 = vmatprep.subr.bf16.mxu0 %v6932_v18  ;;  %v6717_v18 = vcombine.low %v268_v8, %v272_v9  ;;  %v6726_v20 = vcombine.high %v276_v15, %v280_v17  ;;  %v324_v8 = vld [vmem:[#allocation10 + $0x308] sm:$0xff] }
 0x10e   :  { %v209_v29 = vld [vmem:[#allocation3 + $0xc0] sm:$0xff]  ;;  %v6940_v32 = vcombine.high %v491_v19, %v495_v23  ;;  %2990 = vmatmul.mubr.bf16.vlgmr.msra.gmra.mrb[0].mxu1 %v8666_v22  ;;  %v6939_v42 = vcombine.low %v491_v19, %v495_v23 }
 0x10f   :  { %v499_v36 = vld [vmem:[#allocation10 + $0x880] sm:$0xff]  ;;  %v8673_v38 = vpack.c.bf16 %v209_v29, %v202_v28  ;;  %3043 = vmatmul.mubr.bf16.vlgmr.msra.gmra.mrb[0].mxu0 %v8668_v27  ;;  %3170 = vmatpush1.bf16.msra.mxu1 %v6677_v26  ;;  %v288_v26 = vld [vmem:[#allocation10 + $0x1e8] sm:$0xff]  ;;  %v6725_v28 = vcombine.low %v276_v15, %v280_v17 }
 0x110   :  { %v503_v37 = vld [vmem:[#allocation10 + $0x8a0] sm:$0xff]  ;;  %3064 = vmatpush1.bf16.msra.mxu0 %v6931_v30  ;;  %3171 = vmatprep.subr.bf16.mxu1 %v6686_v31  ;;  %v6734_v30 = vcombine.high %v284_v24, %v288_v26 }
 0x111   :  { %v201_v44 = vld [vmem:[#allocation3 + $0x80] sm:$0xff]  ;;  %3065 = vmatprep.subr.bf16.mxu0 %v6940_v32  ;;  %v6948_v46 = vcombine.high %v499_v36, %v503_v37  ;;  %2999 = vmatprep.mubr.bf16.mxu1 %v8670_v35  ;;  %v6947_v56 = vcombine.low %v499_v36, %v503_v37  ;;  %v296_v36 = vld [vmem:[#allocation10 + $0x228] sm:$0xff]  ;;  %v6733_v37 = vcombine.low %v284_v24, %v288_v26 }
 0x112   :  { %v507_v47 = vld [vmem:[#allocation10 + $0x8c0] sm:$0xff]  ;;  %3052 = vmatprep.mubr.bf16.mxu0 %v8673_v38  ;;  %v8680_v55 = vpack.c.bf16 %v208_v45, %v201_v44  ;;  %v6742_v40 = vcombine.high %v292_v33, %v296_v36  ;;  %v304_v45 = vld [vmem:[#allocation10 + $0x268] sm:$0xff] }
 0x113   :  { %v511_v50 = vld [vmem:[#allocation10 + $0x8e0] sm:$0xff]  ;;  %3172 = vmatpush1.bf16.msra.mxu1 %v6685_v39 }
 0x114   :  { %v197_v53 = vld [vmem:[#allocation3 + $0x60] sm:$0xff]  ;;  %3066 = vmatpush1.bf16.msra.mxu0 %v6939_v42  ;;  %3173 = vmatprep.subr.bf16.mxu1 %v6694_v43  ;;  %v6956_v58 = vcombine.high %v507_v47, %v511_v50  ;;  %v6955_v3 = vcombine.low %v507_v47, %v511_v50  ;;  %v300_v43 = vld [vmem:[#allocation10 + $0x248] sm:$0xff] }
 0x115   :  { %3067 = vmatprep.subr.bf16.mxu0 %v6948_v46  ;;  %v8682_v62 = vpack.c.bf16 %v197_v53, %v190_v52  ;;  %v515_v63 = vld [vmem:[#allocation10 + $0x900] sm:$0xff]  ;;  %v6741_v46 = vcombine.low %v292_v33, %v296_v36  ;;  %v6750_v48 = vcombine.high %v300_v43, %v304_v45  ;;  %v308_v52 = vld [vmem:[#allocation10 + $0x288] sm:$0xff] }
 0x116   :  { %v519_v0 = vld [vmem:[#allocation10 + $0x920] sm:$0xff]  ;;  %3000 = vmatmul.mubr.bf16.gmra.mrb[4].mxu1 %v8677_v51 }
 0x117   :  { %3174 = vmatpush1.bf16.msra.mxu1 %v6693_v54  ;;  %3053 = vmatmul.mubr.bf16.gmra.mrb[4].mxu0 %v8680_v55  ;;  %v523_v5 = vld [vmem:[#allocation10 + $0x940] sm:$0xff]  ;;  %v6964_v7 = vcombine.high %v515_v63, %v519_v0  ;;  %v6963_v11 = vcombine.low %v515_v63, %v519_v0  ;;  %v312_v54 = vld [vmem:[#allocation10 + $0x2a8] sm:$0xff] }
 0x118   :  { %3068 = vmatpush1.bf16.msra.mxu0 %v6947_v56  ;;  %3175 = vmatprep.subr.bf16.mxu1 %v6702_v57  ;;  %v527_v6 = vld [vmem:[#allocation10 + $0x960] sm:$0xff]  ;;  %v6749_v56 = vcombine.low %v300_v43, %v304_v45  ;;  %v316_v63 = vld [vmem:[#allocation10 + $0x2c8] sm:$0xff] }
 0x119   :  { %3069 = vmatprep.subr.bf16.mxu0 %v6956_v58  ;;  %3095 = vmatprep.mubr.bf16.mxu0 %v8682_v62  ;;  %v531_v13 = vld [vmem:[#allocation10 + $0x980] sm:$0xff]  ;;  %v6972_v16 = vcombine.high %v523_v5, %v527_v6  ;;  %v6971_v19 = vcombine.low %v523_v5, %v527_v6  ;;  %v6758_v58 = vcombine.high %v308_v52, %v312_v54 }
 0x11a   :  { %3201 = vmatprep.mubr.bf16.mxu1 %v8660_v59  ;;  %v535_v14 = vld [vmem:[#allocation10 + $0x9a0] sm:$0xff] }
 0x11b   :  { %3176 = vmatpush1.bf16.msra.mxu1 %v6701_v2  ;;  %v539_v21 = vld [vmem:[#allocation10 + $0x9c0] sm:$0xff]  ;;  %v6980_v25 = vcombine.high %v531_v13, %v535_v14  ;;  %v6979_v29 = vcombine.low %v531_v13, %v535_v14  ;;  %v320_v2 = vld [vmem:[#allocation10 + $0x2e8] sm:$0xff] }
 0x11c   :  { %3070 = vmatpush1.bf16.msra.mxu0 %v6955_v3  ;;  %3177 = vmatprep.subr.bf16.mxu1 %v6710_v4  ;;  %v543_v23 = vld [vmem:[#allocation10 + $0x9e0] sm:$0xff]  ;;  %v6757_v3 = vcombine.low %v308_v52, %v312_v54  ;;  %v6766_v5 = vcombine.high %v316_v63, %v320_v2 }
 0x11d   :  { %3071 = vmatprep.subr.bf16.mxu0 %v6964_v7  ;;  %v547_v31 = vld [vmem:[#allocation10 + $0xa00] sm:$0xff]  ;;  %v6988_v34 = vcombine.high %v539_v21, %v543_v23  ;;  %v6987_v39 = vcombine.low %v539_v21, %v543_v23 }
 0x11e   :  { %v551_v32 = vld [vmem:[#allocation10 + $0xa20] sm:$0xff] }
 0x11f   :  { %3178 = vmatpush1.bf16.msra.mxu1 %v6709_v10  ;;  %v555_v41 = vld [vmem:[#allocation10 + $0xa40] sm:$0xff]  ;;  %v6996_v44 = vcombine.high %v547_v31, %v551_v32  ;;  %v6995_v47 = vcombine.low %v547_v31, %v551_v32  ;;  %v328_v10 = vld [vmem:[#allocation10 + $0x328] sm:$0xff] }
 0x120   :  { %3072 = vmatpush1.bf16.msra.mxu0 %v6963_v11  ;;  %3179 = vmatprep.subr.bf16.mxu1 %v6718_v12  ;;  %v559_v42 = vld [vmem:[#allocation10 + $0xa60] sm:$0xff]  ;;  %v6765_v11 = vcombine.low %v316_v63, %v320_v2  ;;  %v6774_v13 = vcombine.high %v324_v8, %v328_v10 }
 0x121   :  { %3073 = vmatprep.subr.bf16.mxu0 %v6972_v16  ;;  %v563_v49 = vld [vmem:[#allocation10 + $0xa80] sm:$0xff]  ;;  %v7004_v53 = vcombine.high %v555_v41, %v559_v42  ;;  %v7003_v57 = vcombine.low %v555_v41, %v559_v42  ;;  %v332_v16 = vld [vmem:[#allocation10 + $0x348] sm:$0xff] }
 0x122   :  { %v567_v50 = vld [vmem:[#allocation10 + $0xaa0] sm:$0xff] }
 0x123   :  { %3180 = vmatpush1.bf16.msra.mxu1 %v6717_v18  ;;  %v571_v60 = vld [vmem:[#allocation10 + $0xac0] sm:$0xff]  ;;  %v7012_v0 = vcombine.high %v563_v49, %v567_v50  ;;  %v7011_v4 = vcombine.low %v563_v49, %v567_v50  ;;  %v336_v18 = vld [vmem:[#allocation10 + $0x368] sm:$0xff] }
 0x124   :  { %3074 = vmatpush1.bf16.msra.mxu0 %v6971_v19  ;;  %3181 = vmatprep.subr.bf16.mxu1 %v6726_v20  ;;  %v575_v61 = vld [vmem:[#allocation10 + $0xae0] sm:$0xff]  ;;  %v6773_v19 = vcombine.low %v324_v8, %v328_v10  ;;  %v6782_v21 = vcombine.high %v332_v16, %v336_v18  ;;  %v376_v8 = vld [vmem:[#allocation10 + $0x4a8] sm:$0xff] }
 0x125   :  { %3075 = vmatprep.subr.bf16.mxu0 %v6980_v25  ;;  %v579_v6 = vld [vmem:[#allocation10 + $0xb00] sm:$0xff]  ;;  %v7020_v9 = vcombine.high %v571_v60, %v575_v61  ;;  %v7019_v12 = vcombine.low %v571_v60, %v575_v61  ;;  %v340_v25 = vld [vmem:[#allocation10 + $0x388] sm:$0xff]  ;;  %v211_v61 = vld [vmem:[#allocation3 + $0xd0] sm:$0xff] }
 0x126   :  { %v583_v7 = vld [vmem:[#allocation10 + $0xb20] sm:$0xff] }
 0x127   :  { %3182 = vmatpush1.bf16.msra.mxu1 %v6725_v28  ;;  %v587_v14 = vld [vmem:[#allocation10 + $0xb40] sm:$0xff]  ;;  %v7028_v17 = vcombine.high %v579_v6, %v583_v7  ;;  %v7027_v20 = vcombine.low %v579_v6, %v583_v7  ;;  %v344_v28 = vld [vmem:[#allocation10 + $0x3a8] sm:$0xff] }
 0x128   :  { %3076 = vmatpush1.bf16.msra.mxu0 %v6979_v29  ;;  %3183 = vmatprep.subr.bf16.mxu1 %v6734_v30  ;;  %v591_v15 = vld [vmem:[#allocation10 + $0xb60] sm:$0xff]  ;;  %v6781_v29 = vcombine.low %v332_v16, %v336_v18  ;;  %v6790_v31 = vcombine.high %v340_v25, %v344_v28  ;;  %v372_v6 = vld [vmem:[#allocation10 + $0x488] sm:$0xff]  ;;  %v203_v16 = vld [vmem:[#allocation3 + $0x90] sm:$0xff] }
 0x129   :  { %3077 = vmatprep.subr.bf16.mxu0 %v6988_v34  ;;  %v595_v23 = vld [vmem:[#allocation10 + $0xb80] sm:$0xff]  ;;  %v7036_v26 = vcombine.high %v587_v14, %v591_v15  ;;  %v7035_v30 = vcombine.low %v587_v14, %v591_v15  ;;  %v348_v34 = vld [vmem:[#allocation10 + $0x3c8] sm:$0xff] }
 0x12a   :  { %v599_v24 = vld [vmem:[#allocation10 + $0xba0] sm:$0xff]  ;;  %v380_v15 = vld [vmem:[#allocation10 + $0x4c8] sm:$0xff] }
 0x12b   :  { %3184 = vmatpush1.bf16.msra.mxu1 %v6733_v37  ;;  %v603_v32 = vld [vmem:[#allocation10 + $0xbc0] sm:$0xff]  ;;  %v7044_v36 = vcombine.high %v595_v23, %v599_v24  ;;  %v352_v37 = vld [vmem:[#allocation10 + $0x3e8] sm:$0xff] }
 0x12c   :  { %3078 = vmatpush1.bf16.msra.mxu0 %v6987_v39  ;;  %3185 = vmatprep.subr.bf16.mxu1 %v6742_v40  ;;  %v607_v33 = vld [vmem:[#allocation10 + $0xbe0] sm:$0xff]  ;;  %v6789_v39 = vcombine.low %v340_v25, %v344_v28  ;;  %v7043_v40 = vcombine.low %v595_v23, %v599_v24  ;;  %v6798_v41 = vcombine.high %v348_v34, %v352_v37  ;;  %v388_v28 = vld [vmem:[#allocation10 + $0x508] sm:$0xff] }
 0x12d   :  { %3079 = vmatprep.subr.bf16.mxu0 %v6996_v44  ;;  %v611_v42 = vld [vmem:[#allocation10 + $0xc00] sm:$0xff]  ;;  %v356_v44 = vld [vmem:[#allocation10 + $0x408] sm:$0xff]  ;;  %v7052_v45 = vcombine.high %v603_v32, %v607_v33  ;;  %v6797_v49 = vcombine.low %v348_v34, %v352_v37  ;;  %v7051_v50 = vcombine.low %v603_v32, %v607_v33 }
 0x12e   :  { %v615_v43 = vld [vmem:[#allocation10 + $0xc20] sm:$0xff]  ;;  %v396_v37 = vld [vmem:[#allocation10 + $0x548] sm:$0xff] }
 0x12f   :  { %3186 = vmatpush1.bf16.msra.mxu1 %v6741_v46  ;;  %v360_v46 = vld [vmem:[#allocation10 + $0x428] sm:$0xff]  ;;  %v623_v54 = vld [vmem:[#allocation10 + $0xc60] sm:$0xff]  ;;  %v7060_v60 = vcombine.high %v611_v42, %v615_v43  ;;  %v7059_v2 = vcombine.low %v611_v42, %v615_v43 }
 0x130   :  { %3080 = vmatpush1.bf16.msra.mxu0 %v6995_v47  ;;  %3187 = vmatprep.subr.bf16.mxu1 %v6750_v48  ;;  %v189_v47 = vld [vmem:[#allocation3 + $0x20] sm:$0xff]  ;;  %v196_v48 = vld [vmem:[#allocation3 + $0x58] sm:$0xff]  ;;  %v6806_v52 = vcombine.high %v356_v44, %v360_v46  ;;  %v6805_v63 = vcombine.low %v356_v44, %v360_v46 }
 0x131   :  { %3081 = vmatprep.subr.bf16.mxu0 %v7004_v53  ;;  %v619_v53 = vld [vmem:[#allocation10 + $0xc40] sm:$0xff] }
 0x132   :  { %v7068_v7 = vcombine.high %v619_v53, %v623_v54  ;;  %v639_v14 = vld [vmem:[#allocation10 + $0xce0] sm:$0xff] }
 0x133   :  { %3188 = vmatpush1.bf16.msra.mxu1 %v6749_v56  ;;  %v364_v56 = vld [vmem:[#allocation10 + $0x448] sm:$0xff]  ;;  %v643_v25 = vld [vmem:[#allocation10 + $0xd00] sm:$0xff] }
 0x134   :  { %3082 = vmatpush1.bf16.msra.mxu0 %v7003_v57  ;;  %3189 = vmatprep.subr.bf16.mxu1 %v6758_v58  ;;  %v368_v57 = vld [vmem:[#allocation10 + $0x468] sm:$0xff]  ;;  %v204_v58 = vld [vmem:[#allocation3 + $0x98] sm:$0xff]  ;;  %v651_v34 = vld [vmem:[#allocation10 + $0xd40] sm:$0xff] }
 0x135   :  { %3083 = vmatprep.subr.bf16.mxu0 %v7012_v0  ;;  %v8688_v0 = vpack.c.bf16 %v196_v48, %v189_v47  ;;  %v6813_v10 = vcombine.low %v364_v56, %v368_v57  ;;  %v663_v46 = vld [vmem:[#allocation10 + $0xda0] sm:$0xff]  ;;  %v404_v47 = vld [vmem:[#allocation10 + $0x588] sm:$0xff] }
 0x137   :  { %3190 = vmatpush1.bf16.msra.mxu1 %v6757_v3  ;;  %v6814_v3 = vcombine.high %v364_v56, %v368_v57  ;;  %v671_v56 = vld [vmem:[#allocation10 + $0xde0] sm:$0xff] }
 0x138   :  { %3084 = vmatpush1.bf16.msra.mxu0 %v7011_v4  ;;  %3191 = vmatprep.subr.bf16.mxu1 %v6766_v5  ;;  %v627_v4 = vld [vmem:[#allocation10 + $0xc80] sm:$0xff] }
 0x139   :  { %3085 = vmatprep.subr.bf16.mxu0 %v7020_v9  ;;  %v631_v5 = vld [vmem:[#allocation10 + $0xca0] sm:$0xff]  ;;  %v8690_v9 = vpack.c.bf16 %v211_v61, %v204_v58  ;;  %v412_v58 = vld [vmem:[#allocation10 + $0x5c8] sm:$0xff] }
 0x13a   :  { %v7076_v18 = vcombine.high %v627_v4, %v631_v5  ;;  %v7075_v23 = vcombine.low %v627_v4, %v631_v5  ;;  %v424_v4 = vld [vmem:[#allocation10 + $0x628] sm:$0xff]  ;;  %v229_v5 = vld [vmem:[#allocation10 + $0x10] sm:$0xff] }
 0x13b   :  { %3192 = vmatpush1.bf16.msra.mxu1 %v6765_v11  ;;  %v7067_v11 = vcombine.low %v619_v53, %v623_v54  ;;  %v667_v54 = vld [vmem:[#allocation10 + $0xdc0] sm:$0xff] }
 0x13c   :  { %3086 = vmatpush1.bf16.msra.mxu0 %v7019_v12  ;;  %3193 = vmatprep.subr.bf16.mxu1 %v6774_v13  ;;  %v6822_v12 = vcombine.high %v372_v6, %v376_v8  ;;  %v635_v13 = vld [vmem:[#allocation10 + $0xcc0] sm:$0xff] }
 0x13d   :  { %3087 = vmatprep.subr.bf16.mxu0 %v7028_v17  ;;  %v210_v17 = vld [vmem:[#allocation3 + $0xc8] sm:$0xff]  ;;  %v7083_v32 = vcombine.low %v635_v13, %v639_v14 }
 0x13f   :  { %3194 = vmatpush1.bf16.msra.mxu1 %v6773_v19  ;;  %v384_v19 = vld [vmem:[#allocation10 + $0x4e8] sm:$0xff] }
 0x140   :  { %3088 = vmatpush1.bf16.msra.mxu0 %v7027_v20  ;;  %3195 = vmatprep.subr.bf16.mxu1 %v6782_v21  ;;  %v6821_v20 = vcombine.low %v372_v6, %v376_v8  ;;  %v8696_v21 = vpack.c.bf16 %v210_v17, %v203_v16  ;;  %v6830_v24 = vcombine.high %v380_v15, %v384_v19  ;;  %v191_v8 = vld [vmem:[#allocation3 + $0x30] sm:$0xff] }
 0x141   :  { %3089 = vmatprep.subr.bf16.mxu0 %v7036_v26  ;;  %v647_v26 = vld [vmem:[#allocation10 + $0xd20] sm:$0xff]  ;;  %v7116_v6 = vcombine.high %v667_v54, %v671_v56  ;;  %v237_v16 = vld [vmem:[#allocation10 + $0x50] sm:$0xff] }
 0x142   :  { %v7091_v43 = vcombine.low %v643_v25, %v647_v26 }
 0x143   :  { %3196 = vmatpush1.bf16.msra.mxu1 %v6781_v29  ;;  %v7084_v29 = vcombine.high %v635_v13, %v639_v14  ;;  %v428_v14 = vld [vmem:[#allocation10 + $0x648] sm:$0xff] }
 0x144   :  { %3090 = vmatpush1.bf16.msra.mxu0 %v7035_v30  ;;  %3197 = vmatprep.subr.bf16.mxu1 %v6790_v31  ;;  %v392_v30 = vld [vmem:[#allocation10 + $0x528] sm:$0xff]  ;;  %v6829_v31 = vcombine.low %v380_v15, %v384_v19 }
 0x145   :  { %3091 = vmatprep.subr.bf16.mxu0 %v7044_v36  ;;  %v6838_v33 = vcombine.high %v388_v28, %v392_v30  ;;  %v655_v36 = vld [vmem:[#allocation10 + $0xd60] sm:$0xff]  ;;  %v6837_v42 = vcombine.low %v388_v28, %v392_v30  ;;  %v432_v15 = vld [vmem:[#allocation10 + $0x668] sm:$0xff]  ;;  %v245_v28 = vld [vmem:[#allocation10 + $0x90] sm:$0xff] }
 0x146   :  { %v7100_v48 = vcombine.high %v651_v34, %v655_v36  ;;  %v249_v30 = vld [vmem:[#allocation10 + $0xb0] sm:$0xff] }
 0x147   :  { %3198 = vmatpush1.bf16.msra.mxu1 %v6789_v39  ;;  %v7092_v39 = vcombine.high %v643_v25, %v647_v26  ;;  %v436_v25 = vld [vmem:[#allocation10 + $0x688] sm:$0xff] }
 0x148   :  { %3092 = vmatpush1.bf16.msra.mxu0 %v7043_v40  ;;  %3199 = vmatprep.subr.bf16.mxu1 %v6798_v41  ;;  %v400_v40 = vld [vmem:[#allocation10 + $0x568] sm:$0xff]  ;;  %v8446_v41 = vmov 0  }
 0x149   :  { %3093 = vmatprep.subr.bf16.mxu0 %v7052_v45  ;;  %v6846_v44 = vcombine.high %v396_v37, %v400_v40  ;;  %v659_v45 = vld [vmem:[#allocation10 + $0xd80] sm:$0xff]  ;;  %v440_v26 = vld [vmem:[#allocation10 + $0x6a8] sm:$0xff] }
 0x14a   :  { %v7108_v57 = vcombine.high %v659_v45, %v663_v46 }
 0x14b   :  { %3200 = vmatpush1.bf16.msra.mxu1 %v6797_v49  ;;  %v408_v49 = vld [vmem:[#allocation10 + $0x5a8] sm:$0xff] }
 0x14c   :  { %3094 = vmatpush1.bf16.msra.mxu0 %v7051_v50  ;;  %3222 = vmatprep.subr.bf16.mxu1 %v6806_v52  ;;  %v6845_v50 = vcombine.low %v396_v37, %v400_v40  ;;  %v7099_v52 = vcombine.low %v651_v34, %v655_v36  ;;  %v6854_v53 = vcombine.high %v404_v47, %v408_v49  ;;  %v444_v37 = vld [vmem:[#allocation10 + $0x6c8] sm:$0xff]  ;;  %v253_v40 = vld [vmem:[#allocation10 + $0xd0] sm:$0xff] }
 0x14d   :  { %3116 = vmatprep.subr.bf16.mxu0 %v7060_v60  ;;  %v416_v60 = vld [vmem:[#allocation10 + $0x5e8] sm:$0xff]  ;;  %v6853_v61 = vcombine.low %v404_v47, %v408_v49  ;;  %v6886_v36 = vcombine.high %v436_v25, %v440_v26 }
 0x14e   :  { %3202 = vmatmul.mubr.bf16.vlgmr.msra.gmra.mrb[8].mxu1 %v8666_v22  ;;  %v456_v49 = vld [vmem:[#allocation10 + $0x728] sm:$0xff] }
 0x14f   :  { %3096 = vmatmul.mubr.bf16.vlgmr.msra.gmra.mrb[0].mxu0 %v8688_v0  ;;  %3223 = vmatpush1.bf16.msra.mxu1 %v6805_v63  ;;  %v7107_v63 = vcombine.low %v659_v45, %v663_v46  ;;  %v6885_v45 = vcombine.low %v436_v25, %v440_v26  ;;  %v6695_v46 = vcombine.low %v245_v28, %v249_v30  ;;  %v484_v26 = vld [vmem:[#allocation10 + $0x808] sm:$0xff] }
 0x150   :  { %3117 = vmatpush1.bf16.msra.mxu0 %v7059_v2  ;;  %3224 = vmatprep.subr.bf16.mxu1 %v6814_v3  ;;  %v6862_v2 = vcombine.high %v412_v58, %v416_v60  ;;  %v420_v3 = vld [vmem:[#allocation10 + $0x608] sm:$0xff] }
 0x151   :  { %3118 = vmatprep.subr.bf16.mxu0 %v7068_v7  ;;  %3105 = vmatprep.mubr.bf16.mxu0 %v8690_v9  ;;  %v233_v7 = vld [vmem:[#allocation10 + $0x30] sm:$0xff]  ;;  %v6870_v13 = vcombine.high %v420_v3, %v424_v4 }
 0x152   :  { %3211 = vmatprep.mubr.bf16.mxu1 %v8670_v35  ;;  %v6680_v17 = vcombine.high %v229_v5, %v233_v7 }
 0x153   :  { %3225 = vmatpush1.bf16.msra.mxu1 %v6813_v10  ;;  %v198_v10 = vld [vmem:[#allocation3 + $0x68] sm:$0xff] }
 0x154   :  { %3119 = vmatpush1.bf16.msra.mxu0 %v7067_v11  ;;  %3226 = vmatprep.subr.bf16.mxu1 %v6822_v12  ;;  %v6861_v11 = vcombine.low %v412_v58, %v416_v60  ;;  %v7115_v12 = vcombine.low %v667_v54, %v671_v56  ;;  %v8702_v19 = vpack.c.bf16 %v198_v10, %v191_v8  ;;  %v460_v58 = vld [vmem:[#allocation10 + $0x748] sm:$0xff]  ;;  %v277_v8 = vld [vmem:[#allocation10 + $0x190] sm:$0xff] }
 0x155   :  { %3120 = vmatprep.subr.bf16.mxu0 %v7076_v18  ;;  %v241_v18 = vld [vmem:[#allocation10 + $0x70] sm:$0xff]  ;;  %v464_v60 = vld [vmem:[#allocation10 + $0x768] sm:$0xff] }
 0x156   :  { %3212 = vmatmul.mubr.bf16.gmra.mrb[12].mxu1 %v8677_v51  ;;  %v6687_v34 = vcombine.low %v237_v16, %v241_v18 }
 0x157   :  { %3227 = vmatpush1.bf16.msra.mxu1 %v6821_v20  ;;  %3106 = vmatmul.mubr.bf16.gmra.mrb[4].mxu0 %v8696_v21  ;;  %v6869_v20 = vcombine.low %v420_v3, %v424_v4 }
 0x158   :  { %3121 = vmatpush1.bf16.msra.mxu0 %v7075_v23  ;;  %3228 = vmatprep.subr.bf16.mxu1 %v6830_v24  ;;  %v6679_v23 = vcombine.low %v229_v5, %v233_v7  ;;  %v6878_v24 = vcombine.high %v428_v14, %v432_v15  ;;  %v6910_v5 = vcombine.high %v460_v58, %v464_v60  ;;  %v472_v7 = vld [vmem:[#allocation10 + $0x7a8] sm:$0xff] }
 0x159   :  { %3122 = vmatprep.subr.bf16.mxu0 %v7084_v29  ;;  %3148 = vmatprep.mubr.bf16.mxu0 %v8446_v41  ;;  %v6688_v29 = vcombine.high %v237_v16, %v241_v18  ;;  %v480_v16 = vld [vmem:[#allocation10 + $0x7e8] sm:$0xff] }
 0x15a   :  { %3254 = vmatprep.mubr.bf16.mxu1 %v8663_v1 }
 0x15b   :  { %3229 = vmatpush1.bf16.msra.mxu1 %v6829_v31  ;;  %v205_v31 = vld [vmem:[#allocation3 + $0xa0] sm:$0xff] }
 0x15c   :  { %3123 = vmatpush1.bf16.msra.mxu0 %v7083_v32  ;;  %3230 = vmatprep.subr.bf16.mxu1 %v6838_v33  ;;  %v212_v32 = vld [vmem:[#allocation3 + $0xd8] sm:$0xff]  ;;  %v6877_v33 = vcombine.low %v428_v14, %v432_v15  ;;  %v476_v15 = vld [vmem:[#allocation10 + $0x7c8] sm:$0xff] }
 0x15d   :  { %3124 = vmatprep.subr.bf16.mxu0 %v7092_v39  ;;  %v448_v39 = vld [vmem:[#allocation10 + $0x6e8] sm:$0xff]  ;;  %v6926_v25 = vcombine.high %v476_v15, %v480_v16 }
 0x15e   :  { %v6894_v47 = vcombine.high %v444_v37, %v448_v39  ;;  %v6893_v54 = vcombine.low %v444_v37, %v448_v39  ;;  %v496_v37 = vld [vmem:[#allocation10 + $0x868] sm:$0xff]  ;;  %v301_v39 = vld [vmem:[#allocation10 + $0x250] sm:$0xff] }
 0x15f   :  { %3231 = vmatpush1.bf16.msra.mxu1 %v6837_v42  ;;  %v6696_v42 = vcombine.high %v245_v28, %v249_v30  ;;  %v488_v28 = vld [vmem:[#allocation10 + $0x828] sm:$0xff] }
 0x160   :  { %3125 = vmatpush1.bf16.msra.mxu0 %v7091_v43  ;;  %3232 = vmatprep.subr.bf16.mxu1 %v6846_v44  ;;  %v257_v43 = vld [vmem:[#allocation10 + $0xf0] sm:$0xff]  ;;  %v8706_v44 = vpack.c.bf16 %v212_v32, %v205_v31  ;;  %v6925_v32 = vcombine.low %v476_v15, %v480_v16  ;;  %v528_v15 = vld [vmem:[#allocation10 + $0x968] sm:$0xff] }
 0x161   :  { %3126 = vmatprep.subr.bf16.mxu0 %v7100_v48  ;;  %v452_v48 = vld [vmem:[#allocation10 + $0x708] sm:$0xff]  ;;  %v6703_v56 = vcombine.low %v253_v40, %v257_v43  ;;  %v297_v31 = vld [vmem:[#allocation10 + $0x230] sm:$0xff] }
 0x162   :  { %v6901_v3 = vcombine.low %v452_v48, %v456_v49  ;;  %v333_v16 = vld [vmem:[#allocation10 + $0x350] sm:$0xff] }
 0x163   :  { %3233 = vmatpush1.bf16.msra.mxu1 %v6845_v50  ;;  %v261_v50 = vld [vmem:[#allocation10 + $0x110] sm:$0xff] }
 0x164   :  { %3127 = vmatpush1.bf16.msra.mxu0 %v7099_v52  ;;  %3234 = vmatprep.subr.bf16.mxu1 %v6854_v53  ;;  %v6704_v52 = vcombine.high %v253_v40, %v257_v43  ;;  %v265_v53 = vld [vmem:[#allocation10 + $0x130] sm:$0xff]  ;;  %v6933_v43 = vcombine.low %v484_v26, %v488_v28 }
 0x165   :  { %3128 = vmatprep.subr.bf16.mxu0 %v7108_v57  ;;  %v6902_v57 = vcombine.high %v452_v48, %v456_v49  ;;  %v6711_v4 = vcombine.low %v261_v50, %v265_v53  ;;  %v504_v48 = vld [vmem:[#allocation10 + $0x8a8] sm:$0xff]  ;;  %v309_v49 = vld [vmem:[#allocation10 + $0x290] sm:$0xff] }
 0x167   :  { %3235 = vmatpush1.bf16.msra.mxu1 %v6853_v61  ;;  %v269_v61 = vld [vmem:[#allocation10 + $0x150] sm:$0xff] }
 0x168   :  { %3129 = vmatpush1.bf16.msra.mxu0 %v7107_v63  ;;  %3236 = vmatprep.subr.bf16.mxu1 %v6862_v2  ;;  %v6712_v63 = vcombine.high %v261_v50, %v265_v53  ;;  %v273_v2 = vld [vmem:[#allocation10 + $0x170] sm:$0xff] }
 0x169   :  { %3130 = vmatprep.subr.bf16.mxu0 %v7116_v6  ;;  %v468_v6 = vld [vmem:[#allocation10 + $0x788] sm:$0xff]  ;;  %v6720_v10 = vcombine.high %v269_v61, %v273_v2 }
 0x16a   :  { %v6918_v14 = vcombine.high %v468_v6, %v472_v7 }
 0x16b   :  { %3237 = vmatpush1.bf16.msra.mxu1 %v6861_v11  ;;  %v281_v11 = vld [vmem:[#allocation10 + $0x1b0] sm:$0xff] }
 0x16c   :  { %3131 = vmatpush1.bf16.msra.mxu0 %v7115_v12  ;;  %3238 = vmatprep.subr.bf16.mxu1 %v6870_v13  ;;  %v6909_v12 = vcombine.low %v460_v58, %v464_v60  ;;  %v6719_v13 = vcombine.low %v269_v61, %v273_v2  ;;  %v6728_v18 = vcombine.high %v277_v8, %v281_v11  ;;  %v512_v58 = vld [vmem:[#allocation10 + $0x8e8] sm:$0xff]  ;;  %v317_v60 = vld [vmem:[#allocation10 + $0x2d0] sm:$0xff] }
 0x16d   :  { %3381 = vmatprep.subr.bf16.mxu0 %v6680_v17  ;;  %v285_v17 = vld [vmem:[#allocation10 + $0x1d0] sm:$0xff] }
 0x16f   :  { %3149 = vmatmul.mubr.bf16.vlgmr.msra.gmra.mrb[0].mxu0 %v8702_v19  ;;  %3239 = vmatpush1.bf16.msra.mxu1 %v6869_v20  ;;  %v289_v20 = vld [vmem:[#allocation10 + $0x1f0] sm:$0xff] }
 0x170   :  { %3382 = vmatpush1.bf16.msra.mxu0 %v6679_v23  ;;  %3240 = vmatprep.subr.bf16.mxu1 %v6878_v24  ;;  %v6917_v23 = vcombine.low %v468_v6, %v472_v7  ;;  %v6727_v24 = vcombine.low %v277_v8, %v281_v11  ;;  %v6736_v30 = vcombine.high %v285_v17, %v289_v20  ;;  %v520_v6 = vld [vmem:[#allocation10 + $0x928] sm:$0xff]  ;;  %v325_v7 = vld [vmem:[#allocation10 + $0x310] sm:$0xff] }
 0x171   :  { %3383 = vmatprep.subr.bf16.mxu0 %v6688_v29  ;;  %3158 = vmatprep.mubr.bf16.mxu0 %v8446_v41  ;;  %v293_v29 = vld [vmem:[#allocation10 + $0x210] sm:$0xff] }
 0x172   :  { %v6744_v40 = vcombine.high %v293_v29, %v297_v31 }
 0x173   :  { %3241 = vmatpush1.bf16.msra.mxu1 %v6877_v33  ;;  %v6735_v33 = vcombine.low %v285_v17, %v289_v20 }
 0x174   :  { %3384 = vmatpush1.bf16.msra.mxu0 %v6687_v34  ;;  %3242 = vmatprep.subr.bf16.mxu1 %v6886_v36  ;;  %v6934_v34 = vcombine.high %v484_v26, %v488_v28  ;;  %v492_v36 = vld [vmem:[#allocation10 + $0x848] sm:$0xff]  ;;  %v341_v28 = vld [vmem:[#allocation10 + $0x390] sm:$0xff] }
 0x175   :  { %3385 = vmatprep.subr.bf16.mxu0 %v6696_v42  ;;  %v305_v42 = vld [vmem:[#allocation10 + $0x270] sm:$0xff]  ;;  %v6941_v53 = vcombine.low %v492_v36, %v496_v37  ;;  %v536_v26 = vld [vmem:[#allocation10 + $0x9a8] sm:$0xff] }
 0x176   :  { %v6752_v50 = vcombine.high %v301_v39, %v305_v42 }
 0x177   :  { %3159 = vmatmul.mubr.bf16.gmra.mrb[4].mxu0 %v8706_v44  ;;  %3243 = vmatpush1.bf16.msra.mxu1 %v6885_v45  ;;  %v6743_v45 = vcombine.low %v293_v29, %v297_v31 }
 0x178   :  { %3386 = vmatpush1.bf16.msra.mxu0 %v6695_v46  ;;  %3244 = vmatprep.subr.bf16.mxu1 %v6894_v47  ;;  %v6942_v46 = vcombine.high %v492_v36, %v496_v37  ;;  %v500_v47 = vld [vmem:[#allocation10 + $0x888] sm:$0xff]  ;;  %v349_v37 = vld [vmem:[#allocation10 + $0x3d0] sm:$0xff] }
 0x179   :  { %3387 = vmatprep.subr.bf16.mxu0 %v6704_v52  ;;  %3413 = vmatprep.mubr.bf16.mxu0 %v8660_v59  ;;  %v313_v52 = vld [vmem:[#allocation10 + $0x2b0] sm:$0xff]  ;;  %v6949_v2 = vcombine.low %v500_v47, %v504_v48  ;;  %v544_v36 = vld [vmem:[#allocation10 + $0x9e8] sm:$0xff] }
 0x17a   :  { %v6760_v61 = vcombine.high %v309_v49, %v313_v52 }
 0x17b   :  { %3245 = vmatpush1.bf16.msra.mxu1 %v6893_v54  ;;  %v6751_v54 = vcombine.low %v301_v39, %v305_v42 }
 0x17c   :  { %3388 = vmatpush1.bf16.msra.mxu0 %v6703_v56  ;;  %3246 = vmatprep.subr.bf16.mxu1 %v6902_v57  ;;  %v6950_v56 = vcombine.high %v500_v47, %v504_v48  ;;  %v508_v57 = vld [vmem:[#allocation10 + $0x8c8] sm:$0xff]  ;;  %v357_v48 = vld [vmem:[#allocation10 + $0x410] sm:$0xff] }
 0x17d   :  { %3389 = vmatprep.subr.bf16.mxu0 %v6712_v63  ;;  %v321_v63 = vld [vmem:[#allocation10 + $0x2f0] sm:$0xff]  ;;  %v6957_v11 = vcombine.low %v508_v57, %v512_v58  ;;  %v552_v47 = vld [vmem:[#allocation10 + $0xa28] sm:$0xff] }
 0x17e   :  { %v6768_v8 = vcombine.high %v317_v60, %v321_v63 }
 0x17f   :  { %3247 = vmatpush1.bf16.msra.mxu1 %v6901_v3  ;;  %v6759_v3 = vcombine.low %v309_v49, %v313_v52 }
 0x180   :  { %3390 = vmatpush1.bf16.msra.mxu0 %v6711_v4  ;;  %3248 = vmatprep.subr.bf16.mxu1 %v6910_v5  ;;  %v6958_v4 = vcombine.high %v508_v57, %v512_v58  ;;  %v516_v5 = vld [vmem:[#allocation10 + $0x908] sm:$0xff]  ;;  %v365_v58 = vld [vmem:[#allocation10 + $0x450] sm:$0xff] }
 0x181   :  { %3391 = vmatprep.subr.bf16.mxu0 %v6720_v10  ;;  %v329_v10 = vld [vmem:[#allocation10 + $0x330] sm:$0xff]  ;;  %v6965_v20 = vcombine.low %v516_v5, %v520_v6  ;;  %v560_v57 = vld [vmem:[#allocation10 + $0xa68] sm:$0xff] }
 0x182   :  { %v6776_v17 = vcombine.high %v325_v7, %v329_v10 }
 0x183   :  { %3249 = vmatpush1.bf16.msra.mxu1 %v6909_v12  ;;  %v6767_v12 = vcombine.low %v317_v60, %v321_v63 }
 0x184   :  { %3392 = vmatpush1.bf16.msra.mxu0 %v6719_v13  ;;  %3250 = vmatprep.subr.bf16.mxu1 %v6918_v14  ;;  %v6966_v13 = vcombine.high %v516_v5, %v520_v6  ;;  %v524_v14 = vld [vmem:[#allocation10 + $0x948] sm:$0xff]  ;;  %v373_v6 = vld [vmem:[#allocation10 + $0x490] sm:$0xff] }
 0x185   :  { %3393 = vmatprep.subr.bf16.mxu0 %v6728_v18  ;;  %v337_v18 = vld [vmem:[#allocation10 + $0x370] sm:$0xff]  ;;  %v6973_v31 = vcombine.low %v524_v14, %v528_v15  ;;  %v568_v5 = vld [vmem:[#allocation10 + $0xaa8] sm:$0xff] }
 0x186   :  { %v6784_v29 = vcombine.high %v333_v16, %v337_v18 }
 0x187   :  { %3251 = vmatpush1.bf16.msra.mxu1 %v6917_v23  ;;  %v6775_v23 = vcombine.low %v325_v7, %v329_v10 }
 0x188   :  { %3394 = vmatpush1.bf16.msra.mxu0 %v6727_v24  ;;  %3252 = vmatprep.subr.bf16.mxu1 %v6926_v25  ;;  %v6974_v24 = vcombine.high %v524_v14, %v528_v15  ;;  %v532_v25 = vld [vmem:[#allocation10 + $0x988] sm:$0xff]  ;;  %v381_v15 = vld [vmem:[#allocation10 + $0x4d0] sm:$0xff] }
 0x189   :  { %3395 = vmatprep.subr.bf16.mxu0 %v6736_v30  ;;  %v345_v30 = vld [vmem:[#allocation10 + $0x3b0] sm:$0xff]  ;;  %v6981_v42 = vcombine.low %v532_v25, %v536_v26  ;;  %v576_v14 = vld [vmem:[#allocation10 + $0xae8] sm:$0xff] }
 0x18a   :  { %v6792_v39 = vcombine.high %v341_v28, %v345_v30 }
 0x18b   :  { %3253 = vmatpush1.bf16.msra.mxu1 %v6925_v32  ;;  %v6783_v32 = vcombine.low %v333_v16, %v337_v18 }
 0x18c   :  { %3396 = vmatpush1.bf16.msra.mxu0 %v6735_v33  ;;  %3275 = vmatprep.subr.bf16.mxu1 %v6934_v34  ;;  %v6982_v33 = vcombine.high %v532_v25, %v536_v26  ;;  %v540_v34 = vld [vmem:[#allocation10 + $0x9c8] sm:$0xff]  ;;  %v389_v26 = vld [vmem:[#allocation10 + $0x510] sm:$0xff] }
 0x18d   :  { %3397 = vmatprep.subr.bf16.mxu0 %v6744_v40  ;;  %v353_v40 = vld [vmem:[#allocation10 + $0x3f0] sm:$0xff]  ;;  %v6989_v52 = vcombine.low %v540_v34, %v544_v36  ;;  %v584_v25 = vld [vmem:[#allocation10 + $0xb28] sm:$0xff] }
 0x18e   :  { %3255 = vmatmul.mubr.bf16.vlgmr.msra.gmra.mrb[8].mxu1 %v8668_v27  ;;  %v6800_v49 = vcombine.high %v349_v37, %v353_v40 }
 0x18f   :  { %3276 = vmatpush1.bf16.msra.mxu1 %v6933_v43  ;;  %3264 = vmatprep.mubr.bf16.mxu1 %v8673_v38  ;;  %v6791_v43 = vcombine.low %v341_v28, %v345_v30 }
 0x190   :  { %3398 = vmatpush1.bf16.msra.mxu0 %v6743_v45  ;;  %3277 = vmatprep.subr.bf16.mxu1 %v6942_v46  ;;  %v6990_v45 = vcombine.high %v540_v34, %v544_v36  ;;  %v548_v46 = vld [vmem:[#allocation10 + $0xa08] sm:$0xff] }
 0x191   :  { %3399 = vmatprep.subr.bf16.mxu0 %v6752_v50  ;;  %v361_v50 = vld [vmem:[#allocation10 + $0x430] sm:$0xff]  ;;  %v6997_v63 = vcombine.low %v548_v46, %v552_v47  ;;  %v592_v36 = vld [vmem:[#allocation10 + $0xb68] sm:$0xff] }
 0x192   :  { %v6808_v60 = vcombine.high %v357_v48, %v361_v50 }
 0x193   :  { %3278 = vmatpush1.bf16.msra.mxu1 %v6941_v53  ;;  %v6799_v53 = vcombine.low %v349_v37, %v353_v40  ;;  %v397_v37 = vld [vmem:[#allocation10 + $0x550] sm:$0xff] }
 0x194   :  { %3400 = vmatpush1.bf16.msra.mxu0 %v6751_v54  ;;  %3279 = vmatprep.subr.bf16.mxu1 %v6950_v56  ;;  %v6998_v54 = vcombine.high %v548_v46, %v552_v47  ;;  %v556_v56 = vld [vmem:[#allocation10 + $0xa48] sm:$0xff] }
 0x195   :  { %3401 = vmatprep.subr.bf16.mxu0 %v6760_v61  ;;  %v369_v61 = vld [vmem:[#allocation10 + $0x470] sm:$0xff]  ;;  %v7005_v10 = vcombine.low %v556_v56, %v560_v57  ;;  %v596_v46 = vld [vmem:[#allocation10 + $0xb88] sm:$0xff] }
 0x196   :  { %3265 = vmatmul.mubr.bf16.gmra.mrb[12].mxu1 %v8680_v55  ;;  %v6816_v7 = vcombine.high %v365_v58, %v369_v61  ;;  %v600_v47 = vld [vmem:[#allocation10 + $0xba8] sm:$0xff] }
 0x197   :  { %3280 = vmatpush1.bf16.msra.mxu1 %v6949_v2  ;;  %3307 = vmatprep.mubr.bf16.mxu1 %v8682_v62  ;;  %v6807_v2 = vcombine.low %v357_v48, %v361_v50  ;;  %v405_v48 = vld [vmem:[#allocation10 + $0x590] sm:$0xff] }
 0x198   :  { %3402 = vmatpush1.bf16.msra.mxu0 %v6759_v3  ;;  %3281 = vmatprep.subr.bf16.mxu1 %v6958_v4  ;;  %v7006_v3 = vcombine.high %v556_v56, %v560_v57  ;;  %v564_v4 = vld [vmem:[#allocation10 + $0xa88] sm:$0xff] }
 0x199   :  { %3403 = vmatprep.subr.bf16.mxu0 %v6768_v8  ;;  %v377_v8 = vld [vmem:[#allocation10 + $0x4b0] sm:$0xff]  ;;  %v7013_v18 = vcombine.low %v564_v4, %v568_v5  ;;  %v604_v56 = vld [vmem:[#allocation10 + $0xbc8] sm:$0xff] }
 0x19a   :  { %v6824_v16 = vcombine.high %v373_v6, %v377_v8  ;;  %v608_v57 = vld [vmem:[#allocation10 + $0xbe8] sm:$0xff] }
 0x19b   :  { %3282 = vmatpush1.bf16.msra.mxu1 %v6957_v11  ;;  %v6815_v11 = vcombine.low %v365_v58, %v369_v61  ;;  %v413_v58 = vld [vmem:[#allocation10 + $0x5d0] sm:$0xff]  ;;  %v7045_v61 = vcombine.low %v596_v46, %v600_v47 }
 0x19c   :  { %3404 = vmatpush1.bf16.msra.mxu0 %v6767_v12  ;;  %3283 = vmatprep.subr.bf16.mxu1 %v6966_v13  ;;  %v7014_v12 = vcombine.high %v564_v4, %v568_v5  ;;  %v572_v13 = vld [vmem:[#allocation10 + $0xac8] sm:$0xff] }
 0x19d   :  { %3405 = vmatprep.subr.bf16.mxu0 %v6776_v17  ;;  %v385_v17 = vld [vmem:[#allocation10 + $0x4f0] sm:$0xff]  ;;  %v7021_v30 = vcombine.low %v572_v13, %v576_v14  ;;  %v612_v4 = vld [vmem:[#allocation10 + $0xc08] sm:$0xff] }
 0x19e   :  { %v6832_v28 = vcombine.high %v381_v15, %v385_v17  ;;  %v616_v5 = vld [vmem:[#allocation10 + $0xc28] sm:$0xff] }
 0x19f   :  { %3284 = vmatpush1.bf16.msra.mxu1 %v6965_v20  ;;  %v6823_v20 = vcombine.low %v373_v6, %v377_v8  ;;  %v421_v6 = vld [vmem:[#allocation10 + $0x610] sm:$0xff]  ;;  %v7053_v8 = vcombine.low %v604_v56, %v608_v57 }
 0x1a0   :  { %3406 = vmatpush1.bf16.msra.mxu0 %v6775_v23  ;;  %3285 = vmatprep.subr.bf16.mxu1 %v6974_v24  ;;  %v7022_v23 = vcombine.high %v572_v13, %v576_v14  ;;  %v580_v24 = vld [vmem:[#allocation10 + $0xb08] sm:$0xff] }
 0x1a1   :  { %3407 = vmatprep.subr.bf16.mxu0 %v6784_v29  ;;  %v393_v29 = vld [vmem:[#allocation10 + $0x530] sm:$0xff]  ;;  %v7029_v40 = vcombine.low %v580_v24, %v584_v25  ;;  %v620_v13 = vld [vmem:[#allocation10 + $0xc48] sm:$0xff] }
 0x1a2   :  { %v6840_v34 = vcombine.high %v389_v26, %v393_v29  ;;  %v624_v14 = vld [vmem:[#allocation10 + $0xc68] sm:$0xff] }
 0x1a3   :  { %3286 = vmatpush1.bf16.msra.mxu1 %v6973_v31  ;;  %v6831_v31 = vcombine.low %v381_v15, %v385_v17  ;;  %v429_v15 = vld [vmem:[#allocation10 + $0x650] sm:$0xff]  ;;  %v7061_v17 = vcombine.low %v612_v4, %v616_v5 }
 0x1a4   :  { %3408 = vmatpush1.bf16.msra.mxu0 %v6783_v32  ;;  %3287 = vmatprep.subr.bf16.mxu1 %v6982_v33  ;;  %v7030_v32 = vcombine.high %v580_v24, %v584_v25  ;;  %v588_v33 = vld [vmem:[#allocation10 + $0xb48] sm:$0xff] }
 0x1a5   :  { %3409 = vmatprep.subr.bf16.mxu0 %v6792_v39  ;;  %v401_v39 = vld [vmem:[#allocation10 + $0x570] sm:$0xff]  ;;  %v7037_v50 = vcombine.low %v588_v33, %v592_v36  ;;  %v628_v24 = vld [vmem:[#allocation10 + $0xc88] sm:$0xff] }
 0x1a6   :  { %v632_v25 = vld [vmem:[#allocation10 + $0xca8] sm:$0xff] }
 0x1a7   :  { %3288 = vmatpush1.bf16.msra.mxu1 %v6981_v42  ;;  %v6839_v42 = vcombine.low %v389_v26, %v393_v29  ;;  %v437_v26 = vld [vmem:[#allocation10 + $0x690] sm:$0xff]  ;;  %v7069_v29 = vcombine.low %v620_v13, %v624_v14 }
 0x1a8   :  { %3410 = vmatpush1.bf16.msra.mxu0 %v6791_v43  ;;  %3289 = vmatprep.subr.bf16.mxu1 %v6990_v45  ;;  %v7038_v43 = vcombine.high %v588_v33, %v592_v36  ;;  %v6848_v45 = vcombine.high %v397_v37, %v401_v39  ;;  %v636_v33 = vld [vmem:[#allocation10 + $0xcc8] sm:$0xff]  ;;  %v445_v36 = vld [vmem:[#allocation10 + $0x6d0] sm:$0xff] }
 0x1a9   :  { %3411 = vmatprep.subr.bf16.mxu0 %v6800_v49  ;;  %v409_v49 = vld [vmem:[#allocation10 + $0x5b0] sm:$0xff] }
 0x1ab   :  { %3290 = vmatpush1.bf16.msra.mxu1 %v6989_v52  ;;  %v6847_v52 = vcombine.low %v397_v37, %v401_v39  ;;  %v449_v37 = vld [vmem:[#allocation10 + $0x6f0] sm:$0xff]  ;;  %v7077_v39 = vcombine.low %v628_v24, %v632_v25 }
 0x1ac   :  { %3412 = vmatpush1.bf16.msra.mxu0 %v6799_v53  ;;  %3291 = vmatprep.subr.bf16.mxu1 %v6998_v54  ;;  %v7046_v53 = vcombine.high %v596_v46, %v600_v47  ;;  %v6856_v54 = vcombine.high %v405_v48, %v409_v49  ;;  %v648_v46 = vld [vmem:[#allocation10 + $0xd28] sm:$0xff]  ;;  %v453_v47 = vld [vmem:[#allocation10 + $0x710] sm:$0xff] }
 0x1ad   :  { %3434 = vmatprep.subr.bf16.mxu0 %v6808_v60  ;;  %v417_v60 = vld [vmem:[#allocation10 + $0x5f0] sm:$0xff] }
 0x1af   :  { %3292 = vmatpush1.bf16.msra.mxu1 %v6997_v63  ;;  %3414 = vmatmul.mubr.bf16.vlgmr.msra.gmra.mrb[8].mxu0 %v8666_v22  ;;  %v6855_v63 = vcombine.low %v405_v48, %v409_v49  ;;  %v457_v48 = vld [vmem:[#allocation10 + $0x730] sm:$0xff] }
 0x1b0   :  { %3435 = vmatpush1.bf16.msra.mxu0 %v6807_v2  ;;  %3293 = vmatprep.subr.bf16.mxu1 %v7006_v3  ;;  %v7054_v2 = vcombine.high %v604_v56, %v608_v57  ;;  %v6864_v3 = vcombine.high %v413_v58, %v417_v60  ;;  %v656_v56 = vld [vmem:[#allocation10 + $0xd68] sm:$0xff]  ;;  %v461_v57 = vld [vmem:[#allocation10 + $0x750] sm:$0xff] }
 0x1b1   :  { %3436 = vmatprep.subr.bf16.mxu0 %v6816_v7  ;;  %3423 = vmatprep.mubr.bf16.mxu0 %v8670_v35  ;;  %v425_v7 = vld [vmem:[#allocation10 + $0x630] sm:$0xff] }
 0x1b3   :  { %3294 = vmatpush1.bf16.msra.mxu1 %v7005_v10  ;;  %v6863_v10 = vcombine.low %v413_v58, %v417_v60  ;;  %v465_v58 = vld [vmem:[#allocation10 + $0x770] sm:$0xff] }
 0x1b4   :  { %3437 = vmatpush1.bf16.msra.mxu0 %v6815_v11  ;;  %3295 = vmatprep.subr.bf16.mxu1 %v7014_v12  ;;  %v7062_v11 = vcombine.high %v612_v4, %v616_v5  ;;  %v6872_v12 = vcombine.high %v421_v6, %v425_v7  ;;  %v664_v4 = vld [vmem:[#allocation10 + $0xda8] sm:$0xff]  ;;  %v469_v5 = vld [vmem:[#allocation10 + $0x790] sm:$0xff] }
 0x1b5   :  { %3438 = vmatprep.subr.bf16.mxu0 %v6824_v16  ;;  %v433_v16 = vld [vmem:[#allocation10 + $0x670] sm:$0xff] }
 0x1b7   :  { %3296 = vmatpush1.bf16.msra.mxu1 %v7013_v18  ;;  %3424 = vmatmul.mubr.bf16.gmra.mrb[12].mxu0 %v8677_v51  ;;  %v6871_v18 = vcombine.low %v421_v6, %v425_v7  ;;  %v473_v6 = vld [vmem:[#allocation10 + $0x7b0] sm:$0xff] }
 0x1b8   :  { %3439 = vmatpush1.bf16.msra.mxu0 %v6823_v20  ;;  %3297 = vmatprep.subr.bf16.mxu1 %v7022_v23  ;;  %v7070_v20 = vcombine.high %v620_v13, %v624_v14  ;;  %v6880_v23 = vcombine.high %v429_v15, %v433_v16  ;;  %v668_v13 = vld [vmem:[#allocation10 + $0xdc8] sm:$0xff] }
 0x1b9   :  { %3440 = vmatprep.subr.bf16.mxu0 %v6832_v28  ;;  %3466 = vmatprep.mubr.bf16.mxu0 %v8663_v1  ;;  %v441_v28 = vld [vmem:[#allocation10 + $0x6b0] sm:$0xff]  ;;  %v672_v14 = vld [vmem:[#allocation10 + $0xde8] sm:$0xff] }
 0x1bb   :  { %3298 = vmatpush1.bf16.msra.mxu1 %v7021_v30  ;;  %v6879_v30 = vcombine.low %v429_v15, %v433_v16  ;;  %v477_v16 = vld [vmem:[#allocation10 + $0x7d0] sm:$0xff] }
 0x1bc   :  { %3441 = vmatpush1.bf16.msra.mxu0 %v6831_v31  ;;  %3299 = vmatprep.subr.bf16.mxu1 %v7030_v32  ;;  %v7078_v31 = vcombine.high %v628_v24, %v632_v25  ;;  %v6888_v32 = vcombine.high %v437_v26, %v441_v28  ;;  %v6919_v24 = vcombine.low %v469_v5, %v473_v6 }
 0x1bd   :  { %3442 = vmatprep.subr.bf16.mxu0 %v6840_v34  ;;  %v640_v34 = vld [vmem:[#allocation10 + $0xce8] sm:$0xff]  ;;  %v7118_v25 = vcombine.high %v668_v13, %v672_v14 }
 0x1be   :  { %v7085_v49 = vcombine.low %v636_v33, %v640_v34 }
 0x1bf   :  { %3300 = vmatpush1.bf16.msra.mxu1 %v7029_v40  ;;  %v6887_v40 = vcombine.low %v437_v26, %v441_v28  ;;  %v230_v28 = vld [vmem:[#allocation10 + $0x18] sm:$0xff] }
 0x1c0   :  { %3443 = vmatpush1.bf16.msra.mxu0 %v6839_v42  ;;  %3301 = vmatprep.subr.bf16.mxu1 %v7038_v43  ;;  %v7086_v42 = vcombine.high %v636_v33, %v640_v34  ;;  %v6896_v43 = vcombine.high %v445_v36, %v449_v37 }
 0x1c1   :  { %3444 = vmatprep.subr.bf16.mxu0 %v6848_v45  ;;  %v644_v45 = vld [vmem:[#allocation10 + $0xd08] sm:$0xff] }
 0x1c2   :  { %v7093_v60 = vcombine.low %v644_v45, %v648_v46 }
 0x1c3   :  { %3302 = vmatpush1.bf16.msra.mxu1 %v7037_v50  ;;  %v6895_v50 = vcombine.low %v445_v36, %v449_v37  ;;  %v238_v37 = vld [vmem:[#allocation10 + $0x58] sm:$0xff] }
 0x1c4   :  { %3445 = vmatpush1.bf16.msra.mxu0 %v6847_v52  ;;  %3303 = vmatprep.subr.bf16.mxu1 %v7046_v53  ;;  %v7094_v52 = vcombine.high %v644_v45, %v648_v46  ;;  %v6904_v53 = vcombine.high %v453_v47, %v457_v48 }
 0x1c5   :  { %3446 = vmatprep.subr.bf16.mxu0 %v6856_v54  ;;  %v652_v54 = vld [vmem:[#allocation10 + $0xd48] sm:$0xff] }
 0x1c6   :  { %v7101_v7 = vcombine.low %v652_v54, %v656_v56 }
 0x1c7   :  { %3304 = vmatpush1.bf16.msra.mxu1 %v7045_v61  ;;  %v6903_v61 = vcombine.low %v453_v47, %v457_v48 }
 0x1c8   :  { %3447 = vmatpush1.bf16.msra.mxu0 %v6855_v63  ;;  %3305 = vmatprep.subr.bf16.mxu1 %v7054_v2  ;;  %v7102_v63 = vcombine.high %v652_v54, %v656_v56  ;;  %v6912_v2 = vcombine.high %v461_v57, %v465_v58  ;;  %v250_v54 = vld [vmem:[#allocation10 + $0xb8] sm:$0xff]  ;;  %v501_v56 = vld [vmem:[#allocation10 + $0x890] sm:$0xff] }
 0x1c9   :  { %3448 = vmatprep.subr.bf16.mxu0 %v6864_v3  ;;  %v660_v3 = vld [vmem:[#allocation10 + $0xd88] sm:$0xff] }
 0x1cb   :  { %3306 = vmatpush1.bf16.msra.mxu1 %v7053_v8  ;;  %v6911_v8 = vcombine.low %v461_v57, %v465_v58  ;;  %v505_v57 = vld [vmem:[#allocation10 + $0x8b0] sm:$0xff] }
 0x1cc   :  { %3449 = vmatpush1.bf16.msra.mxu0 %v6863_v10  ;;  %3328 = vmatprep.subr.bf16.mxu1 %v7062_v11  ;;  %v7110_v10 = vcombine.high %v660_v3, %v664_v4 }
 0x1cd   :  { %3450 = vmatprep.subr.bf16.mxu0 %v6872_v12  ;;  %v6920_v12 = vcombine.high %v469_v5, %v473_v6  ;;  %v513_v5 = vld [vmem:[#allocation10 + $0x8f0] sm:$0xff] }
 0x1ce   :  { %3308 = vmatmul.mubr.bf16.vlgmr.msra.gmra.mrb[8].mxu1 %v8688_v0 }
 0x1cf   :  { %3329 = vmatpush1.bf16.msra.mxu1 %v7061_v17  ;;  %3317 = vmatprep.mubr.bf16.mxu1 %v8690_v9  ;;  %v481_v17 = vld [vmem:[#allocation10 + $0x7f0] sm:$0xff] }
 0x1d0   :  { %3451 = vmatpush1.bf16.msra.mxu0 %v6871_v18  ;;  %3330 = vmatprep.subr.bf16.mxu1 %v7070_v20  ;;  %v7109_v20 = vcombine.low %v660_v3, %v664_v4  ;;  %v6928_v26 = vcombine.high %v477_v16, %v481_v17  ;;  %v6927_v33 = vcombine.low %v477_v16, %v481_v17  ;;  %v258_v3 = vld [vmem:[#allocation10 + $0xf8] sm:$0xff]  ;;  %v509_v4 = vld [vmem:[#allocation10 + $0x8d0] sm:$0xff] }
 0x1d1   :  { %3452 = vmatprep.subr.bf16.mxu0 %v6880_v23  ;;  %v521_v16 = vld [vmem:[#allocation10 + $0x930] sm:$0xff] }
 0x1d3   :  { %3331 = vmatpush1.bf16.msra.mxu1 %v7069_v29  ;;  %v234_v29 = vld [vmem:[#allocation10 + $0x38] sm:$0xff] }
 0x1d4   :  { %3453 = vmatpush1.bf16.msra.mxu0 %v6879_v30  ;;  %3332 = vmatprep.subr.bf16.mxu1 %v7078_v31  ;;  %v485_v30 = vld [vmem:[#allocation10 + $0x810] sm:$0xff]  ;;  %v6682_v34 = vcombine.high %v230_v28, %v234_v29  ;;  %v6681_v46 = vcombine.low %v230_v28, %v234_v29  ;;  %v274_v28 = vld [vmem:[#allocation10 + $0x178] sm:$0xff] }
 0x1d5   :  { %3454 = vmatprep.subr.bf16.mxu0 %v6888_v32  ;;  %v489_v31 = vld [vmem:[#allocation10 + $0x830] sm:$0xff]  ;;  %v7117_v32 = vcombine.low %v668_v13, %v672_v14  ;;  %v266_v13 = vld [vmem:[#allocation10 + $0x138] sm:$0xff] }
 0x1d6   :  { %3318 = vmatmul.mubr.bf16.gmra.mrb[12].mxu1 %v8696_v21  ;;  %v6936_v36 = vcombine.high %v485_v30, %v489_v31  ;;  %v6935_v48 = vcombine.low %v485_v30, %v489_v31  ;;  %v517_v14 = vld [vmem:[#allocation10 + $0x910] sm:$0xff] }
 0x1d7   :  { %3333 = vmatpush1.bf16.msra.mxu1 %v7077_v39  ;;  %3360 = vmatprep.mubr.bf16.mxu1 %v8446_v41  ;;  %v242_v39 = vld [vmem:[#allocation10 + $0x78] sm:$0xff]  ;;  %v525_v29 = vld [vmem:[#allocation10 + $0x950] sm:$0xff] }
 0x1d8   :  { %3455 = vmatpush1.bf16.msra.mxu0 %v6887_v40  ;;  %3334 = vmatprep.subr.bf16.mxu1 %v7086_v42  ;;  %v493_v42 = vld [vmem:[#allocation10 + $0x850] sm:$0xff]  ;;  %v6689_v58 = vcombine.low %v238_v37, %v242_v39 }
 0x1d9   :  { %3456 = vmatprep.subr.bf16.mxu0 %v6896_v43  ;;  %v497_v43 = vld [vmem:[#allocation10 + $0x870] sm:$0xff] }
 0x1da   :  { %v529_v30 = vld [vmem:[#allocation10 + $0x970] sm:$0xff] }
 0x1db   :  { %3335 = vmatpush1.bf16.msra.mxu1 %v7085_v49  ;;  %v6690_v49 = vcombine.high %v238_v37, %v242_v39  ;;  %v282_v37 = vld [vmem:[#allocation10 + $0x1b8] sm:$0xff]  ;;  %v533_v39 = vld [vmem:[#allocation10 + $0x990] sm:$0xff] }
 0x1dc   :  { %3457 = vmatpush1.bf16.msra.mxu0 %v6895_v50  ;;  %3336 = vmatprep.subr.bf16.mxu1 %v7094_v52  ;;  %v6944_v52 = vcombine.high %v493_v42, %v497_v43 }
 0x1dd   :  { %3458 = vmatprep.subr.bf16.mxu0 %v6904_v53  ;;  %v246_v53 = vld [vmem:[#allocation10 + $0x98] sm:$0xff] }
 0x1de   :  { %v6697_v6 = vcombine.low %v246_v53, %v250_v54 }
 0x1df   :  { %3337 = vmatpush1.bf16.msra.mxu1 %v7093_v60  ;;  %v6943_v60 = vcombine.low %v493_v42, %v497_v43  ;;  %v537_v42 = vld [vmem:[#allocation10 + $0x9b0] sm:$0xff] }
 0x1e0   :  { %3459 = vmatpush1.bf16.msra.mxu0 %v6903_v61  ;;  %3338 = vmatprep.subr.bf16.mxu1 %v7102_v63  ;;  %v6698_v61 = vcombine.high %v246_v53, %v250_v54  ;;  %v6952_v63 = vcombine.high %v501_v56, %v505_v57  ;;  %v541_v53 = vld [vmem:[#allocation10 + $0x9d0] sm:$0xff] }
 0x1e1   :  { %v8722_v11 = vpop.f32.mrb[0].mxu1  ;;  %3460 = vmatprep.subr.bf16.mxu0 %v6912_v2  ;;  %v254_v2 = vld [vmem:[#allocation10 + $0xd8] sm:$0xff]  ;;  %v545_v54 = vld [vmem:[#allocation10 + $0x9f0] sm:$0xff] }
 0x1e2   :  { %v8724_v15 = vpop.f32.mrb[1].mxu1  ;;  %v6705_v17 = vcombine.low %v254_v2, %v258_v3 }
 0x1e3   :  { %v8726_v18 = vpop.f32.mrb[2].mxu1  ;;  %3339 = vmatpush1.bf16.msra.mxu1 %v7101_v7  ;;  %v6951_v7 = vcombine.low %v501_v56, %v505_v57  ;;  %v6983_v57 = vcombine.low %v533_v39, %v537_v42 }
 0x1e4   :  { %3461 = vmatpush1.bf16.msra.mxu0 %v6911_v8  ;;  %v8728_v23 = vpop.f32.mrb[3].mxu1  ;;  %3340 = vmatprep.subr.bf16.mxu1 %v7110_v10  ;;  %v6706_v8 = vcombine.high %v254_v2, %v258_v3  ;;  %v6960_v10 = vcombine.high %v509_v4, %v513_v5  ;;  %v549_v2 = vld [vmem:[#allocation10 + $0xa10] sm:$0xff] }
 0x1e5   :  { %3462 = vmatprep.subr.bf16.mxu0 %v6920_v12  ;;  %v262_v12 = vld [vmem:[#allocation10 + $0x118] sm:$0xff]  ;;  %v553_v3 = vld [vmem:[#allocation10 + $0xa30] sm:$0xff] }
 0x1e6   :  { %v6713_v31 = vcombine.low %v262_v12, %v266_v13 }
 0x1e7   :  { %3341 = vmatpush1.bf16.msra.mxu1 %v7109_v20  ;;  %v6959_v20 = vcombine.low %v509_v4, %v513_v5  ;;  %v6991_v5 = vcombine.low %v541_v53, %v545_v54 }
 0x1e8   :  { %3463 = vmatpush1.bf16.msra.mxu0 %v6919_v24  ;;  %3342 = vmatprep.subr.bf16.mxu1 %v7118_v25  ;;  %v6714_v24 = vcombine.high %v262_v12, %v266_v13  ;;  %v6968_v25 = vcombine.high %v517_v14, %v521_v16  ;;  %v557_v12 = vld [vmem:[#allocation10 + $0xa50] sm:$0xff] }
 0x1e9   :  { %3464 = vmatprep.subr.bf16.mxu0 %v6928_v26  ;;  %v8730_v40 = vpop.f32.mrb[4].mxu1  ;;  %v270_v26 = vld [vmem:[#allocation10 + $0x158] sm:$0xff]  ;;  %v561_v13 = vld [vmem:[#allocation10 + $0xa70] sm:$0xff] }
 0x1ea   :  { %v8732_v45 = vpop.f32.mrb[5].mxu1  ;;  %v6721_v43 = vcombine.low %v270_v26, %v274_v28 }
 0x1eb   :  { %3343 = vmatpush1.bf16.msra.mxu1 %v7117_v32  ;;  %v8734_v47 = vpop.f32.mrb[6].mxu1  ;;  %v6967_v32 = vcombine.low %v517_v14, %v521_v16  ;;  %v6999_v16 = vcombine.low %v549_v2, %v553_v3 }
 0x1ec   :  { %3465 = vmatpush1.bf16.msra.mxu0 %v6927_v33  ;;  %3593 = vmatprep.subr.bf16.mxu1 %v6682_v34  ;;  %v8736_v50 = vpop.f32.mrb[7].mxu1  ;;  %v6722_v33 = vcombine.high %v270_v26, %v274_v28  ;;  %v6976_v34 = vcombine.high %v525_v29, %v529_v30  ;;  %v565_v26 = vld [vmem:[#allocation10 + $0xa90] sm:$0xff] }
 0x1ed   :  { %3487 = vmatprep.subr.bf16.mxu0 %v6936_v36  ;;  %v278_v36 = vld [vmem:[#allocation10 + $0x198] sm:$0xff]  ;;  %v569_v28 = vld [vmem:[#allocation10 + $0xab0] sm:$0xff] }
 0x1ee   :  { %3361 = vmatmul.mubr.bf16.vlgmr.msra.gmra.mrb[8].mxu1 %v8702_v19  ;;  %v6729_v56 = vcombine.low %v278_v36, %v282_v37 }
 0x1ef   :  { %3467 = vmatmul.mubr.bf16.vlgmr.msra.gmra.mrb[8].mxu0 %v8668_v27  ;;  %3594 = vmatpush1.bf16.msra.mxu1 %v6681_v46  ;;  %v6975_v46 = vcombine.low %v525_v29, %v529_v30  ;;  %v7007_v30 = vcombine.low %v557_v12, %v561_v13 }
 0x1f0   :  { %3488 = vmatpush1.bf16.msra.mxu0 %v6935_v48  ;;  %3595 = vmatprep.subr.bf16.mxu1 %v6690_v49  ;;  %v6730_v48 = vcombine.high %v278_v36, %v282_v37  ;;  %v286_v49 = vld [vmem:[#allocation10 + $0x1d8] sm:$0xff]  ;;  %v573_v36 = vld [vmem:[#allocation10 + $0xad0] sm:$0xff] }
 0x1f1   :  { %3489 = vmatprep.subr.bf16.mxu0 %v6944_v52  ;;  %3370 = vmatprep.mubr.bf16.mxu1 %v8446_v41  ;;  %v290_v52 = vld [vmem:[#allocation10 + $0x1f8] sm:$0xff]  ;;  %v577_v37 = vld [vmem:[#allocation10 + $0xaf0] sm:$0xff] }
 0x1f2   :  { %3476 = vmatprep.mubr.bf16.mxu0 %v8673_v38  ;;  %v6737_v4 = vcombine.low %v286_v49, %v290_v52 }
 0x1f3   :  { %3596 = vmatpush1.bf16.msra.mxu1 %v6689_v58  ;;  %v6738_v58 = vcombine.high %v286_v49, %v290_v52  ;;  %v581_v49 = vld [vmem:[#allocation10 + $0xb10] sm:$0xff] }
 0x1f4   :  { %3490 = vmatpush1.bf16.msra.mxu0 %v6943_v60  ;;  %3597 = vmatprep.subr.bf16.mxu1 %v6698_v61  ;;  %v6992_v60 = vcombine.high %v541_v53, %v545_v54  ;;  %v294_v61 = vld [vmem:[#allocation10 + $0x218] sm:$0xff]  ;;  %v585_v52 = vld [vmem:[#allocation10 + $0xb30] sm:$0xff]  ;;  %v7023_v54 = vcombine.low %v573_v36, %v577_v37 }
 0x1f5   :  { %3491 = vmatprep.subr.bf16.mxu0 %v6952_v63  ;;  %v298_v63 = vld [vmem:[#allocation10 + $0x238] sm:$0xff] }
 0x1f6   :  { %3371 = vmatmul.mubr.bf16.gmra.mrb[12].mxu1 %v8706_v44  ;;  %v6745_v14 = vcombine.low %v294_v61, %v298_v63 }
 0x1f7   :  { %3598 = vmatpush1.bf16.msra.mxu1 %v6697_v6  ;;  %3477 = vmatmul.mubr.bf16.gmra.mrb[12].mxu0 %v8680_v55  ;;  %v6746_v6 = vcombine.high %v294_v61, %v298_v63  ;;  %v589_v61 = vld [vmem:[#allocation10 + $0xb50] sm:$0xff] }
 0x1f8   :  { %3492 = vmatpush1.bf16.msra.mxu0 %v6951_v7  ;;  %3599 = vmatprep.subr.bf16.mxu1 %v6706_v8  ;;  %v7000_v7 = vcombine.high %v549_v2, %v553_v3  ;;  %v302_v8 = vld [vmem:[#allocation10 + $0x258] sm:$0xff]  ;;  %v593_v63 = vld [vmem:[#allocation10 + $0xb70] sm:$0xff]  ;;  %v7031_v3 = vcombine.low %v581_v49, %v585_v52 }
 0x1f9   :  { %3493 = vmatprep.subr.bf16.mxu0 %v6960_v10  ;;  %3519 = vmatprep.mubr.bf16.mxu0 %v8682_v62  ;;  %v306_v10 = vld [vmem:[#allocation10 + $0x278] sm:$0xff] }
 0x1fa   :  { %3625 = vmatprep.mubr.bf16.mxu1 %v8660_v59  ;;  %v6984_v59 = vcombine.high %v533_v39, %v537_v42  ;;  %v6753_v29 = vcombine.low %v302_v8, %v306_v10  ;;  %v7015_v42 = vcombine.low %v565_v26, %v569_v28 }
 0x1fb   :  { %3600 = vmatpush1.bf16.msra.mxu1 %v6705_v17  ;;  %v6754_v17 = vcombine.high %v302_v8, %v306_v10  ;;  %v597_v8 = vld [vmem:[#allocation10 + $0xb90] sm:$0xff] }
 0x1fc   :  { %3494 = vmatpush1.bf16.msra.mxu0 %v6959_v20  ;;  %3601 = vmatprep.subr.bf16.mxu1 %v6714_v24  ;;  %v7008_v20 = vcombine.high %v557_v12, %v561_v13  ;;  %v310_v24 = vld [vmem:[#allocation10 + $0x298] sm:$0xff]  ;;  %v601_v10 = vld [vmem:[#allocation10 + $0xbb0] sm:$0xff]  ;;  %v7039_v13 = vcombine.low %v589_v61, %v593_v63 }
 0x1fd   :  { %3495 = vmatprep.subr.bf16.mxu0 %v6968_v25  ;;  %v314_v25 = vld [vmem:[#allocation10 + $0x2b8] sm:$0xff] }
 0x1fe   :  { %v6761_v39 = vcombine.low %v310_v24, %v314_v25 }
 0x1ff   :  { %3602 = vmatpush1.bf16.msra.mxu1 %v6713_v31  ;;  %v6762_v31 = vcombine.high %v310_v24, %v314_v25  ;;  %v605_v24 = vld [vmem:[#allocation10 + $0xbd0] sm:$0xff] }
 0x200   :  { %3496 = vmatpush1.bf16.msra.mxu0 %v6967_v32  ;;  %3603 = vmatprep.subr.bf16.mxu1 %v6722_v33  ;;  %v7016_v32 = vcombine.high %v565_v26, %v569_v28  ;;  %v318_v33 = vld [vmem:[#allocation10 + $0x2d8] sm:$0xff]  ;;  %v609_v25 = vld [vmem:[#allocation10 + $0xbf0] sm:$0xff]  ;;  %v7047_v28 = vcombine.low %v597_v8, %v601_v10 }
 0x201   :  { %3497 = vmatprep.subr.bf16.mxu0 %v6976_v34  ;;  %v322_v34 = vld [vmem:[#allocation10 + $0x2f8] sm:$0xff] }
 0x202   :  { %v6769_v53 = vcombine.low %v318_v33, %v322_v34 }
 0x203   :  { %3604 = vmatpush1.bf16.msra.mxu1 %v6721_v43  ;;  %v6770_v43 = vcombine.high %v318_v33, %v322_v34  ;;  %v613_v33 = vld [vmem:[#allocation10 + $0xc10] sm:$0xff] }
 0x204   :  { %3498 = vmatpush1.bf16.msra.mxu0 %v6975_v46  ;;  %3605 = vmatprep.subr.bf16.mxu1 %v6730_v48  ;;  %v7024_v46 = vcombine.high %v573_v36, %v577_v37  ;;  %v326_v48 = vld [vmem:[#allocation10 + $0x318] sm:$0xff]  ;;  %v617_v34 = vld [vmem:[#allocation10 + $0xc30] sm:$0xff]  ;;  %v7055_v37 = vcombine.low %v605_v24, %v609_v25 }
 0x205   :  { %3499 = vmatprep.subr.bf16.mxu0 %v6984_v59  ;;  %v330_v59 = vld [vmem:[#allocation10 + $0x338] sm:$0xff] }
 0x206   :  { %v6777_v2 = vcombine.low %v326_v48, %v330_v59 }
 0x207   :  { %3606 = vmatpush1.bf16.msra.mxu1 %v6729_v56  ;;  %v6778_v56 = vcombine.high %v326_v48, %v330_v59  ;;  %v621_v48 = vld [vmem:[#allocation10 + $0xc50] sm:$0xff] }
 0x208   :  { %3500 = vmatpush1.bf16.msra.mxu0 %v6983_v57  ;;  %3607 = vmatprep.subr.bf16.mxu1 %v6738_v58  ;;  %v7032_v57 = vcombine.high %v581_v49, %v585_v52  ;;  %v334_v58 = vld [vmem:[#allocation10 + $0x358] sm:$0xff]  ;;  %v625_v59 = vld [vmem:[#allocation10 + $0xc70] sm:$0xff]  ;;  %v7063_v52 = vcombine.low %v613_v33, %v617_v34 }
 0x209   :  { %3501 = vmatprep.subr.bf16.mxu0 %v6992_v60  ;;  %v338_v60 = vld [vmem:[#allocation10 + $0x378] sm:$0xff] }
 0x20a   :  { %v6785_v12 = vcombine.low %v334_v58, %v338_v60 }
 0x20b   :  { %3608 = vmatpush1.bf16.msra.mxu1 %v6737_v4  ;;  %v6786_v4 = vcombine.high %v334_v58, %v338_v60  ;;  %v629_v58 = vld [vmem:[#allocation10 + $0xc90] sm:$0xff] }
 0x20c   :  { %3502 = vmatpush1.bf16.msra.mxu0 %v6991_v5  ;;  %3609 = vmatprep.subr.bf16.mxu1 %v6746_v6  ;;  %v7040_v5 = vcombine.high %v589_v61, %v593_v63  ;;  %v342_v6 = vld [vmem:[#allocation10 + $0x398] sm:$0xff]  ;;  %v633_v60 = vld [vmem:[#allocation10 + $0xcb0] sm:$0xff]  ;;  %v7071_v63 = vcombine.low %v621_v48, %v625_v59 }
 0x20d   :  { %3503 = vmatprep.subr.bf16.mxu0 %v7000_v7  ;;  %v346_v7 = vld [vmem:[#allocation10 + $0x3b8] sm:$0xff] }
 0x20e   :  { %v6793_v26 = vcombine.low %v342_v6, %v346_v7 }
 0x20f   :  { %3610 = vmatpush1.bf16.msra.mxu1 %v6745_v14  ;;  %v6794_v14 = vcombine.high %v342_v6, %v346_v7  ;;  %v386_v6 = vld [vmem:[#allocation10 + $0x4f8] sm:$0xff]  ;;  %v637_v7 = vld [vmem:[#allocation10 + $0xcd0] sm:$0xff] }
 0x210   :  { %3504 = vmatpush1.bf16.msra.mxu0 %v6999_v16  ;;  %3611 = vmatprep.subr.bf16.mxu1 %v6754_v17  ;;  %v7048_v16 = vcombine.high %v597_v8, %v601_v10  ;;  %v350_v17 = vld [vmem:[#allocation10 + $0x3d8] sm:$0xff]  ;;  %v641_v8 = vld [vmem:[#allocation10 + $0xcf0] sm:$0xff]  ;;  %v7079_v10 = vcombine.low %v629_v58, %v633_v60 }
 0x211   :  { %3505 = vmatprep.subr.bf16.mxu0 %v7008_v20  ;;  %v354_v20 = vld [vmem:[#allocation10 + $0x3f8] sm:$0xff] }
 0x212   :  { %v6801_v36 = vcombine.low %v350_v17, %v354_v20 }
 0x213   :  { %3612 = vmatpush1.bf16.msra.mxu1 %v6753_v29  ;;  %v6802_v29 = vcombine.high %v350_v17, %v354_v20  ;;  %v394_v17 = vld [vmem:[#allocation10 + $0x538] sm:$0xff]  ;;  %v645_v20 = vld [vmem:[#allocation10 + $0xd10] sm:$0xff] }
 0x214   :  { %3506 = vmatpush1.bf16.msra.mxu0 %v7007_v30  ;;  %3613 = vmatprep.subr.bf16.mxu1 %v6762_v31  ;;  %v7056_v30 = vcombine.high %v605_v24, %v609_v25  ;;  %v358_v31 = vld [vmem:[#allocation10 + $0x418] sm:$0xff]  ;;  %v649_v24 = vld [vmem:[#allocation10 + $0xd30] sm:$0xff] }
 0x215   :  { %3507 = vmatprep.subr.bf16.mxu0 %v7016_v32  ;;  %v362_v32 = vld [vmem:[#allocation10 + $0x438] sm:$0xff] }
 0x216   :  { %v6809_v49 = vcombine.low %v358_v31, %v362_v32 }
 0x217   :  { %3614 = vmatpush1.bf16.msra.mxu1 %v6761_v39  ;;  %v6810_v39 = vcombine.high %v358_v31, %v362_v32  ;;  %v402_v31 = vld [vmem:[#allocation10 + $0x578] sm:$0xff]  ;;  %v8758_v32 = vld [vmem:[#allocation11] sm:$0xff] }
 0x218   :  { %3508 = vmatpush1.bf16.msra.mxu0 %v7015_v42  ;;  %3615 = vmatprep.subr.bf16.mxu1 %v6770_v43  ;;  %v7064_v42 = vcombine.high %v613_v33, %v617_v34  ;;  %v366_v43 = vld [vmem:[#allocation10 + $0x458] sm:$0xff]  ;;  %v653_v33 = vld [vmem:[#allocation10 + $0xd50] sm:$0xff] }
 0x219   :  { %3509 = vmatprep.subr.bf16.mxu0 %v7024_v46  ;;  %v370_v46 = vld [vmem:[#allocation10 + $0x478] sm:$0xff]  ;;  %v657_v34 = vld [vmem:[#allocation10 + $0xd70] sm:$0xff] }
 0x21a   :  { %v6817_v61 = vcombine.low %v366_v43, %v370_v46 }
 0x21b   :  { %3616 = vmatpush1.bf16.msra.mxu1 %v6769_v53  ;;  %v6818_v53 = vcombine.high %v366_v43, %v370_v46  ;;  %v7104_v43 = vcombine.high %v653_v33, %v657_v34  ;;  %v406_v46 = vld [vmem:[#allocation10 + $0x598] sm:$0xff] }
 0x21c   :  { %3510 = vmatpush1.bf16.msra.mxu0 %v7023_v54  ;;  %3617 = vmatprep.subr.bf16.mxu1 %v6778_v56  ;;  %v7072_v54 = vcombine.high %v621_v48, %v625_v59  ;;  %v374_v56 = vld [vmem:[#allocation10 + $0x498] sm:$0xff] }
 0x21d   :  { %3511 = vmatprep.subr.bf16.mxu0 %v7032_v57  ;;  %v378_v57 = vld [vmem:[#allocation10 + $0x4b8] sm:$0xff] }
 0x21e   :  { %v410_v48 = vld [vmem:[#allocation10 + $0x5b8] sm:$0xff] }
 0x21f   :  { %3618 = vmatpush1.bf16.msra.mxu1 %v6777_v2  ;;  %v6826_v2 = vcombine.high %v374_v56, %v378_v57 }
 0x220   :  { %3512 = vmatpush1.bf16.msra.mxu0 %v7031_v3  ;;  %3619 = vmatprep.subr.bf16.mxu1 %v6786_v4  ;;  %v677_v3 = vlaneseq  ;;  %v7080_v4 = vcombine.high %v629_v58, %v633_v60  ;;  %v414_v58 = vld [vmem:[#allocation10 + $0x5d8] sm:$0xff] }
 0x221   :  { %3513 = vmatprep.subr.bf16.mxu0 %v7040_v5  ;;  %v382_v5 = vld [vmem:[#allocation10 + $0x4d8] sm:$0xff] }
 0x222   :  { %v6833_v25 = vcombine.low %v382_v5, %v386_v6  ;;  %v418_v60 = vld [vmem:[#allocation10 + $0x5f8] sm:$0xff] }
 0x223   :  { %3620 = vmatpush1.bf16.msra.mxu1 %v6785_v12  ;;  %v6834_v12 = vcombine.high %v382_v5, %v386_v6 }
 0x224   :  { %3514 = vmatpush1.bf16.msra.mxu0 %v7039_v13  ;;  %3621 = vmatprep.subr.bf16.mxu1 %v6794_v14  ;;  %v8750_v13 = vshrl.u32 %v677_v3, 7  ;;  %v7088_v14 = vcombine.high %v637_v7, %v641_v8  ;;  %v8778_v3 = vld [vmem:[#allocation10 + $0xdf0] sm:$0xff] }
 0x225   :  { %3515 = vmatprep.subr.bf16.mxu0 %v7048_v16  ;;  %v390_v16 = vld [vmem:[#allocation10 + $0x518] sm:$0xff] }
 0x227   :  { %3622 = vmatpush1.bf16.msra.mxu1 %v6793_v26  ;;  %v6842_v26 = vcombine.high %v390_v16, %v394_v17 }
 0x228   :  { %3516 = vmatpush1.bf16.msra.mxu0 %v7047_v28  ;;  %3623 = vmatprep.subr.bf16.mxu1 %v6802_v29  ;;  %v8755_v28 = vsub.s32 0, %v8750_v13  ;;  %v7096_v29 = vcombine.high %v645_v20, %v649_v24 }
 0x229   :  { %3517 = vmatprep.subr.bf16.mxu0 %v7056_v30  ;;  %v398_v30 = vld [vmem:[#allocation10 + $0x558] sm:$0xff] }
 0x22b   :  { %3624 = vmatpush1.bf16.msra.mxu1 %v6801_v36  ;;  %v6841_v36 = vcombine.low %v390_v16, %v394_v17  ;;  %v8786_v17 = vld [vmem:[#allocation10 + $0x618] sm:$0xff] }
 0x22c   :  { %3518 = vmatpush1.bf16.msra.mxu0 %v7055_v37  ;;  %3646 = vmatprep.subr.bf16.mxu1 %v6810_v39  ;;  %v7095_v37 = vcombine.low %v645_v20, %v649_v24  ;;  %v6850_v39 = vcombine.high %v398_v30, %v402_v31  ;;  %v426_v20 = vld [vmem:[#allocation10 + $0x638] sm:$0xff] }
 0x22d   :  { %3540 = vmatprep.subr.bf16.mxu0 %v7064_v42  ;;  %v8766_v42 = vrot.slane %v8758_v32, %v8755_v28 }
 0x22e   :  { %3626 = vmatmul.mubr.bf16.vlgmr.msra.gmra.mrb[16].mxu1 %v8666_v22  ;;  %v6825_v22 = vcombine.low %v374_v56, %v378_v57 }
 0x22f   :  { %3520 = vmatmul.mubr.bf16.vlgmr.msra.gmra.mrb[8].mxu0 %v8688_v0  ;;  %3647 = vmatpush1.bf16.msra.mxu1 %v6809_v49  ;;  %v661_v49 = vld [vmem:[#allocation10 + $0xd90] sm:$0xff]  ;;  %v2992_v56 = vadd.f32 %v8722_v11, %v8766_v42  ;;  %v6857_v11 = vcombine.low %v406_v46, %v410_v48 }
 0x230   :  { %3541 = vmatpush1.bf16.msra.mxu0 %v7063_v52  ;;  %3648 = vmatprep.subr.bf16.mxu1 %v6818_v53  ;;  %v6849_v52 = vcombine.low %v398_v30, %v402_v31  ;;  %v7103_v53 = vcombine.low %v653_v33, %v657_v34  ;;  %v3901_v30 = vld [vmem:[#allocation5] sm:$0xff]  ;;  %v6865_v34 = vcombine.low %v414_v58, %v418_v60 }
 0x231   :  { %3542 = vmatprep.subr.bf16.mxu0 %v7072_v54  ;;  %3529 = vmatprep.mubr.bf16.mxu0 %v8690_v9  ;;  %v6858_v54 = vcombine.high %v406_v46, %v410_v48  ;;  %v3909_v33 = vld [vmem:[#allocation5 + $0x40] sm:$0xff]  ;;  %v3910_v46 = vld [vmem:[#allocation5 + $0x48] sm:$0xff]  ;;  %v3002_v48 = vadd.f32 %v8730_v40, %v8766_v42 }
 0x232   :  { %3635 = vmatprep.mubr.bf16.mxu1 %v8670_v35  ;;  %v7087_v35 = vcombine.low %v637_v7, %v641_v8 }
 0x233   :  { %3649 = vmatpush1.bf16.msra.mxu1 %v6817_v61 }
 0x234   :  { %3543 = vmatpush1.bf16.msra.mxu0 %v7071_v63  ;;  %3650 = vmatprep.subr.bf16.mxu1 %v6826_v2  ;;  %v8776_v2 = vld [vmem:[#allocation10 + $0xdd0] sm:$0xff] }
 0x235   :  { %3544 = vmatprep.subr.bf16.mxu0 %v7080_v4  ;;  %v2996_v4 = vadd.f32 %v8726_v18, %v8766_v42  ;;  %v7120_v18 = vcombine.high %v8776_v2, %v8778_v3 }
 0x236   :  { %3636 = vmatmul.mubr.bf16.gmra.mrb[20].mxu1 %v8677_v51  ;;  %v8761_v51 = vsub.s32 1, %v8750_v13 }
 0x237   :  { %3651 = vmatpush1.bf16.msra.mxu1 %v6825_v22  ;;  %3530 = vmatmul.mubr.bf16.gmra.mrb[12].mxu0 %v8696_v21 }
 0x238   :  { %3545 = vmatpush1.bf16.msra.mxu0 %v7079_v10  ;;  %3652 = vmatprep.subr.bf16.mxu1 %v6834_v12  ;;  %v8770_v59 = vrot.slane %v8758_v32, %v8761_v51 }
 0x239   :  { %3546 = vmatprep.subr.bf16.mxu0 %v7088_v14  ;;  %3572 = vmatprep.mubr.bf16.mxu0 %v8446_v41 }
 0x23a   :  { %3678 = vmatprep.mubr.bf16.mxu1 %v8663_v1  ;;  %v665_v1 = vld [vmem:[#allocation10 + $0xdb0] sm:$0xff]  ;;  %v2994_v61 = vadd.f32 %v8724_v15, %v8770_v59  ;;  %v2998_v8 = vadd.f32 %v8728_v23, %v8770_v59  ;;  %v6866_v15 = vcombine.high %v414_v58, %v418_v60  ;;  %v7119_v23 = vcombine.low %v8776_v2, %v8778_v3 }
 0x23b   :  { %3653 = vmatpush1.bf16.msra.mxu1 %v6833_v25  ;;  %v7112_v57 = vcombine.high %v661_v49, %v665_v1  ;;  %v7111_v7 = vcombine.low %v661_v49, %v665_v1  ;;  %v6873_v1 = vcombine.low %v8786_v17, %v426_v20 }
 0x23c   :  { %3547 = vmatpush1.bf16.msra.mxu0 %v7087_v35  ;;  %3654 = vmatprep.subr.bf16.mxu1 %v6842_v26  ;;  %v8790_v35 = vld [vmem:[#allocation10 + $0x658] sm:$0xff] }
 0x23d   :  { %3548 = vmatprep.subr.bf16.mxu0 %v7096_v29  ;;  %v8792_v26 = vld [vmem:[#allocation10 + $0x678] sm:$0xff] }
 0x23f   :  { %3655 = vmatpush1.bf16.msra.mxu1 %v6841_v36 }
 0x240   :  { %3549 = vmatpush1.bf16.msra.mxu0 %v7095_v37  ;;  %3656 = vmatprep.subr.bf16.mxu1 %v6850_v39  ;;  %v6874_v39 = vcombine.high %v8786_v17, %v426_v20  ;;  %v3917_v17 = vld [vmem:[#allocation5 + $0x80] sm:$0xff] }
 0x241   :  { %3550 = vmatprep.subr.bf16.mxu0 %v7104_v43  ;;  %v3902_v43 = vld [vmem:[#allocation5 + $0x8] sm:$0xff]  ;;  %v3925_v20 = vld [vmem:[#allocation5 + $0xc0] sm:$0xff] }
 0x242   :  { %v3150_v63 = vpop.f32.mrb[0].mxu0 }
 0x243   :  { %v7445_v5 = vadd.f32 %v3150_v63, %v2992_v56  ;;  %v3152_v6 = vpop.f32.mrb[1].mxu0  ;;  %3657 = vmatpush1.bf16.msra.mxu1 %v6849_v52  ;;  %v7676_v52 = vld [vmem:[#allocation13 + $0x4] ss:$16 sps:$4 sm:$0xff]  }
 0x244   :  { %v7447_v22 = vadd.f32 %v3152_v6, %v2994_v61  ;;  %v3154_v10 = vpop.f32.mrb[2].mxu0  ;;  %3551 = vmatpush1.bf16.msra.mxu0 %v7103_v53  ;;  %3658 = vmatprep.subr.bf16.mxu1 %v6858_v54  ;;  %v6882_v53 = vcombine.high %v8790_v35, %v8792_v26  ;;  %v3004_v54 = vadd.f32 %v8732_v45, %v8770_v59 }
 0x245   :  { %vm3805_vm0 = vcmp.ge.f32.partialorder %v7445_v5, 0.0  ;;  %v3837_v12 = vmul.f32 0.2, %v7445_v5  ;;  %v7449_v14 = vadd.f32 %v3154_v10, %v2996_v4  ;;  %v3156_v16 = vpop.f32.mrb[3].mxu0  ;;  %3552 = vmatprep.subr.bf16.mxu0 %v7112_v57  ;;  %v3006_v61 = vadd.f32 %v8734_v47, %v8766_v42  ;;  %v438_v42 = vld [vmem:[#allocation10 + $0x698] sm:$0xff] }
 0x246   :  { %vm3806_vm1 = vcmp.ge.f32.partialorder %v7447_v22, 0.0  ;;  %v3838_v24 = vmul.f32 0.2, %v7447_v22  ;;  %v7451_v25 = vadd.f32 %v3156_v16, %v2998_v8  ;;  %v3008_v4 = vadd.f32 %v8736_v50, %v8770_v59  ;;  %v442_v10 = vld [vmem:[#allocation10 + $0x6b8] sm:$0xff] }
 0x247   :  { %v3869_v29 = vsel %vm3805_vm0, %v7445_v5, %v3837_v12  ;;  %vm3813_vm2 = vcmp.ge.f32.partialorder %v7449_v14, 0.0  ;;  %v3845_v31 = vmul.f32 0.2, %v7449_v14  ;;  %3659 = vmatpush1.bf16.msra.mxu1 %v6857_v11  ;;  %v7679_v11 = vld [vmem:[#allocation13 + $0x24] ss:$16 sps:$4 sm:$0xff]   ;;  %v6881_v16 = vcombine.low %v8790_v35, %v8792_v26 }
 0x248   :  { %v3870_v36 = vsel %vm3806_vm1, %v7447_v22, %v3838_v24  ;;  %vm3814_vm3 = vcmp.ge.f32.partialorder %v7451_v25, 0.0  ;;  %v3846_v37 = vmul.f32 0.2, %v7451_v25  ;;  %3553 = vmatpush1.bf16.msra.mxu0 %v7111_v7  ;;  %3660 = vmatprep.subr.bf16.mxu1 %v6866_v15  ;;  %v3933_v56 = vmul.f32 %v3901_v30, %v3869_v29  ;;  %v7674_v7 = vld [vmem:[#allocation13] ss:$16 sps:$4 sm:$0xff]  }
 0x249   :  { %v3877_v49 = vsel %vm3813_vm2, %v7449_v14, %v3845_v31  ;;  %3554 = vmatprep.subr.bf16.mxu0 %v7120_v18  ;;  %v3934_v2 = vmul.f32 %v3902_v43, %v3870_v36  ;;  %v3918_v18 = vld [vmem:[#allocation5 + $0x88] sm:$0xff]  ;;  %v6890_v29 = vcombine.high %v438_v42, %v442_v10  ;;  %v446_v36 = vld [vmem:[#allocation10 + $0x6d8] sm:$0xff] }
 0x24a   :  { %v3941_v57 = vmul.f32 %v3909_v33, %v3877_v49  ;;  %v3878_v58 = vsel %vm3814_vm3, %v7451_v25, %v3846_v37  ;;  %v3160_v60 = vpop.f32.mrb[4].mxu0  ;;  %v3926_v30 = vld [vmem:[#allocation5 + $0xc8] sm:$0xff]  ;;  %v450_v35 = vld [vmem:[#allocation10 + $0x6f8] sm:$0xff] }
 0x24b   :  { %v7453_v40 = vadd.f32 %v3160_v60, %v3002_v48  ;;  %v3162_v63 = vpop.f32.mrb[5].mxu0  ;;  %3661 = vmatpush1.bf16.msra.mxu1 %v6865_v34  ;;  %v3942_v3 = vmul.f32 %v3910_v46, %v3878_v58  ;;  %v7682_v33 = vld [vmem:[#allocation13 + $0x44] ss:$16 sps:$4 sm:$0xff]   ;;  %v7680_v48 = vld [vmem:[#allocation13 + $0x40] ss:$16 sps:$4 sm:$0xff]  }
 0x24c   :  { %v8807_v5 = vpack.c.bf16 %v3941_v57, %v3933_v56  ;;  %v7455_v6 = vadd.f32 %v3162_v63, %v3004_v54  ;;  %v3164_v45 = vpop.f32.mrb[6].mxu0  ;;  %3555 = vmatpush1.bf16.msra.mxu0 %v7119_v23  ;;  %3662 = vmatprep.subr.bf16.mxu1 %v6874_v39  ;;  %v7677_v23 = vld [vmem:[#allocation13 + $0x20] ss:$16 sps:$4 sm:$0xff]   ;;  %v6889_v39 = vcombine.low %v438_v42, %v442_v10 }
 0x24d   :  { %vm3821_vm4 = vcmp.ge.f32.partialorder %v7453_v40, 0.0  ;;  %v3853_v8 = vmul.f32 0.2, %v7453_v40  ;;  %v7457_v22 = vadd.f32 %v3164_v45, %v3006_v61  ;;  %v3166_v47 = vpop.f32.mrb[7].mxu0  ;;  %5539 = vmatprep.subr.bf16.mxu0 %v7676_v52  ;;  %v8809_v15 = vpack.c.bf16 %v3942_v3, %v3934_v2  ;;  %v7685_v52 = vld [vmem:[#allocation13 + $0x64] ss:$16 sps:$4 sm:$0xff]  }
 0x24e   :  { %vm3822_vm5 = vcmp.ge.f32.partialorder %v7455_v6, 0.0  ;;  %v3854_v12 = vmul.f32 0.2, %v7455_v6  ;;  %v7459_v50 = vadd.f32 %v3166_v47, %v3008_v4  ;;  %v458_v54 = vld [vmem:[#allocation10 + $0x738] sm:$0xff]  ;;  %v6897_v57 = vcombine.low %v446_v36, %v450_v35 }
 0x24f   :  { %v3885_v59 = vsel %vm3821_vm4, %v7453_v40, %v3853_v8  ;;  %vm3829_vm6 = vcmp.ge.f32.partialorder %v7457_v22, 0.0  ;;  %v3861_v14 = vmul.f32 0.2, %v7457_v22  ;;  %3573 = vmatmul.mubr.bf16.vlgmr.msra.gmra.mrb[8].mxu0 %v8702_v19  ;;  %3663 = vmatpush1.bf16.msra.mxu1 %v6873_v1  ;;  %v6898_v1 = vcombine.high %v446_v36, %v450_v35  ;;  %v7683_v58 = vld [vmem:[#allocation13 + $0x60] ss:$16 sps:$4 sm:$0xff]  }
 0x250   :  { %v3886_v24 = vsel %vm3822_vm5, %v7455_v6, %v3854_v12  ;;  %vm3830_vm7 = vcmp.ge.f32.partialorder %v7459_v50, 0.0  ;;  %v3862_v25 = vmul.f32 0.2, %v7459_v50  ;;  %5540 = vmatpush1.bf16.msra.mxu0 %v7674_v7  ;;  %3664 = vmatprep.subr.bf16.mxu1 %v6882_v53  ;;  %v3949_v26 = vmul.f32 %v3917_v17, %v3885_v59  ;;  %v454_v53 = vld [vmem:[#allocation10 + $0x718] sm:$0xff] }
 0x251   :  { %v3893_v31 = vsel %vm3829_vm6, %v7457_v22, %v3861_v14  ;;  %5541 = vmatprep.subr.bf16.mxu0 %v7679_v11  ;;  %3582 = vmatprep.mubr.bf16.mxu0 %v8446_v41  ;;  %v3950_v43 = vmul.f32 %v3918_v18, %v3886_v24  ;;  %v6906_v60 = vcombine.high %v454_v53, %v458_v54  ;;  %v7688_v61 = vld [vmem:[#allocation13 + $0x84] ss:$16 sps:$4 sm:$0xff]   ;;  %v7686_v3 = vld [vmem:[#allocation13 + $0x80] ss:$16 sps:$4 sm:$0xff]  }
 0x252   :  { %v3894_v34 = vsel %vm3830_vm7, %v7459_v50, %v3862_v25  ;;  %v3957_v37 = vmul.f32 %v3925_v20, %v3893_v31  ;;  %v462_v40 = vld [vmem:[#allocation10 + $0x758] sm:$0xff]  ;;  %v6905_v2 = vcombine.low %v454_v53, %v458_v54 }
 0x253   :  { %3665 = vmatpush1.bf16.msra.mxu1 %v6881_v16  ;;  %v3958_v46 = vmul.f32 %v3926_v30, %v3894_v34  ;;  %v466_v63 = vld [vmem:[#allocation10 + $0x778] sm:$0xff] }
 0x254   :  { %5542 = vmatpush1.bf16.msra.mxu0 %v7677_v23  ;;  %3666 = vmatprep.subr.bf16.mxu1 %v6890_v29  ;;  %v8816_v49 = vpack.c.bf16 %v3957_v37, %v3949_v26  ;;  %v6914_v4 = vcombine.high %v462_v40, %v466_v63  ;;  %v7691_v6 = vld [vmem:[#allocation13 + $0xa4] ss:$16 sps:$4 sm:$0xff]   ;;  %v6913_v11 = vcombine.low %v462_v40, %v466_v63  ;;  %v7689_v8 = vld [vmem:[#allocation13 + $0xa0] ss:$16 sps:$4 sm:$0xff]  }
 0x255   :  { %5543 = vmatprep.subr.bf16.mxu0 %v7682_v33  ;;  %v8818_v56 = vpack.c.bf16 %v3958_v46, %v3950_v43  ;;  %v470_v45 = vld [vmem:[#allocation10 + $0x798] sm:$0xff] }
 0x256   :  { %v474_v7 = vld [vmem:[#allocation10 + $0x7b8] sm:$0xff] }
 0x257   :  { %3583 = vmatmul.mubr.bf16.gmra.mrb[12].mxu0 %v8706_v44  ;;  %3667 = vmatpush1.bf16.msra.mxu1 %v6889_v39  ;;  %v6922_v22 = vcombine.high %v470_v45, %v474_v7  ;;  %v7694_v47 = vld [vmem:[#allocation13 + $0xc4] ss:$16 sps:$4 sm:$0xff]   ;;  %v6921_v12 = vcombine.low %v470_v45, %v474_v7  ;;  %v7692_v50 = vld [vmem:[#allocation13 + $0xc0] ss:$16 sps:$4 sm:$0xff]  }
 0x258   :  { %5544 = vmatpush1.bf16.msra.mxu0 %v7680_v48  ;;  %5571 = vmatprep.mubr.bf16.mxu0 %v8809_v15  ;;  %v478_v42 = vld [vmem:[#allocation10 + $0x7d8] sm:$0xff] }
 0x259   :  { %3668 = vmatprep.subr.bf16.mxu1 %v6898_v1  ;;  %5545 = vmatprep.subr.bf16.mxu0 %v7685_v52  ;;  %v482_v10 = vld [vmem:[#allocation10 + $0x7f8] sm:$0xff] }
 0x25a   :  { %v6930_v59 = vcombine.high %v478_v42, %v482_v10  ;;  %v7697_v14 = vld [vmem:[#allocation13 + $0xe4] ss:$16 sps:$4 sm:$0xff]   ;;  %v6929_v17 = vcombine.low %v478_v42, %v482_v10  ;;  %v7695_v20 = vld [vmem:[#allocation13 + $0xe0] ss:$16 sps:$4 sm:$0xff]  }
 0x25b   :  { %3669 = vmatpush1.bf16.msra.mxu1 %v6897_v57  ;;  %v486_v16 = vld [vmem:[#allocation10 + $0x818] sm:$0xff] }
 0x25c   :  { %5546 = vmatpush1.bf16.msra.mxu0 %v7683_v58  ;;  %3670 = vmatprep.subr.bf16.mxu1 %v6906_v60  ;;  %v490_v18 = vld [vmem:[#allocation10 + $0x838] sm:$0xff] }
 0x25d   :  { %5547 = vmatprep.subr.bf16.mxu0 %v7688_v61  ;;  %v6938_v24 = vcombine.high %v486_v16, %v490_v18  ;;  %v7700_v25 = vld [vmem:[#allocation13 + $0x104] ss:$16 sps:$4 sm:$0xff]   ;;  %v6937_v30 = vcombine.low %v486_v16, %v490_v18  ;;  %v7698_v31 = vld [vmem:[#allocation13 + $0x100] ss:$16 sps:$4 sm:$0xff]  }
 0x25e   :  { %v494_v23 = vld [vmem:[#allocation10 + $0x858] sm:$0xff] }
 0x25f   :  { %3671 = vmatpush1.bf16.msra.mxu1 %v6905_v2  ;;  %v498_v29 = vld [vmem:[#allocation10 + $0x878] sm:$0xff] }
 0x260   :  { %5548 = vmatpush1.bf16.msra.mxu0 %v7686_v3  ;;  %3672 = vmatprep.subr.bf16.mxu1 %v6914_v4  ;;  %v6946_v33 = vcombine.high %v494_v23, %v498_v29  ;;  %v7703_v34 = vld [vmem:[#allocation13 + $0x124] ss:$16 sps:$4 sm:$0xff]   ;;  %v6945_v26 = vcombine.low %v494_v23, %v498_v29  ;;  %v7701_v37 = vld [vmem:[#allocation13 + $0x120] ss:$16 sps:$4 sm:$0xff]  }
 0x261   :  { %5549 = vmatprep.subr.bf16.mxu0 %v7691_v6  ;;  %v502_v36 = vld [vmem:[#allocation10 + $0x898] sm:$0xff] }
 0x262   :  { %v506_v35 = vld [vmem:[#allocation10 + $0x8b8] sm:$0xff] }
 0x263   :  { %3673 = vmatpush1.bf16.msra.mxu1 %v6913_v11  ;;  %v6954_v39 = vcombine.high %v502_v36, %v506_v35  ;;  %v7706_v43 = vld [vmem:[#allocation13 + $0x144] ss:$16 sps:$4 sm:$0xff]   ;;  %v6953_v1 = vcombine.low %v502_v36, %v506_v35  ;;  %v7704_v52 = vld [vmem:[#allocation13 + $0x140] ss:$16 sps:$4 sm:$0xff]  }
 0x264   :  { %5550 = vmatpush1.bf16.msra.mxu0 %v7689_v8  ;;  %3674 = vmatprep.subr.bf16.mxu1 %v6922_v22  ;;  %v510_v46 = vld [vmem:[#allocation10 + $0x8d8] sm:$0xff] }
 0x265   :  { %5551 = vmatprep.subr.bf16.mxu0 %v7694_v47  ;;  %v514_v48 = vld [vmem:[#allocation10 + $0x8f8] sm:$0xff] }
 0x266   :  { %v6962_v53 = vcombine.high %v510_v46, %v514_v48  ;;  %v518_v54 = vld [vmem:[#allocation10 + $0x918] sm:$0xff] }
 0x267   :  { %3675 = vmatpush1.bf16.msra.mxu1 %v6921_v12  ;;  %v522_v57 = vld [vmem:[#allocation10 + $0x938] sm:$0xff] }
 0x268   :  { %5552 = vmatpush1.bf16.msra.mxu0 %v7692_v50  ;;  %3676 = vmatprep.subr.bf16.mxu1 %v6930_v59  ;;  %v7707_v58 = vld [vmem:[#allocation13 + $0x160] ss:$16 sps:$4 sm:$0xff]   ;;  %v6970_v60 = vcombine.high %v518_v54, %v522_v57  ;;  %v7712_v61 = vld [vmem:[#allocation13 + $0x184] ss:$16 sps:$4 sm:$0xff]   ;;  %v6969_v2 = vcombine.low %v518_v54, %v522_v57 }
 0x269   :  { %5553 = vmatprep.subr.bf16.mxu0 %v7697_v14  ;;  %v526_v40 = vld [vmem:[#allocation10 + $0x958] sm:$0xff] }
 0x26a   :  { %v530_v63 = vld [vmem:[#allocation10 + $0x978] sm:$0xff] }
 0x26b   :  { %3677 = vmatpush1.bf16.msra.mxu1 %v6929_v17  ;;  %v7710_v3 = vld [vmem:[#allocation13 + $0x180] ss:$16 sps:$4 sm:$0xff]   ;;  %v6978_v4 = vcombine.high %v526_v40, %v530_v63  ;;  %v7718_v8 = vld [vmem:[#allocation13 + $0x1c4] ss:$16 sps:$4 sm:$0xff]  }
 0x26c   :  { %5554 = vmatpush1.bf16.msra.mxu0 %v7695_v20  ;;  %3699 = vmatprep.subr.bf16.mxu1 %v6938_v24  ;;  %v534_v6 = vld [vmem:[#allocation10 + $0x998] sm:$0xff] }
 0x26d   :  { %5555 = vmatprep.subr.bf16.mxu0 %v7700_v25  ;;  %v538_v45 = vld [vmem:[#allocation10 + $0x9b8] sm:$0xff] }
 0x26e   :  { %3679 = vmatmul.mubr.bf16.vlgmr.msra.gmra.mrb[16].mxu1 %v8668_v27  ;;  %v7709_v27 = vld [vmem:[#allocation13 + $0x164] ss:$16 sps:$4 sm:$0xff]   ;;  %v7713_v7 = vld [vmem:[#allocation13 + $0x1a0] ss:$16 sps:$4 sm:$0xff]   ;;  %v6986_v11 = vcombine.high %v534_v6, %v538_v45  ;;  %v6985_v42 = vcombine.low %v534_v6, %v538_v45 }
 0x26f   :  { %3700 = vmatpush1.bf16.msra.mxu1 %v6937_v30  ;;  %3688 = vmatprep.mubr.bf16.mxu1 %v8673_v38  ;;  %v6961_v38 = vcombine.low %v510_v46, %v514_v48  ;;  %v542_v22 = vld [vmem:[#allocation10 + $0x9d8] sm:$0xff] }
 0x270   :  { %5556 = vmatpush1.bf16.msra.mxu0 %v7698_v31  ;;  %3701 = vmatprep.subr.bf16.mxu1 %v6946_v33  ;;  %v546_v47 = vld [vmem:[#allocation10 + $0x9f8] sm:$0xff] }
 0x271   :  { %5557 = vmatprep.subr.bf16.mxu0 %v7703_v34  ;;  %v7716_v10 = vld [vmem:[#allocation13 + $0x1c0] ss:$16 sps:$4 sm:$0xff]   ;;  %v6994_v12 = vcombine.high %v542_v22, %v546_v47  ;;  %v7721_v50 = vld [vmem:[#allocation13 + $0x1e4] ss:$16 sps:$4 sm:$0xff]   ;;  %v6993_v16 = vcombine.low %v542_v22, %v546_v47 }
 0x272   :  { %v550_v59 = vld [vmem:[#allocation10 + $0xa18] sm:$0xff] }
 0x273   :  { %3702 = vmatpush1.bf16.msra.mxu1 %v6945_v26  ;;  %v554_v14 = vld [vmem:[#allocation10 + $0xa38] sm:$0xff] }
 0x274   :  { %5558 = vmatpush1.bf16.msra.mxu0 %v7701_v37  ;;  %3703 = vmatprep.subr.bf16.mxu1 %v6954_v39  ;;  %v7719_v18 = vld [vmem:[#allocation13 + $0x1e0] ss:$16 sps:$4 sm:$0xff]   ;;  %v7002_v17 = vcombine.high %v550_v59, %v554_v14  ;;  %v7724_v20 = vld [vmem:[#allocation13 + $0x204] ss:$16 sps:$4 sm:$0xff]   ;;  %v7001_v23 = vcombine.low %v550_v59, %v554_v14 }
 0x275   :  { %5559 = vmatprep.subr.bf16.mxu0 %v7706_v43  ;;  %v558_v24 = vld [vmem:[#allocation10 + $0xa58] sm:$0xff] }
 0x276   :  { %3689 = vmatmul.mubr.bf16.gmra.mrb[20].mxu1 %v8680_v55  ;;  %v7715_v55 = vld [vmem:[#allocation13 + $0x1a4] ss:$16 sps:$4 sm:$0xff]   ;;  %v7722_v29 = vld [vmem:[#allocation13 + $0x200] ss:$16 sps:$4 sm:$0xff]  }
 0x277   :  { %3704 = vmatpush1.bf16.msra.mxu1 %v6953_v1  ;;  %3731 = vmatprep.mubr.bf16.mxu1 %v8682_v62  ;;  %v6977_v62 = vcombine.low %v526_v40, %v530_v63  ;;  %v562_v25 = vld [vmem:[#allocation10 + $0xa78] sm:$0xff] }
 0x278   :  { %5560 = vmatpush1.bf16.msra.mxu0 %v7704_v52  ;;  %3705 = vmatprep.subr.bf16.mxu1 %v6962_v53  ;;  %v7010_v30 = vcombine.high %v558_v24, %v562_v25  ;;  %v7727_v31 = vld [vmem:[#allocation13 + $0x224] ss:$16 sps:$4 sm:$0xff]   ;;  %v7009_v36 = vcombine.low %v558_v24, %v562_v25  ;;  %v7725_v35 = vld [vmem:[#allocation13 + $0x220] ss:$16 sps:$4 sm:$0xff]  }
 0x279   :  { %5561 = vmatprep.subr.bf16.mxu0 %v7709_v27  ;;  %v566_v33 = vld [vmem:[#allocation10 + $0xa98] sm:$0xff] }
 0x27a   :  { %v570_v34 = vld [vmem:[#allocation10 + $0xab8] sm:$0xff] }
 0x27b   :  { %3706 = vmatpush1.bf16.msra.mxu1 %v6961_v38  ;;  %v7018_v26 = vcombine.high %v566_v33, %v570_v34  ;;  %v7730_v37 = vld [vmem:[#allocation13 + $0x244] ss:$16 sps:$4 sm:$0xff]   ;;  %v7017_v46 = vcombine.low %v566_v33, %v570_v34  ;;  %v7728_v48 = vld [vmem:[#allocation13 + $0x240] ss:$16 sps:$4 sm:$0xff]  }
 0x27c   :  { %5562 = vmatpush1.bf16.msra.mxu0 %v7707_v58  ;;  %3707 = vmatprep.subr.bf16.mxu1 %v6970_v60  ;;  %v574_v39 = vld [vmem:[#allocation10 + $0xad8] sm:$0xff] }
 0x27d   :  { %5563 = vmatprep.subr.bf16.mxu0 %v7712_v61  ;;  %v578_v43 = vld [vmem:[#allocation10 + $0xaf8] sm:$0xff] }
 0x27e   :  { %v7026_v1 = vcombine.high %v574_v39, %v578_v43  ;;  %v7733_v52 = vld [vmem:[#allocation13 + $0x264] ss:$16 sps:$4 sm:$0xff]   ;;  %v7025_v54 = vcombine.low %v574_v39, %v578_v43  ;;  %v7731_v57 = vld [vmem:[#allocation13 + $0x260] ss:$16 sps:$4 sm:$0xff]  }
 0x27f   :  { %3708 = vmatpush1.bf16.msra.mxu1 %v6969_v2  ;;  %v582_v53 = vld [vmem:[#allocation10 + $0xb18] sm:$0xff] }
 0x280   :  { %5564 = vmatpush1.bf16.msra.mxu0 %v7710_v3  ;;  %3709 = vmatprep.subr.bf16.mxu1 %v6978_v4  ;;  %v586_v27 = vld [vmem:[#allocation10 + $0xb38] sm:$0xff] }
 0x281   :  { %5565 = vmatprep.subr.bf16.mxu0 %v7715_v55  ;;  %v7034_v38 = vcombine.high %v582_v53, %v586_v27  ;;  %v7736_v58 = vld [vmem:[#allocation13 + $0x284] ss:$16 sps:$4 sm:$0xff]   ;;  %v7033_v40 = vcombine.low %v582_v53, %v586_v27  ;;  %v7734_v63 = vld [vmem:[#allocation13 + $0x280] ss:$16 sps:$4 sm:$0xff]  }
 0x282   :  { %v590_v60 = vld [vmem:[#allocation10 + $0xb58] sm:$0xff] }
 0x283   :  { %3710 = vmatpush1.bf16.msra.mxu1 %v6977_v62  ;;  %v594_v61 = vld [vmem:[#allocation10 + $0xb78] sm:$0xff] }
 0x284   :  { %5566 = vmatpush1.bf16.msra.mxu0 %v7713_v7  ;;  %3711 = vmatprep.subr.bf16.mxu1 %v6986_v11  ;;  %v7042_v2 = vcombine.high %v590_v60, %v594_v61  ;;  %v7739_v3 = vld [vmem:[#allocation13 + $0x2a4] ss:$16 sps:$4 sm:$0xff]   ;;  %v7041_v6 = vcombine.low %v590_v60, %v594_v61  ;;  %v7737_v45 = vld [vmem:[#allocation13 + $0x2a0] ss:$16 sps:$4 sm:$0xff]   ;;  %v691_v60 = vsub.s32 3, %v8750_v13 }
 0x285   :  { %5567 = vmatprep.subr.bf16.mxu0 %v7718_v8  ;;  %v598_v4 = vld [vmem:[#allocation10 + $0xb98] sm:$0xff] }
 0x286   :  { %v602_v55 = vld [vmem:[#allocation10 + $0xbb8] sm:$0xff] }
 0x287   :  { %3712 = vmatpush1.bf16.msra.mxu1 %v6985_v42  ;;  %v7050_v62 = vcombine.high %v598_v4, %v602_v55  ;;  %v7742_v7 = vld [vmem:[#allocation13 + $0x2c4] ss:$16 sps:$4 sm:$0xff]   ;;  %v7049_v22 = vcombine.low %v598_v4, %v602_v55  ;;  %v7740_v47 = vld [vmem:[#allocation13 + $0x2c0] ss:$16 sps:$4 sm:$0xff]   ;;  %v8843_v4 = vrot.slane %v8758_v32, %v691_v60 }
 0x288   :  { %5568 = vmatpush1.bf16.msra.mxu0 %v7716_v10  ;;  %3713 = vmatprep.subr.bf16.mxu1 %v6994_v12  ;;  %v606_v11 = vld [vmem:[#allocation10 + $0xbd8] sm:$0xff] }
 0x289   :  { %5569 = vmatprep.subr.bf16.mxu0 %v7721_v50  ;;  %v610_v8 = vld [vmem:[#allocation10 + $0xbf8] sm:$0xff] }
 0x28a   :  { %v7058_v42 = vcombine.high %v606_v11, %v610_v8  ;;  %v7745_v10 = vld [vmem:[#allocation13 + $0x2e4] ss:$16 sps:$4 sm:$0xff]   ;;  %v7057_v59 = vcombine.low %v606_v11, %v610_v8  ;;  %v7743_v14 = vld [vmem:[#allocation13 + $0x2e0] ss:$16 sps:$4 sm:$0xff]  }
 0x28b   :  { %3714 = vmatpush1.bf16.msra.mxu1 %v6993_v16  ;;  %v614_v12 = vld [vmem:[#allocation10 + $0xc18] sm:$0xff] }
 0x28c   :  { %5570 = vmatpush1.bf16.msra.mxu0 %v7719_v18  ;;  %3715 = vmatprep.subr.bf16.mxu1 %v7002_v17  ;;  %v618_v50 = vld [vmem:[#allocation10 + $0xc38] sm:$0xff] }
 0x28d   :  { %5592 = vmatprep.subr.bf16.mxu0 %v7724_v20  ;;  %v7066_v16 = vcombine.high %v614_v12, %v618_v50  ;;  %v7748_v18 = vld [vmem:[#allocation13 + $0x304] ss:$16 sps:$4 sm:$0xff]   ;;  %v7065_v24 = vcombine.low %v614_v12, %v618_v50  ;;  %v7746_v25 = vld [vmem:[#allocation13 + $0x300] ss:$16 sps:$4 sm:$0xff]  }
 0x28e   :  { %v622_v17 = vld [vmem:[#allocation10 + $0xc58] sm:$0xff] }
 0x28f   :  { %5572 = vmatmul.mubr.bf16.vlgmr.msra.gmra.mrb[16].mxu0 %v8807_v5  ;;  %3716 = vmatpush1.bf16.msra.mxu1 %v7001_v23  ;;  %v626_v20 = vld [vmem:[#allocation10 + $0xc78] sm:$0xff] }
 0x290   :  { %5581 = vmatprep.mubr.bf16.mxu0 %v8818_v56  ;;  %5593 = vmatpush1.bf16.msra.mxu0 %v7722_v29  ;;  %v7074_v23 = vcombine.high %v622_v17, %v626_v20  ;;  %v7751_v29 = vld [vmem:[#allocation13 + $0x324] ss:$16 sps:$4 sm:$0xff]   ;;  %v7073_v33 = vcombine.low %v622_v17, %v626_v20  ;;  %v7749_v34 = vld [vmem:[#allocation13 + $0x320] ss:$16 sps:$4 sm:$0xff]  }
 0x291   :  { %3717 = vmatprep.subr.bf16.mxu1 %v7010_v30  ;;  %5594 = vmatprep.subr.bf16.mxu0 %v7727_v31  ;;  %v630_v30 = vld [vmem:[#allocation10 + $0xc98] sm:$0xff] }
 0x292   :  { %v634_v31 = vld [vmem:[#allocation10 + $0xcb8] sm:$0xff] }
 0x293   :  { %3718 = vmatpush1.bf16.msra.mxu1 %v7009_v36  ;;  %v7082_v36 = vcombine.high %v630_v30, %v634_v31  ;;  %v7081_v39 = vcombine.low %v630_v30, %v634_v31  ;;  %v7752_v43 = vld [vmem:[#allocation13 + $0x340] ss:$16 sps:$4 sm:$0xff]   ;;  %v7760_v27 = vld [vmem:[#allocation13 + $0x384] ss:$16 sps:$4 sm:$0xff]  }
 0x294   :  { %5595 = vmatpush1.bf16.msra.mxu0 %v7725_v35  ;;  %3719 = vmatprep.subr.bf16.mxu1 %v7018_v26  ;;  %v7754_v35 = vld [vmem:[#allocation13 + $0x344] ss:$16 sps:$4 sm:$0xff]  }
 0x295   :  { %5596 = vmatprep.subr.bf16.mxu0 %v7730_v37  ;;  %v638_v26 = vld [vmem:[#allocation10 + $0xcd8] sm:$0xff] }
 0x296   :  { %v642_v37 = vld [vmem:[#allocation10 + $0xcf8] sm:$0xff] }
 0x297   :  { %5582 = vmatmul.mubr.bf16.gmra.mrb[20].mxu0 %v8816_v49  ;;  %3720 = vmatpush1.bf16.msra.mxu1 %v7017_v46  ;;  %v7090_v46 = vcombine.high %v638_v26, %v642_v37  ;;  %v670_v11 = vld [vmem:[#allocation10 + $0xdd8] sm:$0xff] }
 0x298   :  { %5597 = vmatpush1.bf16.msra.mxu0 %v7728_v48  ;;  %3721 = vmatprep.subr.bf16.mxu1 %v7026_v1  ;;  %v646_v48 = vld [vmem:[#allocation10 + $0xd18] sm:$0xff] }
 0x299   :  { %5598 = vmatprep.subr.bf16.mxu0 %v7733_v52  ;;  %v650_v1 = vld [vmem:[#allocation10 + $0xd38] sm:$0xff] }
 0x29a   :  { %v7755_v52 = vld [vmem:[#allocation13 + $0x360] ss:$16 sps:$4 sm:$0xff]   ;;  %v7098_v53 = vcombine.high %v646_v48, %v650_v1  ;;  %v7769_v20 = vld [vmem:[#allocation13 + $0x3e4] ss:$16 sps:$4 sm:$0xff]  }
 0x29b   :  { %3722 = vmatpush1.bf16.msra.mxu1 %v7025_v54  ;;  %v654_v54 = vld [vmem:[#allocation10 + $0xd58] sm:$0xff] }
 0x29c   :  { %5599 = vmatpush1.bf16.msra.mxu0 %v7731_v57  ;;  %3723 = vmatprep.subr.bf16.mxu1 %v7034_v38  ;;  %v658_v57 = vld [vmem:[#allocation10 + $0xd78] sm:$0xff]  ;;  %v687_v38 = vsub.s32 2, %v8750_v13 }
 0x29d   :  { %5600 = vmatprep.subr.bf16.mxu0 %v7736_v58  ;;  %v7097_v58 = vcombine.low %v646_v48, %v650_v1  ;;  %v7106_v61 = vcombine.high %v654_v54, %v658_v57  ;;  %v7105_v55 = vcombine.low %v654_v54, %v658_v57  ;;  %v674_v8 = vld [vmem:[#allocation10 + $0xdf8] sm:$0xff] }
 0x29e   :  { %v7799_v48 = vld [vmem:[#allocation13 + $0x404] ss:$16 sps:$4 sm:$0xff]  }
 0x29f   :  { %3724 = vmatpush1.bf16.msra.mxu1 %v7033_v40  ;;  %v7763_v40 = vld [vmem:[#allocation13 + $0x3a4] ss:$16 sps:$4 sm:$0xff]  }
 0x2a0   :  { %5601 = vmatpush1.bf16.msra.mxu0 %v7734_v63  ;;  %3725 = vmatprep.subr.bf16.mxu1 %v7042_v2  ;;  %v662_v63 = vld [vmem:[#allocation10 + $0xd98] sm:$0xff] }
 0x2a1   :  { %5602 = vmatprep.subr.bf16.mxu0 %v7739_v3  ;;  %v666_v2 = vld [vmem:[#allocation10 + $0xdb8] sm:$0xff]  ;;  %v8838_v3 = vrot.slane %v8758_v32, %v687_v38 }
 0x2a2   :  { %v7113_v12 = vcombine.low %v662_v63, %v666_v2 }
 0x2a3   :  { %3726 = vmatpush1.bf16.msra.mxu1 %v7041_v6  ;;  %v7761_v6 = vld [vmem:[#allocation13 + $0x3a0] ss:$16 sps:$4 sm:$0xff]  }
 0x2a4   :  { %5603 = vmatpush1.bf16.msra.mxu0 %v7737_v45  ;;  %3727 = vmatprep.subr.bf16.mxu1 %v7050_v62  ;;  %v7114_v45 = vcombine.high %v662_v63, %v666_v2  ;;  %v7775_v2 = vld [vmem:[#allocation13 + $0x2c] ss:$16 sps:$4 sm:$0xff]  }
 0x2a5   :  { %5604 = vmatprep.subr.bf16.mxu0 %v7742_v7  ;;  %v7766_v7 = vld [vmem:[#allocation13 + $0x3c4] ss:$16 sps:$4 sm:$0xff]  }
 0x2a7   :  { %3728 = vmatpush1.bf16.msra.mxu1 %v7049_v22 }
 0x2a8   :  { %5605 = vmatpush1.bf16.msra.mxu0 %v7740_v47  ;;  %3729 = vmatprep.subr.bf16.mxu1 %v7058_v42 }
 0x2a9   :  { %5606 = vmatprep.subr.bf16.mxu0 %v7745_v10 }
 0x2ab   :  { %3730 = vmatpush1.bf16.msra.mxu1 %v7057_v59 }
 0x2ac   :  { %5607 = vmatpush1.bf16.msra.mxu0 %v7743_v14  ;;  %3752 = vmatprep.subr.bf16.mxu1 %v7066_v16  ;;  %v7764_v14 = vld [vmem:[#allocation13 + $0x3c0] ss:$16 sps:$4 sm:$0xff]   ;;  %v7122_v16 = vcombine.high %v670_v11, %v674_v8 }
 0x2ad   :  { %5608 = vmatprep.subr.bf16.mxu0 %v7748_v18 }
 0x2ae   :  { %3732 = vmatmul.mubr.bf16.vlgmr.msra.gmra.mrb[16].mxu1 %v8688_v0  ;;  %v7757_v0 = vld [vmem:[#allocation13 + $0x364] ss:$16 sps:$4 sm:$0xff]  }
 0x2af   :  { %3753 = vmatpush1.bf16.msra.mxu1 %v7065_v24  ;;  %3741 = vmatprep.mubr.bf16.mxu1 %v8690_v9  ;;  %v7089_v9 = vcombine.low %v638_v26, %v642_v37  ;;  %v7767_v26 = vld [vmem:[#allocation13 + $0x3e0] ss:$16 sps:$4 sm:$0xff]   ;;  %v7772_v37 = vld [vmem:[#allocation13 + $0xc] ss:$16 sps:$4 sm:$0xff]  }
 0x2b0   :  { %5609 = vmatpush1.bf16.msra.mxu0 %v7746_v25  ;;  %3754 = vmatprep.subr.bf16.mxu1 %v7074_v23  ;;  %v3903_v25 = vld [vmem:[#allocation5 + $0x10] sm:$0xff] }
 0x2b1   :  { %5610 = vmatprep.subr.bf16.mxu0 %v7751_v29  ;;  %v3911_v29 = vld [vmem:[#allocation5 + $0x50] sm:$0xff] }
 0x2b3   :  { %3755 = vmatpush1.bf16.msra.mxu1 %v7073_v33  ;;  %v7121_v33 = vcombine.low %v670_v11, %v674_v8 }
 0x2b4   :  { %5611 = vmatpush1.bf16.msra.mxu0 %v7749_v34  ;;  %3756 = vmatprep.subr.bf16.mxu1 %v7082_v36  ;;  %v3904_v34 = vld [vmem:[#allocation5 + $0x18] sm:$0xff] }
 0x2b5   :  { %5612 = vmatprep.subr.bf16.mxu0 %v7754_v35  ;;  %v3912_v36 = vld [vmem:[#allocation5 + $0x58] sm:$0xff] }
 0x2b6   :  { %3742 = vmatmul.mubr.bf16.gmra.mrb[20].mxu1 %v8696_v21  ;;  %v7758_v21 = vld [vmem:[#allocation13 + $0x380] ss:$16 sps:$4 sm:$0xff]  }
 0x2b7   :  { %3757 = vmatpush1.bf16.msra.mxu1 %v7081_v39  ;;  %3784 = vmatprep.mubr.bf16.mxu1 %v8446_v41 }
 0x2b8   :  { %5613 = vmatpush1.bf16.msra.mxu0 %v7752_v43  ;;  %3758 = vmatprep.subr.bf16.mxu1 %v7090_v46 }
 0x2b9   :  { %5614 = vmatprep.subr.bf16.mxu0 %v7757_v0 }
 0x2bb   :  { %3759 = vmatpush1.bf16.msra.mxu1 %v7089_v9 }
 0x2bc   :  { %5615 = vmatpush1.bf16.msra.mxu0 %v7755_v52  ;;  %3760 = vmatprep.subr.bf16.mxu1 %v7098_v53 }
 0x2bd   :  { %5616 = vmatprep.subr.bf16.mxu0 %v7760_v27 }
 0x2bf   :  { %3761 = vmatpush1.bf16.msra.mxu1 %v7097_v58  ;;  %v7770_v58 = vld [vmem:[#allocation13 + $0x8] ss:$16 sps:$4 sm:$0xff]  }
 0x2c0   :  { %5617 = vmatpush1.bf16.msra.mxu0 %v7758_v21  ;;  %3762 = vmatprep.subr.bf16.mxu1 %v7106_v61 }
 0x2c1   :  { %v3362_v62 = vpop.f32.mrb[8].mxu1  ;;  %5618 = vmatprep.subr.bf16.mxu0 %v7763_v40 }
 0x2c2   :  { %v7460_v22 = vadd.f32 %v3362_v62, %v8838_v3  ;;  %v3364_v47 = vpop.f32.mrb[9].mxu1  ;;  %v3920_v62 = vld [vmem:[#allocation5 + $0x98] sm:$0xff] }
 0x2c3   :  { %v7461_v42 = vadd.f32 %v3364_v47, %v8843_v4  ;;  %v3366_v10 = vpop.f32.mrb[10].mxu1  ;;  %3763 = vmatpush1.bf16.msra.mxu1 %v7105_v55  ;;  %v3919_v55 = vld [vmem:[#allocation5 + $0x90] sm:$0xff] }
 0x2c4   :  { %vm3807_vm8 = vcmp.ge.f32.partialorder %v7460_v22, 0.0  ;;  %v3839_v32 = vmul.f32 0.2, %v7460_v22  ;;  %v7462_v50 = vadd.f32 %v3366_v10, %v8838_v3  ;;  %v3368_v59 = vpop.f32.mrb[11].mxu1  ;;  %5619 = vmatpush1.bf16.msra.mxu0 %v7761_v6  ;;  %3764 = vmatprep.subr.bf16.mxu1 %v7114_v45  ;;  %v7773_v10 = vld [vmem:[#allocation13 + $0x28] ss:$16 sps:$4 sm:$0xff]  }
 0x2c5   :  { %vm3808_vm9 = vcmp.ge.f32.partialorder %v7461_v42, 0.0  ;;  %v3840_v18 = vmul.f32 0.2, %v7461_v42  ;;  %v7463_v17 = vadd.f32 %v3368_v59, %v8843_v4  ;;  %5620 = vmatprep.subr.bf16.mxu0 %v7766_v7  ;;  %v7797_v7 = vld [vmem:[#allocation13 + $0x400] ss:$16 sps:$4 sm:$0xff]  }
 0x2c6   :  { %v3871_v24 = vsel %vm3807_vm8, %v7460_v22, %v3839_v32  ;;  %vm3815_vm10 = vcmp.ge.f32.partialorder %v7462_v50, 0.0  ;;  %v3847_v23 = vmul.f32 0.2, %v7462_v50  ;;  %v7805_v22 = vld [vmem:[#allocation13 + $0x424] ss:$16 sps:$4 sm:$0xff]  }
 0x2c7   :  { %v3872_v30 = vsel %vm3808_vm9, %v7461_v42, %v3840_v18  ;;  %vm3816_vm11 = vcmp.ge.f32.partialorder %v7463_v17, 0.0  ;;  %v3848_v31 = vmul.f32 0.2, %v7463_v17  ;;  %3765 = vmatpush1.bf16.msra.mxu1 %v7113_v12  ;;  %v3935_v39 = vmul.f32 %v3903_v25, %v3871_v24  ;;  %v7778_v32 = vld [vmem:[#allocation13 + $0x4c] ss:$16 sps:$4 sm:$0xff]  }
 0x2c8   :  { %v3879_v35 = vsel %vm3815_vm10, %v7462_v50, %v3847_v23  ;;  %5621 = vmatpush1.bf16.msra.mxu0 %v7764_v14  ;;  %3766 = vmatprep.subr.bf16.mxu1 %v7122_v16  ;;  %v3936_v52 = vmul.f32 %v3904_v34, %v3872_v30  ;;  %v7803_v14 = vld [vmem:[#allocation13 + $0x420] ss:$16 sps:$4 sm:$0xff]   ;;  %v7781_v25 = vld [vmem:[#allocation13 + $0x6c] ss:$16 sps:$4 sm:$0xff]   ;;  %v7811_v23 = vld [vmem:[#allocation13 + $0x444] ss:$16 sps:$4 sm:$0xff]  }
 0x2c9   :  { %v3943_v43 = vmul.f32 %v3911_v29, %v3879_v35  ;;  %v3880_v46 = vsel %vm3816_vm11, %v7463_v17, %v3848_v31  ;;  %v3372_v0 = vpop.f32.mrb[12].mxu1  ;;  %5622 = vmatprep.subr.bf16.mxu0 %v7769_v20  ;;  %v7776_v17 = vld [vmem:[#allocation13 + $0x48] ss:$16 sps:$4 sm:$0xff]   ;;  %v7817_v30 = vld [vmem:[#allocation13 + $0x464] ss:$16 sps:$4 sm:$0xff]  }
 0x2ca   :  { %v7464_v1 = vadd.f32 %v3372_v0, %v8838_v3  ;;  %v3374_v9 = vpop.f32.mrb[13].mxu1  ;;  %v3944_v53 = vmul.f32 %v3912_v36, %v3880_v46  ;;  %v7779_v29 = vld [vmem:[#allocation13 + $0x68] ss:$16 sps:$4 sm:$0xff]   ;;  %v7784_v31 = vld [vmem:[#allocation13 + $0x8c] ss:$16 sps:$4 sm:$0xff]  }
 0x2cb   :  { %v8850_v27 = vpack.c.bf16 %v3943_v43, %v3935_v39  ;;  %v7465_v54 = vadd.f32 %v3374_v9, %v8843_v4  ;;  %v3376_v57 = vpop.f32.mrb[14].mxu1  ;;  %3767 = vmatpush1.bf16.msra.mxu1 %v7121_v33  ;;  %v7815_v33 = vld [vmem:[#allocation13 + $0x460] ss:$16 sps:$4 sm:$0xff]   ;;  %v7782_v34 = vld [vmem:[#allocation13 + $0x88] ss:$16 sps:$4 sm:$0xff]  }
 0x2cc   :  { %vm3823_vm12 = vcmp.ge.f32.partialorder %v7464_v1, 0.0  ;;  %v3855_v21 = vmul.f32 0.2, %v7464_v1  ;;  %v7466_v61 = vadd.f32 %v3376_v57, %v8838_v3  ;;  %v3378_v40 = vpop.f32.mrb[15].mxu1  ;;  %5623 = vmatpush1.bf16.msra.mxu0 %v7767_v26  ;;  %v8854_v63 = vpack.c.bf16 %v3944_v53, %v3936_v52  ;;  %5751 = vmatprep.subr.bf16.mxu1 %v7772_v37  ;;  %v3927_v3 = vld [vmem:[#allocation5 + $0xd0] sm:$0xff] }
 0x2cd   :  { %vm3824_vm13 = vcmp.ge.f32.partialorder %v7465_v54, 0.0  ;;  %v3856_v6 = vmul.f32 0.2, %v7465_v54  ;;  %v7467_v45 = vadd.f32 %v3378_v40, %v8843_v4  ;;  %5645 = vmatprep.subr.bf16.mxu0 %v7799_v48  ;;  %v3928_v4 = vld [vmem:[#allocation5 + $0xd8] sm:$0xff]  ;;  %v7785_v26 = vld [vmem:[#allocation13 + $0xa8] ss:$16 sps:$4 sm:$0xff]  }
 0x2ce   :  { %v3887_v11 = vsel %vm3823_vm12, %v7464_v1, %v3855_v21  ;;  %vm3831_vm14 = vcmp.ge.f32.partialorder %v7466_v61, 0.0  ;;  %v3863_v8 = vmul.f32 0.2, %v7466_v61  ;;  %3785 = vmatmul.mubr.bf16.vlgmr.msra.gmra.mrb[16].mxu1 %v8702_v19  ;;  %5624 = vmatprep.mubr.bf16.mxu0 %v8854_v63  ;;  %v7823_v36 = vld [vmem:[#allocation13 + $0x484] ss:$16 sps:$4 sm:$0xff]  }
 0x2cf   :  { %v3888_v47 = vsel %vm3824_vm13, %v7465_v54, %v3856_v6  ;;  %vm3832_vm15 = vcmp.ge.f32.partialorder %v7467_v45, 0.0  ;;  %v3864_v42 = vmul.f32 0.2, %v7467_v45  ;;  %5625 = vmatmul.mubr.bf16.vlgmr.msra.gmra.mrb[16].mxu0 %v8850_v27  ;;  %5752 = vmatpush1.bf16.msra.mxu1 %v7770_v58  ;;  %v3951_v59 = vmul.f32 %v3919_v55, %v3887_v11  ;;  %v7821_v35 = vld [vmem:[#allocation13 + $0x480] ss:$16 sps:$4 sm:$0xff]  }
 0x2d0   :  { %v3895_v12 = vsel %vm3831_vm14, %v7466_v61, %v3863_v8  ;;  %5753 = vmatprep.subr.bf16.mxu1 %v7775_v2  ;;  %3794 = vmatprep.mubr.bf16.mxu1 %v8446_v41  ;;  %v3952_v16 = vmul.f32 %v3920_v62, %v3888_v47  ;;  %v7809_v41 = vld [vmem:[#allocation13 + $0x440] ss:$16 sps:$4 sm:$0xff]   ;;  %v7829_v37 = vld [vmem:[#allocation13 + $0x4a4] ss:$16 sps:$4 sm:$0xff]   ;;  %v7790_v39 = vld [vmem:[#allocation13 + $0xcc] ss:$16 sps:$4 sm:$0xff]  }
 0x2d1   :  { %v3896_v50 = vsel %vm3832_vm15, %v7467_v45, %v3864_v42  ;;  %v3959_v19 = vmul.f32 %v3927_v3, %v3895_v12  ;;  %5646 = vmatpush1.bf16.msra.mxu0 %v7797_v7  ;;  %v7788_v43 = vld [vmem:[#allocation13 + $0xc8] ss:$16 sps:$4 sm:$0xff]   ;;  %v7835_v46 = vld [vmem:[#allocation13 + $0x4c4] ss:$16 sps:$4 sm:$0xff]   ;;  %v7793_v0 = vld [vmem:[#allocation13 + $0xec] ss:$16 sps:$4 sm:$0xff]  }
 0x2d2   :  { %v3960_v18 = vmul.f32 %v3928_v4, %v3896_v50  ;;  %5647 = vmatprep.subr.bf16.mxu0 %v7805_v22  ;;  %v7833_v48 = vld [vmem:[#allocation13 + $0x4c0] ss:$16 sps:$4 sm:$0xff]   ;;  %v7791_v1 = vld [vmem:[#allocation13 + $0xe8] ss:$16 sps:$4 sm:$0xff]   ;;  %v7841_v9 = vld [vmem:[#allocation13 + $0x4e4] ss:$16 sps:$4 sm:$0xff]  }
 0x2d3   :  { %5754 = vmatpush1.bf16.msra.mxu1 %v7773_v10  ;;  %v8861_v20 = vpack.c.bf16 %v3959_v19, %v3951_v59  ;;  %v7796_v52 = vld [vmem:[#allocation13 + $0x10c] ss:$16 sps:$4 sm:$0xff]   ;;  %v7839_v53 = vld [vmem:[#allocation13 + $0x4e0] ss:$16 sps:$4 sm:$0xff]   ;;  %v7794_v54 = vld [vmem:[#allocation13 + $0x108] ss:$16 sps:$4 sm:$0xff]  }
 0x2d4   :  { %v8863_v24 = vpack.c.bf16 %v3960_v18, %v3952_v16  ;;  %5755 = vmatprep.subr.bf16.mxu1 %v7778_v32  ;;  %v7847_v57 = vld [vmem:[#allocation13 + $0x504] ss:$16 sps:$4 sm:$0xff]   ;;  %v7802_v58 = vld [vmem:[#allocation13 + $0x12c] ss:$16 sps:$4 sm:$0xff]   ;;  %v7845_v21 = vld [vmem:[#allocation13 + $0x500] ss:$16 sps:$4 sm:$0xff]  }
 0x2d5   :  { %5648 = vmatpush1.bf16.msra.mxu0 %v7803_v14  ;;  %v7800_v61 = vld [vmem:[#allocation13 + $0x128] ss:$16 sps:$4 sm:$0xff]   ;;  %v7853_v40 = vld [vmem:[#allocation13 + $0x524] ss:$16 sps:$4 sm:$0xff]   ;;  %v7808_v2 = vld [vmem:[#allocation13 + $0x14c] ss:$16 sps:$4 sm:$0xff]  }
 0x2d6   :  { %3795 = vmatmul.mubr.bf16.gmra.mrb[20].mxu1 %v8706_v44  ;;  %5634 = vmatprep.mubr.bf16.mxu0 %v8863_v24  ;;  %v7787_v44 = vld [vmem:[#allocation13 + $0xac] ss:$16 sps:$4 sm:$0xff]   ;;  %v7851_v55 = vld [vmem:[#allocation13 + $0x520] ss:$16 sps:$4 sm:$0xff]   ;;  %v7806_v6 = vld [vmem:[#allocation13 + $0x148] ss:$16 sps:$4 sm:$0xff]  }
 0x2d7   :  { %5635 = vmatmul.mubr.bf16.gmra.mrb[20].mxu0 %v8861_v20  ;;  %5756 = vmatpush1.bf16.msra.mxu1 %v7776_v17  ;;  %v7859_v45 = vld [vmem:[#allocation13 + $0x544] ss:$16 sps:$4 sm:$0xff]   ;;  %v7814_v62 = vld [vmem:[#allocation13 + $0x16c] ss:$16 sps:$4 sm:$0xff]   ;;  %v7857_v7 = vld [vmem:[#allocation13 + $0x540] ss:$16 sps:$4 sm:$0xff]  }
 0x2d8   :  { %5783 = vmatprep.mubr.bf16.mxu1 %v8809_v15  ;;  %5757 = vmatprep.subr.bf16.mxu1 %v7781_v25  ;;  %v7827_v15 = vld [vmem:[#allocation13 + $0x4a0] ss:$16 sps:$4 sm:$0xff]   ;;  %v7812_v11 = vld [vmem:[#allocation13 + $0x168] ss:$16 sps:$4 sm:$0xff]   ;;  %v7865_v8 = vld [vmem:[#allocation13 + $0x564] ss:$16 sps:$4 sm:$0xff]  }
 0x2d9   :  { %5649 = vmatprep.subr.bf16.mxu0 %v7811_v23  ;;  %v7820_v3 = vld [vmem:[#allocation13 + $0x18c] ss:$16 sps:$4 sm:$0xff]   ;;  %v7863_v22 = vld [vmem:[#allocation13 + $0x560] ss:$16 sps:$4 sm:$0xff]   ;;  %v7818_v47 = vld [vmem:[#allocation13 + $0x188] ss:$16 sps:$4 sm:$0xff]  }
 0x2da   :  { %5650 = vmatpush1.bf16.msra.mxu0 %v7809_v41  ;;  %v7871_v42 = vld [vmem:[#allocation13 + $0x584] ss:$16 sps:$4 sm:$0xff]   ;;  %v7826_v10 = vld [vmem:[#allocation13 + $0x1ac] ss:$16 sps:$4 sm:$0xff]   ;;  %v7869_v4 = vld [vmem:[#allocation13 + $0x580] ss:$16 sps:$4 sm:$0xff]  }
 0x2db   :  { %5758 = vmatpush1.bf16.msra.mxu1 %v7779_v29  ;;  %5651 = vmatprep.subr.bf16.mxu0 %v7817_v30  ;;  %v7824_v12 = vld [vmem:[#allocation13 + $0x1a8] ss:$16 sps:$4 sm:$0xff]   ;;  %v7877_v32 = vld [vmem:[#allocation13 + $0x5a4] ss:$16 sps:$4 sm:$0xff]   ;;  %v7832_v50 = vld [vmem:[#allocation13 + $0x1cc] ss:$16 sps:$4 sm:$0xff]  }
 0x2dc   :  { %5759 = vmatprep.subr.bf16.mxu1 %v7784_v31  ;;  %v7875_v59 = vld [vmem:[#allocation13 + $0x5a0] ss:$16 sps:$4 sm:$0xff]   ;;  %v7830_v19 = vld [vmem:[#allocation13 + $0x1c8] ss:$16 sps:$4 sm:$0xff]   ;;  %v7883_v14 = vld [vmem:[#allocation13 + $0x5c4] ss:$16 sps:$4 sm:$0xff]  }
 0x2dd   :  { %v7838_v16 = vld [vmem:[#allocation13 + $0x1ec] ss:$16 sps:$4 sm:$0xff]   ;;  %v7881_v18 = vld [vmem:[#allocation13 + $0x5c0] ss:$16 sps:$4 sm:$0xff]   ;;  %v7836_v17 = vld [vmem:[#allocation13 + $0x1e8] ss:$16 sps:$4 sm:$0xff]  }
 0x2de   :  { %5652 = vmatpush1.bf16.msra.mxu0 %v7815_v33  ;;  %v7889_v25 = vld [vmem:[#allocation13 + $0x5e4] ss:$16 sps:$4 sm:$0xff]   ;;  %v7844_v23 = vld [vmem:[#allocation13 + $0x20c] ss:$16 sps:$4 sm:$0xff]   ;;  %v7887_v41 = vld [vmem:[#allocation13 + $0x5e0] ss:$16 sps:$4 sm:$0xff]  }
 0x2df   :  { %5760 = vmatpush1.bf16.msra.mxu1 %v7782_v34  ;;  %5653 = vmatprep.subr.bf16.mxu0 %v7823_v36  ;;  %v7842_v29 = vld [vmem:[#allocation13 + $0x208] ss:$16 sps:$4 sm:$0xff]   ;;  %v7850_v30 = vld [vmem:[#allocation13 + $0x22c] ss:$16 sps:$4 sm:$0xff]   ;;  %v7943_v31 = vld [vmem:[#allocation13 + $0x604] ss:$16 sps:$4 sm:$0xff]  }
 0x2e0   :  { %5761 = vmatprep.subr.bf16.mxu1 %v7787_v44  ;;  %v7848_v33 = vld [vmem:[#allocation13 + $0x228] ss:$16 sps:$4 sm:$0xff]   ;;  %v7856_v34 = vld [vmem:[#allocation13 + $0x24c] ss:$16 sps:$4 sm:$0xff]  }
 0x2e1   :  { %v7854_v36 = vld [vmem:[#allocation13 + $0x248] ss:$16 sps:$4 sm:$0xff]   ;;  %v7862_v44 = vld [vmem:[#allocation13 + $0x26c] ss:$16 sps:$4 sm:$0xff]  }
 0x2e2   :  { %5654 = vmatpush1.bf16.msra.mxu0 %v7821_v35  ;;  %v7860_v35 = vld [vmem:[#allocation13 + $0x268] ss:$16 sps:$4 sm:$0xff]  }
 0x2e3   :  { %5762 = vmatpush1.bf16.msra.mxu1 %v7785_v26  ;;  %5655 = vmatprep.subr.bf16.mxu0 %v7829_v37  ;;  %v7866_v26 = vld [vmem:[#allocation13 + $0x288] ss:$16 sps:$4 sm:$0xff]   ;;  %v699_v37 = vsub.s32 5, %v8750_v13 }
 0x2e4   :  { %5763 = vmatprep.subr.bf16.mxu1 %v7790_v39  ;;  %v7874_v39 = vld [vmem:[#allocation13 + $0x2ac] ss:$16 sps:$4 sm:$0xff]  }
 0x2e6   :  { %5656 = vmatpush1.bf16.msra.mxu0 %v7827_v15  ;;  %v8875_v15 = vld [vmem:[#allocation11] sm:$0xff] }
 0x2e7   :  { %5764 = vmatpush1.bf16.msra.mxu1 %v7788_v43  ;;  %5657 = vmatprep.subr.bf16.mxu0 %v7835_v46  ;;  %v700_v46 = vrot.slane %v8875_v15, %v699_v37  ;;  %v3929_v37 = vld [vmem:[#allocation5 + $0xe0] sm:$0xff] }
 0x2e8   :  { %5765 = vmatprep.subr.bf16.mxu1 %v7793_v0 }
 0x2ea   :  { %5658 = vmatpush1.bf16.msra.mxu0 %v7833_v48 }
 0x2eb   :  { %5766 = vmatpush1.bf16.msra.mxu1 %v7791_v1  ;;  %5659 = vmatprep.subr.bf16.mxu0 %v7841_v9  ;;  %v7878_v9 = vld [vmem:[#allocation13 + $0x2c8] ss:$16 sps:$4 sm:$0xff]  }
 0x2ec   :  { %5767 = vmatprep.subr.bf16.mxu1 %v7796_v52 }
 0x2ee   :  { %5660 = vmatpush1.bf16.msra.mxu0 %v7839_v53 }
 0x2ef   :  { %5768 = vmatpush1.bf16.msra.mxu1 %v7794_v54  ;;  %5661 = vmatprep.subr.bf16.mxu0 %v7847_v57  ;;  %v7886_v54 = vld [vmem:[#allocation13 + $0x2ec] ss:$16 sps:$4 sm:$0xff]  }
 0x2f0   :  { %5769 = vmatprep.subr.bf16.mxu1 %v7802_v58 }
 0x2f2   :  { %5662 = vmatpush1.bf16.msra.mxu0 %v7845_v21 }
 0x2f3   :  { %5770 = vmatpush1.bf16.msra.mxu1 %v7800_v61  ;;  %5663 = vmatprep.subr.bf16.mxu0 %v7853_v40  ;;  %v3905_v61 = vld [vmem:[#allocation5 + $0x20] sm:$0xff] }
 0x2f4   :  { %5771 = vmatprep.subr.bf16.mxu1 %v7808_v2 }
 0x2f6   :  { %5664 = vmatpush1.bf16.msra.mxu0 %v7851_v55  ;;  %v3906_v55 = vld [vmem:[#allocation5 + $0x28] sm:$0xff] }
 0x2f7   :  { %5772 = vmatpush1.bf16.msra.mxu1 %v7806_v6  ;;  %5665 = vmatprep.subr.bf16.mxu0 %v7859_v45 }
 0x2f8   :  { %5773 = vmatprep.subr.bf16.mxu1 %v7814_v62  ;;  %v3913_v62 = vld [vmem:[#allocation5 + $0x60] sm:$0xff] }
 0x2fa   :  { %5666 = vmatpush1.bf16.msra.mxu0 %v7857_v7  ;;  %v7884_v7 = vld [vmem:[#allocation13 + $0x2e8] ss:$16 sps:$4 sm:$0xff]  }
 0x2fb   :  { %5774 = vmatpush1.bf16.msra.mxu1 %v7812_v11  ;;  %5667 = vmatprep.subr.bf16.mxu0 %v7865_v8 }
 0x2fc   :  { %5775 = vmatprep.subr.bf16.mxu1 %v7820_v3  ;;  %v3914_v3 = vld [vmem:[#allocation5 + $0x68] sm:$0xff] }
 0x2fe   :  { %5668 = vmatpush1.bf16.msra.mxu0 %v7863_v22  ;;  %v7892_v22 = vld [vmem:[#allocation13 + $0x30c] ss:$16 sps:$4 sm:$0xff]  }
 0x2ff   :  { %5776 = vmatpush1.bf16.msra.mxu1 %v7818_v47  ;;  %5669 = vmatprep.subr.bf16.mxu0 %v7871_v42 }
 0x300   :  { %5777 = vmatprep.subr.bf16.mxu1 %v7826_v10 }
 0x302   :  { %5670 = vmatpush1.bf16.msra.mxu0 %v7869_v4 }
 0x303   :  { %5778 = vmatpush1.bf16.msra.mxu1 %v7824_v12  ;;  %5671 = vmatprep.subr.bf16.mxu0 %v7877_v32 }
 0x304   :  { %5779 = vmatprep.subr.bf16.mxu1 %v7832_v50 }
 0x306   :  { %5672 = vmatpush1.bf16.msra.mxu0 %v7875_v59 }
 0x307   :  { %5780 = vmatpush1.bf16.msra.mxu1 %v7830_v19  ;;  %5673 = vmatprep.subr.bf16.mxu0 %v7883_v14  ;;  %v7890_v14 = vld [vmem:[#allocation13 + $0x308] ss:$16 sps:$4 sm:$0xff]  }
 0x308   :  { %5781 = vmatprep.subr.bf16.mxu1 %v7838_v16 }
 0x30a   :  { %5674 = vmatpush1.bf16.msra.mxu0 %v7881_v18 }
 0x30b   :  { %5782 = vmatpush1.bf16.msra.mxu1 %v7836_v17  ;;  %5675 = vmatprep.subr.bf16.mxu0 %v7889_v25  ;;  %v7895_v25 = vld [vmem:[#allocation13 + $0x32c] ss:$16 sps:$4 sm:$0xff]  }
 0x30c   :  { %5804 = vmatprep.subr.bf16.mxu1 %v7844_v23 }
 0x30e   :  { %5784 = vmatmul.mubr.bf16.vlgmr.msra.gmra.mrb[24].mxu1 %v8807_v5  ;;  %5676 = vmatpush1.bf16.msra.mxu0 %v7887_v41  ;;  %v7868_v5 = vld [vmem:[#allocation13 + $0x28c] ss:$16 sps:$4 sm:$0xff]  }
 0x30f   :  { %5793 = vmatprep.mubr.bf16.mxu1 %v8818_v56  ;;  %5805 = vmatpush1.bf16.msra.mxu1 %v7842_v29  ;;  %v695_v56 = vsub.s32 4, %v8750_v13 }
 0x310   :  { %5806 = vmatprep.subr.bf16.mxu1 %v7850_v30  ;;  %5698 = vmatprep.subr.bf16.mxu0 %v7943_v31  ;;  %v3921_v31 = vld [vmem:[#allocation5 + $0xa0] sm:$0xff] }
 0x311   :  { %v696_v43 = vrot.slane %v8875_v15, %v695_v56  ;;  %v7893_v56 = vld [vmem:[#allocation13 + $0x328] ss:$16 sps:$4 sm:$0xff]  }
 0x313   :  { %5807 = vmatpush1.bf16.msra.mxu1 %v7848_v33  ;;  %v7941_v33 = vld [vmem:[#allocation13 + $0x600] ss:$16 sps:$4 sm:$0xff]  }
 0x314   :  { %5808 = vmatprep.subr.bf16.mxu1 %v7856_v34 }
 0x316   :  { %5794 = vmatmul.mubr.bf16.gmra.mrb[28].mxu1 %v8816_v49  ;;  %v7872_v49 = vld [vmem:[#allocation13 + $0x2a8] ss:$16 sps:$4 sm:$0xff]  }
 0x317   :  { %5809 = vmatpush1.bf16.msra.mxu1 %v7854_v36  ;;  %5836 = vmatprep.mubr.bf16.mxu1 %v8854_v63  ;;  %v7880_v63 = vld [vmem:[#allocation13 + $0x2cc] ss:$16 sps:$4 sm:$0xff]  }
 0x318   :  { %5810 = vmatprep.subr.bf16.mxu1 %v7862_v44  ;;  %v3922_v44 = vld [vmem:[#allocation5 + $0xa8] sm:$0xff] }
 0x31b   :  { %5811 = vmatpush1.bf16.msra.mxu1 %v7860_v35  ;;  %v7949_v35 = vld [vmem:[#allocation13 + $0x624] ss:$16 sps:$4 sm:$0xff]  }
 0x31c   :  { %5812 = vmatprep.subr.bf16.mxu1 %v7868_v5 }
 0x31f   :  { %5813 = vmatpush1.bf16.msra.mxu1 %v7866_v26 }
 0x320   :  { %5814 = vmatprep.subr.bf16.mxu1 %v7874_v39 }
 0x322   :  { %v3574_v0 = vpop.f32.mrb[8].mxu0 }
 0x323   :  { %v7468_v48 = vadd.f32 %v3574_v0, %v696_v43  ;;  %v3576_v1 = vpop.f32.mrb[9].mxu0  ;;  %5815 = vmatpush1.bf16.msra.mxu1 %v7872_v49  ;;  %v3930_v49 = vld [vmem:[#allocation5 + $0xe8] sm:$0xff] }
 0x324   :  { %v7469_v52 = vadd.f32 %v3576_v1, %v700_v46  ;;  %v3578_v53 = vpop.f32.mrb[10].mxu0  ;;  %5816 = vmatprep.subr.bf16.mxu1 %v7880_v63  ;;  %v7898_v63 = vld [vmem:[#allocation13 + $0x34c] ss:$16 sps:$4 sm:$0xff]  }
 0x325   :  { %vm3809_vm0 = vcmp.ge.f32.partialorder %v7468_v48, 0.0  ;;  %v3841_v57 = vmul.f32 0.2, %v7468_v48  ;;  %v7470_v58 = vadd.f32 %v3578_v53, %v696_v43  ;;  %v3580_v21 = vpop.f32.mrb[11].mxu0 }
 0x326   :  { %vm3810_vm1 = vcmp.ge.f32.partialorder %v7469_v52, 0.0  ;;  %v3842_v40 = vmul.f32 0.2, %v7469_v52  ;;  %v7471_v2 = vadd.f32 %v3580_v21, %v700_v46  ;;  %v7901_v21 = vld [vmem:[#allocation13 + $0x36c] ss:$16 sps:$4 sm:$0xff]  }
 0x327   :  { %v3873_v6 = vsel %vm3809_vm0, %v7468_v48, %v3841_v57  ;;  %vm3817_vm2 = vcmp.ge.f32.partialorder %v7470_v58, 0.0  ;;  %v3849_v45 = vmul.f32 0.2, %v7470_v58  ;;  %5817 = vmatpush1.bf16.msra.mxu1 %v7878_v9  ;;  %v7896_v57 = vld [vmem:[#allocation13 + $0x348] ss:$16 sps:$4 sm:$0xff]  }
 0x328   :  { %v3874_v11 = vsel %vm3810_vm1, %v7469_v52, %v3842_v40  ;;  %vm3818_vm3 = vcmp.ge.f32.partialorder %v7471_v2, 0.0  ;;  %v3850_v8 = vmul.f32 0.2, %v7471_v2  ;;  %5818 = vmatprep.subr.bf16.mxu1 %v7886_v54  ;;  %v3937_v42 = vmul.f32 %v3905_v61, %v3873_v6  ;;  %v7955_v52 = vld [vmem:[#allocation13 + $0x644] ss:$16 sps:$4 sm:$0xff]  }
 0x329   :  { %v3881_v47 = vsel %vm3817_vm2, %v7470_v58, %v3849_v45  ;;  %v3938_v59 = vmul.f32 %v3906_v55, %v3874_v11  ;;  %v7953_v40 = vld [vmem:[#allocation13 + $0x640] ss:$16 sps:$4 sm:$0xff]   ;;  %v7899_v55 = vld [vmem:[#allocation13 + $0x368] ss:$16 sps:$4 sm:$0xff]   ;;  %v7904_v6 = vld [vmem:[#allocation13 + $0x38c] ss:$16 sps:$4 sm:$0xff]  }
 0x32a   :  { %v3945_v10 = vmul.f32 %v3913_v62, %v3881_v47  ;;  %v3882_v4 = vsel %vm3818_vm3, %v7471_v2, %v3850_v8  ;;  %v3584_v12 = vpop.f32.mrb[12].mxu0  ;;  %v7961_v2 = vld [vmem:[#allocation13 + $0x664] ss:$16 sps:$4 sm:$0xff]   ;;  %v7959_v45 = vld [vmem:[#allocation13 + $0x660] ss:$16 sps:$4 sm:$0xff]  }
 0x32b   :  { %v7472_v32 = vadd.f32 %v3584_v12, %v696_v43  ;;  %v3586_v50 = vpop.f32.mrb[13].mxu0  ;;  %5819 = vmatpush1.bf16.msra.mxu1 %v7884_v7  ;;  %v3946_v19 = vmul.f32 %v3914_v3, %v3882_v4  ;;  %v7967_v62 = vld [vmem:[#allocation13 + $0x684] ss:$16 sps:$4 sm:$0xff]   ;;  %v7902_v7 = vld [vmem:[#allocation13 + $0x388] ss:$16 sps:$4 sm:$0xff]  }
 0x32c   :  { %v8879_v16 = vpack.c.bf16 %v3945_v10, %v3937_v42  ;;  %v7473_v18 = vadd.f32 %v3586_v50, %v700_v46  ;;  %v3588_v17 = vpop.f32.mrb[14].mxu0  ;;  %5820 = vmatprep.subr.bf16.mxu1 %v7892_v22  ;;  %v7907_v11 = vld [vmem:[#allocation13 + $0x3ac] ss:$16 sps:$4 sm:$0xff]   ;;  %v7965_v8 = vld [vmem:[#allocation13 + $0x680] ss:$16 sps:$4 sm:$0xff]  }
 0x32d   :  { %vm3825_vm4 = vcmp.ge.f32.partialorder %v7472_v32, 0.0  ;;  %v3857_v23 = vmul.f32 0.2, %v7472_v32  ;;  %v7474_v41 = vadd.f32 %v3588_v17, %v696_v43  ;;  %v3590_v29 = vpop.f32.mrb[15].mxu0  ;;  %v8881_v30 = vpack.c.bf16 %v3946_v19, %v3938_v59  ;;  %v7973_v3 = vld [vmem:[#allocation13 + $0x6a4] ss:$16 sps:$4 sm:$0xff]  }
 0x32e   :  { %vm3826_vm5 = vcmp.ge.f32.partialorder %v7473_v18, 0.0  ;;  %v3858_v34 = vmul.f32 0.2, %v7473_v18  ;;  %v7475_v36 = vadd.f32 %v3590_v29, %v700_v46  ;;  %v7947_v46 = vld [vmem:[#allocation13 + $0x620] ss:$16 sps:$4 sm:$0xff]  }
 0x32f   :  { %v3889_v5 = vsel %vm3825_vm4, %v7472_v32, %v3857_v23  ;;  %vm3833_vm6 = vcmp.ge.f32.partialorder %v7474_v41, 0.0  ;;  %v3865_v26 = vmul.f32 0.2, %v7474_v41  ;;  %5677 = vmatprep.mubr.bf16.mxu0 %v8881_v30  ;;  %5821 = vmatpush1.bf16.msra.mxu1 %v7890_v14  ;;  %v7905_v22 = vld [vmem:[#allocation13 + $0x3a8] ss:$16 sps:$4 sm:$0xff]  }
 0x330   :  { %v3890_v39 = vsel %vm3826_vm5, %v7473_v18, %v3858_v34  ;;  %vm3834_vm7 = vcmp.ge.f32.partialorder %v7475_v36, 0.0  ;;  %v3866_v43 = vmul.f32 0.2, %v7475_v36  ;;  %5678 = vmatmul.mubr.bf16.vlgmr.msra.gmra.mrb[16].mxu0 %v8879_v16  ;;  %5822 = vmatprep.subr.bf16.mxu1 %v7895_v25  ;;  %v3953_v1 = vmul.f32 %v3921_v31, %v3889_v5  ;;  %v7910_v47 = vld [vmem:[#allocation13 + $0x3cc] ss:$16 sps:$4 sm:$0xff]  }
 0x331   :  { %v3897_v0 = vsel %vm3833_vm6, %v7474_v41, %v3865_v26  ;;  %5699 = vmatpush1.bf16.msra.mxu0 %v7941_v33  ;;  %v3954_v53 = vmul.f32 %v3922_v44, %v3890_v39  ;;  %v7971_v42 = vld [vmem:[#allocation13 + $0x6a0] ss:$16 sps:$4 sm:$0xff]   ;;  %v7979_v10 = vld [vmem:[#allocation13 + $0x6c4] ss:$16 sps:$4 sm:$0xff]   ;;  %v7908_v4 = vld [vmem:[#allocation13 + $0x3c8] ss:$16 sps:$4 sm:$0xff]  }
 0x332   :  { %v3898_v48 = vsel %vm3834_vm7, %v7475_v36, %v3866_v43  ;;  %v3961_v9 = vmul.f32 %v3929_v37, %v3897_v0  ;;  %5700 = vmatprep.subr.bf16.mxu0 %v7949_v35  ;;  %v7913_v12 = vld [vmem:[#allocation13 + $0x3ec] ss:$16 sps:$4 sm:$0xff]   ;;  %v7977_v32 = vld [vmem:[#allocation13 + $0x6c0] ss:$16 sps:$4 sm:$0xff]   ;;  %v7985_v50 = vld [vmem:[#allocation13 + $0x6e4] ss:$16 sps:$4 sm:$0xff]  }
 0x333   :  { %5823 = vmatpush1.bf16.msra.mxu1 %v7893_v56  ;;  %v3962_v54 = vmul.f32 %v3930_v49, %v3898_v48  ;;  %v7911_v59 = vld [vmem:[#allocation13 + $0x3e8] ss:$16 sps:$4 sm:$0xff]   ;;  %v7916_v19 = vld [vmem:[#allocation13 + $0x40c] ss:$16 sps:$4 sm:$0xff]   ;;  %v7983_v14 = vld [vmem:[#allocation13 + $0x6e0] ss:$16 sps:$4 sm:$0xff]  }
 0x334   :  { %5824 = vmatprep.subr.bf16.mxu1 %v7898_v63  ;;  %v8885_v58 = vpack.c.bf16 %v3961_v9, %v3953_v1  ;;  %v7991_v18 = vld [vmem:[#allocation13 + $0x704] ss:$16 sps:$4 sm:$0xff]   ;;  %v7914_v17 = vld [vmem:[#allocation13 + $0x408] ss:$16 sps:$4 sm:$0xff]   ;;  %v7919_v25 = vld [vmem:[#allocation13 + $0x42c] ss:$16 sps:$4 sm:$0xff]  }
 0x335   :  { %v8887_v61 = vpack.c.bf16 %v3962_v54, %v3954_v53  ;;  %5701 = vmatpush1.bf16.msra.mxu0 %v7947_v46  ;;  %v7989_v23 = vld [vmem:[#allocation13 + $0x700] ss:$16 sps:$4 sm:$0xff]   ;;  %v7997_v41 = vld [vmem:[#allocation13 + $0x724] ss:$16 sps:$4 sm:$0xff]   ;;  %v7917_v29 = vld [vmem:[#allocation13 + $0x428] ss:$16 sps:$4 sm:$0xff]  }
 0x336   :  { %5702 = vmatprep.subr.bf16.mxu0 %v7955_v52  ;;  %v7922_v31 = vld [vmem:[#allocation13 + $0x44c] ss:$16 sps:$4 sm:$0xff]   ;;  %v7995_v33 = vld [vmem:[#allocation13 + $0x720] ss:$16 sps:$4 sm:$0xff]   ;;  %v8003_v34 = vld [vmem:[#allocation13 + $0x744] ss:$16 sps:$4 sm:$0xff]  }
 0x337   :  { %5687 = vmatprep.mubr.bf16.mxu0 %v8887_v61  ;;  %5825 = vmatpush1.bf16.msra.mxu1 %v7896_v57  ;;  %v7920_v36 = vld [vmem:[#allocation13 + $0x448] ss:$16 sps:$4 sm:$0xff]   ;;  %v7925_v44 = vld [vmem:[#allocation13 + $0x46c] ss:$16 sps:$4 sm:$0xff]   ;;  %v8001_v35 = vld [vmem:[#allocation13 + $0x740] ss:$16 sps:$4 sm:$0xff]  }
 0x338   :  { %5688 = vmatmul.mubr.bf16.gmra.mrb[20].mxu0 %v8885_v58  ;;  %5826 = vmatprep.subr.bf16.mxu1 %v7901_v21  ;;  %v7928_v5 = vld [vmem:[#allocation13 + $0x48c] ss:$16 sps:$4 sm:$0xff]   ;;  %v8007_v26 = vld [vmem:[#allocation13 + $0x760] ss:$16 sps:$4 sm:$0xff]   ;;  %v8015_v56 = vld [vmem:[#allocation13 + $0x784] ss:$16 sps:$4 sm:$0xff]  }
 0x339   :  { %5703 = vmatpush1.bf16.msra.mxu0 %v7953_v40  ;;  %v7926_v37 = vld [vmem:[#allocation13 + $0x488] ss:$16 sps:$4 sm:$0xff]   ;;  %v7931_v39 = vld [vmem:[#allocation13 + $0x4ac] ss:$16 sps:$4 sm:$0xff]   ;;  %v8013_v43 = vld [vmem:[#allocation13 + $0x780] ss:$16 sps:$4 sm:$0xff]  }
 0x33a   :  { %5704 = vmatprep.subr.bf16.mxu0 %v7961_v2  ;;  %v7929_v49 = vld [vmem:[#allocation13 + $0x4a8] ss:$16 sps:$4 sm:$0xff]   ;;  %v7934_v63 = vld [vmem:[#allocation13 + $0x4cc] ss:$16 sps:$4 sm:$0xff]   ;;  %v8027_v0 = vld [vmem:[#allocation13 + $0x7c4] ss:$16 sps:$4 sm:$0xff]  }
 0x33b   :  { %5827 = vmatpush1.bf16.msra.mxu1 %v7899_v55  ;;  %v7932_v46 = vld [vmem:[#allocation13 + $0x4c8] ss:$16 sps:$4 sm:$0xff]   ;;  %v7937_v48 = vld [vmem:[#allocation13 + $0x4ec] ss:$16 sps:$4 sm:$0xff]   ;;  %v8025_v1 = vld [vmem:[#allocation13 + $0x7c0] ss:$16 sps:$4 sm:$0xff]  }
 0x33c   :  { %5828 = vmatprep.subr.bf16.mxu1 %v7904_v6  ;;  %v8033_v9 = vld [vmem:[#allocation13 + $0x7e4] ss:$16 sps:$4 sm:$0xff]   ;;  %v7935_v52 = vld [vmem:[#allocation13 + $0x4e8] ss:$16 sps:$4 sm:$0xff]   ;;  %v7940_v53 = vld [vmem:[#allocation13 + $0x50c] ss:$16 sps:$4 sm:$0xff]  }
 0x33d   :  { %5705 = vmatpush1.bf16.msra.mxu0 %v7959_v45  ;;  %v8031_v54 = vld [vmem:[#allocation13 + $0x7e0] ss:$16 sps:$4 sm:$0xff]   ;;  %v7938_v21 = vld [vmem:[#allocation13 + $0x508] ss:$16 sps:$4 sm:$0xff]   ;;  %v7946_v40 = vld [vmem:[#allocation13 + $0x52c] ss:$16 sps:$4 sm:$0xff]  }
 0x33e   :  { %5706 = vmatprep.subr.bf16.mxu0 %v7967_v62  ;;  %v8060_v57 = vld [vmem:[#allocation16 + $0x4] ss:$8 sps:$4 sm:$0xff]   ;;  %v7952_v55 = vld [vmem:[#allocation13 + $0x54c] ss:$16 sps:$4 sm:$0xff]  }
 0x33f   :  { %5829 = vmatpush1.bf16.msra.mxu1 %v7902_v7  ;;  %v7944_v2 = vld [vmem:[#allocation13 + $0x528] ss:$16 sps:$4 sm:$0xff]   ;;  %v7958_v45 = vld [vmem:[#allocation13 + $0x56c] ss:$16 sps:$4 sm:$0xff]  }
 0x340   :  { %5830 = vmatprep.subr.bf16.mxu1 %v7907_v11  ;;  %v7950_v6 = vld [vmem:[#allocation13 + $0x548] ss:$16 sps:$4 sm:$0xff]   ;;  %v7964_v7 = vld [vmem:[#allocation13 + $0x58c] ss:$16 sps:$4 sm:$0xff]  }
 0x341   :  { %5707 = vmatpush1.bf16.msra.mxu0 %v7965_v8  ;;  %v7956_v62 = vld [vmem:[#allocation13 + $0x568] ss:$16 sps:$4 sm:$0xff]   ;;  %v7970_v8 = vld [vmem:[#allocation13 + $0x5ac] ss:$16 sps:$4 sm:$0xff]  }
 0x342   :  { %5708 = vmatprep.subr.bf16.mxu0 %v7973_v3  ;;  %v7962_v11 = vld [vmem:[#allocation13 + $0x588] ss:$16 sps:$4 sm:$0xff]  }
 0x343   :  { %5831 = vmatpush1.bf16.msra.mxu1 %v7905_v22  ;;  %v7968_v3 = vld [vmem:[#allocation13 + $0x5a8] ss:$16 sps:$4 sm:$0xff]   ;;  %v7976_v22 = vld [vmem:[#allocation13 + $0x5cc] ss:$16 sps:$4 sm:$0xff]  }
 0x344   :  { %5832 = vmatprep.subr.bf16.mxu1 %v7910_v47  ;;  %v7974_v47 = vld [vmem:[#allocation13 + $0x5c8] ss:$16 sps:$4 sm:$0xff]  }
 0x345   :  { %5709 = vmatpush1.bf16.msra.mxu0 %v7971_v42  ;;  %v7982_v42 = vld [vmem:[#allocation13 + $0x5ec] ss:$16 sps:$4 sm:$0xff]  }
 0x346   :  { %5710 = vmatprep.subr.bf16.mxu0 %v7979_v10  ;;  %v7980_v10 = vld [vmem:[#allocation13 + $0x5e8] ss:$16 sps:$4 sm:$0xff]  }
 0x347   :  { %5833 = vmatpush1.bf16.msra.mxu1 %v7908_v4  ;;  %v7988_v4 = vld [vmem:[#allocation13 + $0x60c] ss:$16 sps:$4 sm:$0xff]  }
 0x348   :  { %5834 = vmatprep.subr.bf16.mxu1 %v7913_v12  ;;  %v7986_v12 = vld [vmem:[#allocation13 + $0x608] ss:$16 sps:$4 sm:$0xff]  }
 0x349   :  { %5711 = vmatpush1.bf16.msra.mxu0 %v7977_v32  ;;  %v7994_v32 = vld [vmem:[#allocation13 + $0x62c] ss:$16 sps:$4 sm:$0xff]  }
 0x34a   :  { %5712 = vmatprep.subr.bf16.mxu0 %v7985_v50  ;;  %v7992_v50 = vld [vmem:[#allocation13 + $0x628] ss:$16 sps:$4 sm:$0xff]  }
 0x34b   :  { %5835 = vmatpush1.bf16.msra.mxu1 %v7911_v59  ;;  %v8000_v59 = vld [vmem:[#allocation13 + $0x64c] ss:$16 sps:$4 sm:$0xff]  }
 0x34c   :  { %5857 = vmatprep.subr.bf16.mxu1 %v7916_v19  ;;  %v7998_v19 = vld [vmem:[#allocation13 + $0x648] ss:$16 sps:$4 sm:$0xff]  }
 0x34d   :  { %5713 = vmatpush1.bf16.msra.mxu0 %v7983_v14  ;;  %v8006_v14 = vld [vmem:[#allocation13 + $0x66c] ss:$16 sps:$4 sm:$0xff]  }
 0x34e   :  { %5837 = vmatmul.mubr.bf16.vlgmr.msra.gmra.mrb[24].mxu1 %v8850_v27  ;;  %5714 = vmatprep.subr.bf16.mxu0 %v7991_v18  ;;  %v8009_v27 = vld [vmem:[#allocation13 + $0x764] ss:$16 sps:$4 sm:$0xff]   ;;  %v8004_v18 = vld [vmem:[#allocation13 + $0x668] ss:$16 sps:$4 sm:$0xff]  }
 0x34f   :  { %5846 = vmatprep.mubr.bf16.mxu1 %v8863_v24  ;;  %5858 = vmatpush1.bf16.msra.mxu1 %v7914_v17  ;;  %v7923_v24 = vld [vmem:[#allocation13 + $0x468] ss:$16 sps:$4 sm:$0xff]   ;;  %v8012_v17 = vld [vmem:[#allocation13 + $0x68c] ss:$16 sps:$4 sm:$0xff]  }
 0x350   :  { %5859 = vmatprep.subr.bf16.mxu1 %v7919_v25  ;;  %v703_v25 = vsub.s32 6, %v8750_v13 }
 0x351   :  { %5715 = vmatpush1.bf16.msra.mxu0 %v7989_v23  ;;  %v8018_v23 = vld [vmem:[#allocation13 + $0x6ac] ss:$16 sps:$4 sm:$0xff]  }
 0x352   :  { %5716 = vmatprep.subr.bf16.mxu0 %v7997_v41  ;;  %v704_v41 = vrot.slane %v8875_v15, %v703_v25  ;;  %v8037_v25 = vld [vmem:[#allocation13 + $0x728] ss:$16 sps:$4 sm:$0xff]  }
 0x353   :  { %5860 = vmatpush1.bf16.msra.mxu1 %v7917_v29 }
 0x354   :  { %5861 = vmatprep.subr.bf16.mxu1 %v7922_v31  ;;  %v8016_v31 = vld [vmem:[#allocation13 + $0x6a8] ss:$16 sps:$4 sm:$0xff]  }
 0x355   :  { %5717 = vmatpush1.bf16.msra.mxu0 %v7995_v33 }
 0x356   :  { %5847 = vmatmul.mubr.bf16.gmra.mrb[28].mxu1 %v8861_v20  ;;  %5718 = vmatprep.subr.bf16.mxu0 %v8003_v34  ;;  %v8021_v20 = vld [vmem:[#allocation13 + $0x7a4] ss:$16 sps:$4 sm:$0xff]  }
 0x357   :  { %5862 = vmatpush1.bf16.msra.mxu1 %v7920_v36  ;;  %5889 = vmatprep.mubr.bf16.mxu1 %v8881_v30  ;;  %v8019_v30 = vld [vmem:[#allocation13 + $0x7a0] ss:$16 sps:$4 sm:$0xff]  }
 0x358   :  { %5863 = vmatprep.subr.bf16.mxu1 %v7925_v44 }
 0x359   :  { %5719 = vmatpush1.bf16.msra.mxu0 %v8001_v35 }
 0x35a   :  { %5720 = vmatprep.subr.bf16.mxu0 %v8009_v27  ;;  %v8022_v27 = vld [vmem:[#allocation13 + $0x6c8] ss:$16 sps:$4 sm:$0xff]  }
 0x35b   :  { %5864 = vmatpush1.bf16.msra.mxu1 %v7923_v24 }
 0x35c   :  { %5865 = vmatprep.subr.bf16.mxu1 %v7928_v5 }
 0x35d   :  { %5721 = vmatpush1.bf16.msra.mxu0 %v8007_v26 }
 0x35e   :  { %5722 = vmatprep.subr.bf16.mxu0 %v8015_v56  ;;  %v8030_v56 = vld [vmem:[#allocation13 + $0x6ec] ss:$16 sps:$4 sm:$0xff]  }
 0x35f   :  { %5866 = vmatpush1.bf16.msra.mxu1 %v7926_v37 }
 0x360   :  { %5867 = vmatprep.subr.bf16.mxu1 %v7931_v39 }
 0x361   :  { %5723 = vmatpush1.bf16.msra.mxu0 %v8013_v43  ;;  %v3907_v43 = vld [vmem:[#allocation5 + $0x30] sm:$0xff] }
 0x362   :  { %5724 = vmatprep.subr.bf16.mxu0 %v8021_v20 }
 0x363   :  { %5868 = vmatpush1.bf16.msra.mxu1 %v7929_v49  ;;  %v3915_v49 = vld [vmem:[#allocation5 + $0x70] sm:$0xff] }
 0x364   :  { %5869 = vmatprep.subr.bf16.mxu1 %v7934_v63  ;;  %v3908_v63 = vld [vmem:[#allocation5 + $0x38] sm:$0xff] }
 0x365   :  { %5725 = vmatpush1.bf16.msra.mxu0 %v8019_v30 }
 0x366   :  { %5726 = vmatprep.subr.bf16.mxu0 %v8027_v0 }
 0x367   :  { %5870 = vmatpush1.bf16.msra.mxu1 %v7932_v46  ;;  %v8028_v46 = vld [vmem:[#allocation13 + $0x6e8] ss:$16 sps:$4 sm:$0xff]  }
 0x368   :  { %5871 = vmatprep.subr.bf16.mxu1 %v7937_v48  ;;  %v3916_v48 = vld [vmem:[#allocation5 + $0x78] sm:$0xff] }
 0x369   :  { %5727 = vmatpush1.bf16.msra.mxu0 %v8025_v1 }
 0x36a   :  { %5728 = vmatprep.subr.bf16.mxu0 %v8033_v9  ;;  %v8036_v9 = vld [vmem:[#allocation13 + $0x70c] ss:$16 sps:$4 sm:$0xff]  }
 0x36b   :  { %5872 = vmatpush1.bf16.msra.mxu1 %v7935_v52 }
 0x36c   :  { %5873 = vmatprep.subr.bf16.mxu1 %v7940_v53 }
 0x36d   :  { %5729 = vmatpush1.bf16.msra.mxu0 %v8031_v54 }
 0x36e   :  { %6447 = vmatprep.subr.bf16.mxu0 %v8060_v57 }
 0x36f   :  { %5874 = vmatpush1.bf16.msra.mxu1 %v7938_v21 }
 0x370   :  { %5875 = vmatprep.subr.bf16.mxu1 %v7946_v40 }
 0x373   :  { %5876 = vmatpush1.bf16.msra.mxu1 %v7944_v2 }
 0x374   :  { %5877 = vmatprep.subr.bf16.mxu1 %v7952_v55 }
 0x377   :  { %5878 = vmatpush1.bf16.msra.mxu1 %v7950_v6 }
 0x378   :  { %5879 = vmatprep.subr.bf16.mxu1 %v7958_v45 }
 0x37b   :  { %5880 = vmatpush1.bf16.msra.mxu1 %v7956_v62 }
 0x37c   :  { %5881 = vmatprep.subr.bf16.mxu1 %v7964_v7  ;;  %v8034_v7 = vld [vmem:[#allocation13 + $0x708] ss:$16 sps:$4 sm:$0xff]  }
 0x37f   :  { %5882 = vmatpush1.bf16.msra.mxu1 %v7962_v11  ;;  %v8039_v11 = vld [vmem:[#allocation13 + $0x72c] ss:$16 sps:$4 sm:$0xff]  }
 0x380   :  { %5883 = vmatprep.subr.bf16.mxu1 %v7970_v8 }
 0x383   :  { %5884 = vmatpush1.bf16.msra.mxu1 %v7968_v3 }
 0x384   :  { %5885 = vmatprep.subr.bf16.mxu1 %v7976_v22 }
 0x387   :  { %5886 = vmatpush1.bf16.msra.mxu1 %v7974_v47 }
 0x388   :  { %5887 = vmatprep.subr.bf16.mxu1 %v7982_v42  ;;  %v8058_v42 = vld [vmem:[#allocation16] ss:$8 sps:$4 sm:$0xff]  }
 0x38b   :  { %5888 = vmatpush1.bf16.msra.mxu1 %v7980_v10 }
 0x38c   :  { %5910 = vmatprep.subr.bf16.mxu1 %v7988_v4 }
 0x38e   :  { %5890 = vmatmul.mubr.bf16.vlgmr.msra.gmra.mrb[24].mxu1 %v8879_v16  ;;  %v8010_v16 = vld [vmem:[#allocation13 + $0x688] ss:$16 sps:$4 sm:$0xff]  }
 0x38f   :  { %5899 = vmatprep.mubr.bf16.mxu1 %v8887_v61  ;;  %5911 = vmatpush1.bf16.msra.mxu1 %v7986_v12  ;;  %v707_v61 = vsub.s32 7, %v8750_v13  ;;  %v8063_v12 = vld [vmem:[#allocation16 + $0x14] ss:$8 sps:$4 sm:$0xff]   ;;  %v8124_v13 = vld [vmem:[#allocation16 + $0x160] ss:$8 sps:$4 sm:$0xff]  }
 0x390   :  { %5912 = vmatprep.subr.bf16.mxu1 %v7994_v32 }
 0x391   :  { %v708_v29 = vrot.slane %v8875_v15, %v707_v61 }
 0x393   :  { %5913 = vmatpush1.bf16.msra.mxu1 %v7992_v50 }
 0x394   :  { %5914 = vmatprep.subr.bf16.mxu1 %v8000_v59  ;;  %v3924_v59 = vld [vmem:[#allocation5 + $0xb8] sm:$0xff] }
 0x396   :  { %5900 = vmatmul.mubr.bf16.gmra.mrb[28].mxu1 %v8885_v58  ;;  %v8024_v58 = vld [vmem:[#allocation13 + $0x6cc] ss:$16 sps:$4 sm:$0xff]  }
 0x397   :  { %5915 = vmatpush1.bf16.msra.mxu1 %v7998_v19  ;;  %v3923_v19 = vld [vmem:[#allocation5 + $0xb0] sm:$0xff] }
 0x398   :  { %5916 = vmatprep.subr.bf16.mxu1 %v8006_v14  ;;  %v3931_v14 = vld [vmem:[#allocation5 + $0xf0] sm:$0xff] }
 0x39b   :  { %5917 = vmatpush1.bf16.msra.mxu1 %v8004_v18 }
 0x39c   :  { %5918 = vmatprep.subr.bf16.mxu1 %v8012_v17 }
 0x39f   :  { %5919 = vmatpush1.bf16.msra.mxu1 %v8010_v16  ;;  %v3932_v16 = vld [vmem:[#allocation5 + $0xf8] sm:$0xff] }
 0x3a0   :  { %5920 = vmatprep.subr.bf16.mxu1 %v8018_v23  ;;  %v8042_v23 = vld [vmem:[#allocation13 + $0x74c] ss:$16 sps:$4 sm:$0xff]  }
 0x3a1   :  { %v3786_v33 = vpop.f32.mrb[16].mxu1 }
 0x3a2   :  { %v7476_v34 = vadd.f32 %v3786_v33, %v704_v41  ;;  %v3788_v36 = vpop.f32.mrb[17].mxu1  ;;  %v8066_v33 = vld [vmem:[#allocation16 + $0x24] ss:$8 sps:$4 sm:$0xff]  }
 0x3a3   :  { %v7477_v44 = vadd.f32 %v3788_v36, %v708_v29  ;;  %v3790_v35 = vpop.f32.mrb[18].mxu1  ;;  %5921 = vmatpush1.bf16.msra.mxu1 %v8016_v31 }
 0x3a4   :  { %vm3811_vm8 = vcmp.ge.f32.partialorder %v7476_v34, 0.0  ;;  %v3843_v24 = vmul.f32 0.2, %v7476_v34  ;;  %v7478_v5 = vadd.f32 %v3790_v35, %v704_v41  ;;  %v3792_v26 = vpop.f32.mrb[19].mxu1  ;;  %5922 = vmatprep.subr.bf16.mxu1 %v8024_v58 }
 0x3a5   :  { %vm3812_vm9 = vcmp.ge.f32.partialorder %v7477_v44, 0.0  ;;  %v3844_v37 = vmul.f32 0.2, %v7477_v44  ;;  %v7479_v39 = vadd.f32 %v3792_v26, %v708_v29  ;;  %v8069_v26 = vld [vmem:[#allocation16 + $0x34] ss:$8 sps:$4 sm:$0xff]  }
 0x3a6   :  { %v3875_v15 = vsel %vm3811_vm8, %v7476_v34, %v3843_v24  ;;  %vm3819_vm10 = vcmp.ge.f32.partialorder %v7478_v5, 0.0  ;;  %v3851_v20 = vmul.f32 0.2, %v7478_v5  ;;  %v8045_v24 = vld [vmem:[#allocation13 + $0x76c] ss:$16 sps:$4 sm:$0xff]  }
 0x3a7   :  { %v3876_v30 = vsel %vm3812_vm9, %v7477_v44, %v3844_v37  ;;  %vm3820_vm11 = vcmp.ge.f32.partialorder %v7479_v39, 0.0  ;;  %v3852_v0 = vmul.f32 0.2, %v7479_v39  ;;  %5923 = vmatpush1.bf16.msra.mxu1 %v8022_v27  ;;  %v3939_v52 = vmul.f32 %v3907_v43, %v3875_v15  ;;  %v8040_v44 = vld [vmem:[#allocation13 + $0x748] ss:$16 sps:$4 sm:$0xff]  }
 0x3a8   :  { %v3883_v1 = vsel %vm3819_vm10, %v7478_v5, %v3851_v20  ;;  %5924 = vmatprep.subr.bf16.mxu1 %v8030_v56  ;;  %v3940_v2 = vmul.f32 %v3908_v63, %v3876_v30  ;;  %v8064_v5 = vld [vmem:[#allocation16 + $0x20] ss:$8 sps:$4 sm:$0xff]   ;;  %v8043_v56 = vld [vmem:[#allocation13 + $0x768] ss:$16 sps:$4 sm:$0xff]  }
 0x3a9   :  { %v3947_v53 = vmul.f32 %v3915_v49, %v3883_v1  ;;  %v3884_v54 = vsel %vm3820_vm11, %v7479_v39, %v3852_v0  ;;  %v3796_v57 = vpop.f32.mrb[20].mxu1  ;;  %v8048_v37 = vld [vmem:[#allocation13 + $0x78c] ss:$16 sps:$4 sm:$0xff]   ;;  %v8072_v15 = vld [vmem:[#allocation16 + $0x44] ss:$8 sps:$4 sm:$0xff]  }
 0x3aa   :  { %v7480_v21 = vadd.f32 %v3796_v57, %v704_v41  ;;  %v3798_v40 = vpop.f32.mrb[21].mxu1  ;;  %v3948_v55 = vmul.f32 %v3916_v48, %v3884_v54  ;;  %v8067_v39 = vld [vmem:[#allocation16 + $0x30] ss:$8 sps:$4 sm:$0xff]   ;;  %v8046_v43 = vld [vmem:[#allocation13 + $0x788] ss:$16 sps:$4 sm:$0xff]  }
 0x3ab   :  { %v8902_v6 = vpack.c.bf16 %v3947_v53, %v3939_v52  ;;  %v7481_v45 = vadd.f32 %v3798_v40, %v708_v29  ;;  %v3800_v62 = vpop.f32.mrb[22].mxu1  ;;  %5925 = vmatpush1.bf16.msra.mxu1 %v8028_v46  ;;  %v8051_v20 = vld [vmem:[#allocation13 + $0x7ac] ss:$16 sps:$4 sm:$0xff]   ;;  %v8075_v63 = vld [vmem:[#allocation16 + $0x54] ss:$8 sps:$4 sm:$0xff]  }
 0x3ac   :  { %vm3827_vm12 = vcmp.ge.f32.partialorder %v7480_v21, 0.0  ;;  %v3859_v8 = vmul.f32 0.2, %v7480_v21  ;;  %v7482_v3 = vadd.f32 %v3800_v62, %v704_v41  ;;  %v3802_v22 = vpop.f32.mrb[23].mxu1  ;;  %v3972_v47 = vpack.c.bf16 %v3948_v55, %v3940_v2  ;;  %5926 = vmatprep.subr.bf16.mxu1 %v8036_v9  ;;  %v8061_v41 = vld [vmem:[#allocation16 + $0x10] ss:$8 sps:$4 sm:$0xff]  }
 0x3ad   :  { %vm3828_vm13 = vcmp.ge.f32.partialorder %v7481_v45, 0.0  ;;  %v3860_v10 = vmul.f32 0.2, %v7481_v45  ;;  %v7483_v4 = vadd.f32 %v3802_v22, %v708_v29  ;;  %v8070_v49 = vld [vmem:[#allocation16 + $0x40] ss:$8 sps:$4 sm:$0xff]  }
 0x3ae   :  { %v3891_v32 = vsel %vm3827_vm12, %v7480_v21, %v3859_v8  ;;  %vm3835_vm14 = vcmp.ge.f32.partialorder %v7482_v3, 0.0  ;;  %v3867_v50 = vmul.f32 0.2, %v7482_v3  ;;  %5730 = vmatprep.mubr.bf16.mxu0 %v3972_v47  ;;  %5942 = vmatprep.mubr.bf16.mxu1 %v3972_v47  ;;  %v8049_v30 = vld [vmem:[#allocation13 + $0x7a8] ss:$16 sps:$4 sm:$0xff]  }
 0x3af   :  { %v3892_v18 = vsel %vm3828_vm13, %v7481_v45, %v3860_v10  ;;  %vm3836_vm15 = vcmp.ge.f32.partialorder %v7483_v4, 0.0  ;;  %v3868_v17 = vmul.f32 0.2, %v7483_v4  ;;  %5731 = vmatmul.mubr.bf16.vlgmr.msra.gmra.mrb[16].mxu0 %v8902_v6  ;;  %5927 = vmatpush1.bf16.msra.mxu1 %v8034_v7  ;;  %v3955_v31 = vmul.f32 %v3923_v19, %v3891_v32  ;;  %v8054_v0 = vld [vmem:[#allocation13 + $0x7cc] ss:$16 sps:$4 sm:$0xff]  }
 0x3b0   :  { %v3899_v61 = vsel %vm3835_vm14, %v7482_v3, %v3867_v50  ;;  %5928 = vmatprep.subr.bf16.mxu1 %v8039_v11  ;;  %6448 = vmatpush1.bf16.msra.mxu0 %v8058_v42  ;;  %v3956_v34 = vmul.f32 %v3924_v59, %v3892_v18  ;;  %v8073_v46 = vld [vmem:[#allocation16 + $0x50] ss:$8 sps:$4 sm:$0xff]   ;;  %v8078_v48 = vld [vmem:[#allocation16 + $0x64] ss:$8 sps:$4 sm:$0xff]   ;;  %v8076_v52 = vld [vmem:[#allocation16 + $0x60] ss:$8 sps:$4 sm:$0xff]  }
 0x3b1   :  { %v3900_v29 = vsel %vm3836_vm15, %v7483_v4, %v3868_v17  ;;  %v3963_v58 = vmul.f32 %v3931_v14, %v3899_v61  ;;  %6449 = vmatprep.subr.bf16.mxu0 %v8063_v12  ;;  %v8052_v1 = vld [vmem:[#allocation13 + $0x7c8] ss:$16 sps:$4 sm:$0xff]   ;;  %v8057_v9 = vld [vmem:[#allocation13 + $0x7ec] ss:$16 sps:$4 sm:$0xff]   ;;  %v8910_v32 = vld [vmem:[#allocation14] sm:$0xf] }
 0x3b2   :  { %v3964_v36 = vmul.f32 %v3932_v16, %v3900_v29  ;;  %v8081_v53 = vld [vmem:[#allocation16 + $0x74] ss:$8 sps:$4 sm:$0xff]   ;;  %v8079_v57 = vld [vmem:[#allocation16 + $0x70] ss:$8 sps:$4 sm:$0xff]   ;;  %v8084_v21 = vld [vmem:[#allocation16 + $0x84] ss:$8 sps:$4 sm:$0xff]   ;;  %v4242_v50 = vrot.slane %v8910_v32, %v8755_v28  ;;  %v4246_v59 = vrot.slane %v8910_v32, %v8761_v51 }
 0x3b3   :  { %5929 = vmatpush1.bf16.msra.mxu1 %v8037_v25  ;;  %v8905_v35 = vpack.c.bf16 %v3963_v58, %v3955_v31  ;;  %v8055_v54 = vld [vmem:[#allocation13 + $0x7e8] ss:$16 sps:$4 sm:$0xff]   ;;  %v8082_v40 = vld [vmem:[#allocation16 + $0x80] ss:$8 sps:$4 sm:$0xff]   ;;  %v8085_v55 = vld [vmem:[#allocation16 + $0x90] ss:$8 sps:$4 sm:$0xff]  }
 0x3b4   :  { %v3980_v27 = vpack.c.bf16 %v3964_v36, %v3956_v34  ;;  %5930 = vmatprep.subr.bf16.mxu1 %v8042_v23  ;;  %6450 = vmatpush1.bf16.msra.mxu0 %v8061_v41  ;;  %v8087_v2 = vld [vmem:[#allocation16 + $0x94] ss:$8 sps:$4 sm:$0xff]   ;;  %v8090_v45 = vld [vmem:[#allocation16 + $0xa4] ss:$8 sps:$4 sm:$0xff]   ;;  %v8088_v62 = vld [vmem:[#allocation16 + $0xa0] ss:$8 sps:$4 sm:$0xff]  }
 0x3b5   :  { %6451 = vmatprep.subr.bf16.mxu0 %v8066_v33  ;;  %v8093_v7 = vld [vmem:[#allocation16 + $0xb4] ss:$8 sps:$4 sm:$0xff]   ;;  %v8091_v11 = vld [vmem:[#allocation16 + $0xb0] ss:$8 sps:$4 sm:$0xff]   ;;  %v8096_v8 = vld [vmem:[#allocation16 + $0xc4] ss:$8 sps:$4 sm:$0xff]  }
 0x3b6   :  { %5740 = vmatprep.mubr.bf16.mxu0 %v3980_v27  ;;  %v8094_v3 = vld [vmem:[#allocation16 + $0xc0] ss:$8 sps:$4 sm:$0xff]   ;;  %v8097_v22 = vld [vmem:[#allocation16 + $0xd0] ss:$8 sps:$4 sm:$0xff]   ;;  %v8102_v47 = vld [vmem:[#allocation16 + $0xe4] ss:$8 sps:$4 sm:$0xff]  }
 0x3b7   :  { %5741 = vmatmul.mubr.bf16.gmra.mrb[20].mxu0 %v8905_v35  ;;  %5931 = vmatpush1.bf16.msra.mxu1 %v8040_v44  ;;  %v8100_v42 = vld [vmem:[#allocation16 + $0xe0] ss:$8 sps:$4 sm:$0xff]   ;;  %v8105_v10 = vld [vmem:[#allocation16 + $0xf4] ss:$8 sps:$4 sm:$0xff]   ;;  %v8103_v4 = vld [vmem:[#allocation16 + $0xf0] ss:$8 sps:$4 sm:$0xff]  }
 0x3b8   :  { %5932 = vmatprep.subr.bf16.mxu1 %v8045_v24  ;;  %6452 = vmatpush1.bf16.msra.mxu0 %v8064_v5  ;;  %v8108_v12 = vld [vmem:[#allocation16 + $0x104] ss:$8 sps:$4 sm:$0xff]   ;;  %v6011_v58 = vld [vmem:[#allocation7] sm:$0xff] }
 0x3b9   :  { %6453 = vmatprep.subr.bf16.mxu0 %v8069_v26  ;;  %v6015_v34 = vld [vmem:[#allocation7 + $0x20] sm:$0xff] }
 0x3bb   :  { %5933 = vmatpush1.bf16.msra.mxu1 %v8043_v56 }
 0x3bc   :  { %5934 = vmatprep.subr.bf16.mxu1 %v8048_v37  ;;  %6454 = vmatpush1.bf16.msra.mxu0 %v8067_v39 }
 0x3bd   :  { %6455 = vmatprep.subr.bf16.mxu0 %v8072_v15 }
 0x3bf   :  { %5935 = vmatpush1.bf16.msra.mxu1 %v8046_v43 }
 0x3c0   :  { %5936 = vmatprep.subr.bf16.mxu1 %v8051_v20  ;;  %6456 = vmatpush1.bf16.msra.mxu0 %v8070_v49 }
 0x3c1   :  { %6457 = vmatprep.subr.bf16.mxu0 %v8075_v63 }
 0x3c3   :  { %5937 = vmatpush1.bf16.msra.mxu1 %v8049_v30 }
 0x3c4   :  { %5938 = vmatprep.subr.bf16.mxu1 %v8054_v0  ;;  %6458 = vmatpush1.bf16.msra.mxu0 %v8073_v46 }
 0x3c5   :  { %6459 = vmatprep.subr.bf16.mxu0 %v8078_v48 }
 0x3c7   :  { %5939 = vmatpush1.bf16.msra.mxu1 %v8052_v1 }
 0x3c8   :  { %5940 = vmatprep.subr.bf16.mxu1 %v8057_v9  ;;  %6460 = vmatpush1.bf16.msra.mxu0 %v8076_v52  ;;  %v8106_v9 = vld [vmem:[#allocation16 + $0x100] ss:$8 sps:$4 sm:$0xff]  }
 0x3c9   :  { %6461 = vmatprep.subr.bf16.mxu0 %v8081_v53 }
 0x3cb   :  { %5941 = vmatpush1.bf16.msra.mxu1 %v8055_v54  ;;  %v8111_v54 = vld [vmem:[#allocation16 + $0x114] ss:$8 sps:$4 sm:$0xff]  }
 0x3cc   :  { %6462 = vmatpush1.bf16.msra.mxu0 %v8079_v57 }
 0x3cd   :  { %6463 = vmatprep.subr.bf16.mxu0 %v8084_v21 }
 0x3ce   :  { %5943 = vmatmul.mubr.bf16.vlgmr.msra.gmra.mrb[24].mxu1 %v8902_v6  ;;  %v8099_v6 = vld [vmem:[#allocation16 + $0xd4] ss:$8 sps:$4 sm:$0xff]  }
 0x3cf   :  { %5952 = vmatprep.mubr.bf16.mxu1 %v3980_v27  ;;  %v6016_v27 = vld [vmem:[#allocation7 + $0x28] sm:$0xff] }
 0x3d0   :  { %6464 = vmatpush1.bf16.msra.mxu0 %v8082_v40  ;;  %v6019_v40 = vld [vmem:[#allocation7 + $0x40] sm:$0xff] }
 0x3d1   :  { %6465 = vmatprep.subr.bf16.mxu0 %v8087_v2  ;;  %v6023_v2 = vld [vmem:[#allocation7 + $0x60] sm:$0xff] }
 0x3d4   :  { %6466 = vmatpush1.bf16.msra.mxu0 %v8085_v55 }
 0x3d5   :  { %6467 = vmatprep.subr.bf16.mxu0 %v8090_v45 }
 0x3d6   :  { %5953 = vmatmul.mubr.bf16.gmra.mrb[28].mxu1 %v8905_v35  ;;  %v6012_v35 = vld [vmem:[#allocation7 + $0x8] sm:$0xff] }
 0x3d8   :  { %6468 = vmatpush1.bf16.msra.mxu0 %v8088_v62  ;;  %v6020_v62 = vld [vmem:[#allocation7 + $0x48] sm:$0xff] }
 0x3d9   :  { %6469 = vmatprep.subr.bf16.mxu0 %v8093_v7  ;;  %v6024_v7 = vld [vmem:[#allocation7 + $0x68] sm:$0xff] }
 0x3dc   :  { %6470 = vmatpush1.bf16.msra.mxu0 %v8091_v11 }
 0x3dd   :  { %6471 = vmatprep.subr.bf16.mxu0 %v8096_v8  ;;  %v8109_v8 = vld [vmem:[#allocation16 + $0x110] ss:$8 sps:$4 sm:$0xff]  }
 0x3e0   :  { %6472 = vmatpush1.bf16.msra.mxu0 %v8094_v3 }
 0x3e1   :  { %6473 = vmatprep.subr.bf16.mxu0 %v8099_v6  ;;  %v8114_v6 = vld [vmem:[#allocation16 + $0x124] ss:$8 sps:$4 sm:$0xff]  }
 0x3e4   :  { %6474 = vmatpush1.bf16.msra.mxu0 %v8097_v22 }
 0x3e5   :  { %6475 = vmatprep.subr.bf16.mxu0 %v8102_v47 }
 0x3e8   :  { %6476 = vmatpush1.bf16.msra.mxu0 %v8100_v42 }
 0x3e9   :  { %6477 = vmatprep.subr.bf16.mxu0 %v8105_v10 }
 0x3ec   :  { %6478 = vmatpush1.bf16.msra.mxu0 %v8103_v4 }
 0x3ed   :  { %6500 = vmatprep.subr.bf16.mxu0 %v8108_v12 }
 0x482   :  { %v5732_v19 = vpop.f32.mrb[16].mxu0 }
 0x483   :  { %v7484_v14 = vadd.f32 %v5732_v19, %v4242_v50  ;;  %v5734_v18 = vpop.f32.mrb[17].mxu0  ;;  %v8115_v19 = vld [vmem:[#allocation16 + $0x130] ss:$8 sps:$4 sm:$0xff]  }
 0x484   :  { %v7485_v17 = vadd.f32 %v5734_v18, %v4246_v59  ;;  %v5736_v25 = vpop.f32.mrb[18].mxu0  ;;  %v8118_v18 = vld [vmem:[#allocation16 + $0x140] ss:$8 sps:$4 sm:$0xff]  }
 0x485   :  { %vm5963_vm0 = vcmp.ge.f32.partialorder %v7484_v14, 0.0  ;;  %v5979_v16 = vmul.f32 0.2, %v7484_v14  ;;  %v7486_v61 = vadd.f32 %v5736_v25, %v4242_v50  ;;  %v5738_v23 = vpop.f32.mrb[19].mxu0  ;;  %v8123_v25 = vld [vmem:[#allocation16 + $0x154] ss:$8 sps:$4 sm:$0xff]  }
 0x486   :  { %vm5964_vm1 = vcmp.ge.f32.partialorder %v7485_v17, 0.0  ;;  %v5980_v41 = vmul.f32 0.2, %v7485_v17  ;;  %v7487_v29 = vadd.f32 %v5738_v23, %v4246_v59  ;;  %v8121_v23 = vld [vmem:[#allocation16 + $0x150] ss:$8 sps:$4 sm:$0xff]  }
 0x487   :  { %v5995_v31 = vsel %vm5963_vm0, %v7484_v14, %v5979_v16  ;;  %vm5967_vm2 = vcmp.ge.f32.partialorder %v7486_v61, 0.0  ;;  %v5983_v33 = vmul.f32 0.2, %v7486_v61  ;;  %v8120_v14 = vld [vmem:[#allocation16 + $0x144] ss:$8 sps:$4 sm:$0xff]   ;;  %v4254_v16 = vrot.slane %v8910_v32, %v691_v60 }
 0x488   :  { %v5996_v36 = vsel %vm5964_vm1, %v7485_v17, %v5980_v41  ;;  %vm5968_vm3 = vcmp.ge.f32.partialorder %v7487_v29, 0.0  ;;  %v5984_v44 = vmul.f32 0.2, %v7487_v29  ;;  %v6027_v5 = vmul.f32 %v6011_v58, %v5995_v31  ;;  %v8126_v31 = vld [vmem:[#allocation16 + $0x164] ss:$8 sps:$4 sm:$0xff]  }
 0x489   :  { %v5999_v24 = vsel %vm5967_vm2, %v7486_v61, %v5983_v33  ;;  %v6028_v43 = vmul.f32 %v6012_v35, %v5996_v36  ;;  %v4250_v17 = vrot.slane %v8910_v32, %v687_v38  ;;  %v6013_v35 = vld [vmem:[#allocation7 + $0x10] sm:$0xff] }
 0x48a   :  { %v6031_v26 = vmul.f32 %v6015_v34, %v5999_v24  ;;  %v6000_v56 = vsel %vm5968_vm3, %v7487_v29, %v5984_v44  ;;  %v5742_v37 = vpop.f32.mrb[20].mxu0  ;;  %v6017_v24 = vld [vmem:[#allocation7 + $0x30] sm:$0xff] }
 0x48b   :  { %v7488_v39 = vadd.f32 %v5742_v37, %v4242_v50  ;;  %v5744_v15 = vpop.f32.mrb[21].mxu0  ;;  %v6032_v20 = vmul.f32 %v6016_v27, %v6000_v56  ;;  %v6014_v37 = vld [vmem:[#allocation7 + $0x18] sm:$0xff] }
 0x48c   :  { %v6043_v49 = vpack.c.bf16 %v6031_v26, %v6027_v5  ;;  %v7489_v63 = vadd.f32 %v5744_v15, %v4246_v59  ;;  %v5746_v30 = vpop.f32.mrb[22].mxu0  ;;  %v8129_v5 = vld [vmem:[#allocation16 + $0x174] ss:$8 sps:$4 sm:$0xff]  }
 0x48d   :  { %vm5971_vm4 = vcmp.ge.f32.partialorder %v7488_v39, 0.0  ;;  %v5987_v0 = vmul.f32 0.2, %v7488_v39  ;;  %v7490_v46 = vadd.f32 %v5746_v30, %v4242_v50  ;;  %v5748_v48 = vpop.f32.mrb[23].mxu0  ;;  %v6044_v1 = vpack.c.bf16 %v6032_v20, %v6028_v43  ;;  %v8112_v50 = vld [vmem:[#allocation16 + $0x120] ss:$8 sps:$4 sm:$0xff]  }
 0x48e   :  { %vm5972_vm5 = vcmp.ge.f32.partialorder %v7489_v63, 0.0  ;;  %v5988_v52 = vmul.f32 0.2, %v7489_v63  ;;  %v7491_v53 = vadd.f32 %v5748_v48, %v4246_v59  ;;  %v8117_v59 = vld [vmem:[#allocation16 + $0x134] ss:$8 sps:$4 sm:$0xff]  }
 0x48f   :  { %v6003_v57 = vsel %vm5971_vm4, %v7488_v39, %v5987_v0  ;;  %vm5975_vm6 = vcmp.ge.f32.partialorder %v7490_v46, 0.0  ;;  %v5991_v21 = vmul.f32 0.2, %v7490_v46  ;;  %6479 = vmatprep.mubr.bf16.mxu0 %v6044_v1  ;;  %v6018_v39 = vld [vmem:[#allocation7 + $0x38] sm:$0xff] }
 0x490   :  { %v6004_v55 = vsel %vm5972_vm5, %v7489_v63, %v5988_v52  ;;  %vm5976_vm7 = vcmp.ge.f32.partialorder %v7491_v53, 0.0  ;;  %v5992_v45 = vmul.f32 0.2, %v7491_v53  ;;  %6480 = vmatmul.mubr.bf16.vlgmr.msra.gmra.mrb[24].mxu0 %v6043_v49  ;;  %v6035_v22 = vmul.f32 %v6019_v40, %v6003_v57  ;;  %v8127_v30 = vld [vmem:[#allocation16 + $0x170] ss:$8 sps:$4 sm:$0xff]  }
 0x491   :  { %v6007_v11 = vsel %vm5975_vm6, %v7490_v46, %v5991_v21  ;;  %6501 = vmatpush1.bf16.msra.mxu0 %v8106_v9  ;;  %v6036_v42 = vmul.f32 %v6020_v62, %v6004_v55  ;;  %v8132_v9 = vld [vmem:[#allocation16 + $0x184] ss:$8 sps:$4 sm:$0xff]   ;;  %v8130_v62 = vld [vmem:[#allocation16 + $0x180] ss:$8 sps:$4 sm:$0xff]  }
 0x492   :  { %v6008_v3 = vsel %vm5976_vm7, %v7491_v53, %v5992_v45  ;;  %6502 = vmatprep.subr.bf16.mxu0 %v8111_v54  ;;  %v6039_v47 = vmul.f32 %v6023_v2, %v6007_v11 }
 0x493   :  { %v6040_v10 = vmul.f32 %v6024_v7, %v6008_v3  ;;  %v6021_v7 = vld [vmem:[#allocation7 + $0x50] sm:$0xff]  ;;  %v8135_v3 = vld [vmem:[#allocation16 + $0x194] ss:$8 sps:$4 sm:$0xff]  }
 0x494   :  { %v6047_v4 = vpack.c.bf16 %v6039_v47, %v6035_v22 }
 0x495   :  { %6503 = vmatpush1.bf16.msra.mxu0 %v8109_v8  ;;  %v6048_v12 = vpack.c.bf16 %v6040_v10, %v6036_v42  ;;  %v6022_v42 = vld [vmem:[#allocation7 + $0x58] sm:$0xff] }
 0x496   :  { %6504 = vmatprep.subr.bf16.mxu0 %v8114_v6  ;;  %v6025_v6 = vld [vmem:[#allocation7 + $0x70] sm:$0xff]  ;;  %v6026_v10 = vld [vmem:[#allocation7 + $0x78] sm:$0xff] }
 0x497   :  { %6489 = vmatprep.mubr.bf16.mxu0 %v6048_v12 }
 0x498   :  { %6490 = vmatmul.mubr.bf16.gmra.mrb[28].mxu0 %v6047_v4 }
 0x499   :  { %6505 = vmatpush1.bf16.msra.mxu0 %v8112_v50  ;;  %v8133_v50 = vld [vmem:[#allocation16 + $0x190] ss:$8 sps:$4 sm:$0xff]  }
 0x49a   :  { %6506 = vmatprep.subr.bf16.mxu0 %v8117_v59 }
 0x49d   :  { %6507 = vmatpush1.bf16.msra.mxu0 %v8115_v19 }
 0x49e   :  { %6508 = vmatprep.subr.bf16.mxu0 %v8120_v14  ;;  %v8138_v14 = vld [vmem:[#allocation16 + $0x1a4] ss:$8 sps:$4 sm:$0xff]  }
 0x4a1   :  { %6509 = vmatpush1.bf16.msra.mxu0 %v8118_v18  ;;  %v5944_v61 = vpop.f32.mrb[24].mxu1 }
 0x4a2   :  { %v7492_v41 = vadd.f32 %v5944_v61, %v4250_v17  ;;  %v5946_v29 = vpop.f32.mrb[25].mxu1  ;;  %6510 = vmatprep.subr.bf16.mxu0 %v8123_v25  ;;  %v8136_v61 = vld [vmem:[#allocation16 + $0x1a0] ss:$8 sps:$4 sm:$0xff]  }
 0x4a3   :  { %v7493_v58 = vadd.f32 %v5946_v29, %v4254_v16  ;;  %v5948_v33 = vpop.f32.mrb[26].mxu1  ;;  %v8144_v29 = vld [vmem:[#allocation16 + $0x1c4] ss:$8 sps:$4 sm:$0xff]  }
 0x4a4   :  { %vm5965_vm8 = vcmp.ge.f32.partialorder %v7492_v41, 0.0  ;;  %v5981_v34 = vmul.f32 0.2, %v7492_v41  ;;  %v7494_v36 = vadd.f32 %v5948_v33, %v4250_v17  ;;  %v5950_v44 = vpop.f32.mrb[27].mxu1  ;;  %v8145_v33 = vld [vmem:[#allocation16 + $0x1d0] ss:$8 sps:$4 sm:$0xff]  }
 0x4a5   :  { %vm5966_vm9 = vcmp.ge.f32.partialorder %v7493_v58, 0.0  ;;  %v5982_v38 = vmul.f32 0.2, %v7493_v58  ;;  %v7495_v27 = vadd.f32 %v5950_v44, %v4254_v16  ;;  %6511 = vmatpush1.bf16.msra.mxu0 %v8121_v23  ;;  %v8141_v23 = vld [vmem:[#allocation16 + $0x1b4] ss:$8 sps:$4 sm:$0xff]  }
 0x4a6   :  { %v5997_v60 = vsel %vm5965_vm8, %v7492_v41, %v5981_v34  ;;  %vm5969_vm10 = vcmp.ge.f32.partialorder %v7494_v36, 0.0  ;;  %v5985_v32 = vmul.f32 0.2, %v7494_v36  ;;  %6512 = vmatprep.subr.bf16.mxu0 %v8126_v31  ;;  %v8139_v41 = vld [vmem:[#allocation16 + $0x1b0] ss:$8 sps:$4 sm:$0xff]   ;;  %vm6660_vm8 = vcmask 7168  }
 0x4a7   :  { %v5998_v26 = vsel %vm5966_vm9, %v7493_v58, %v5982_v38  ;;  %vm5970_vm11 = vcmp.ge.f32.partialorder %v7495_v27, 0.0  ;;  %v5986_v56 = vmul.f32 0.2, %v7495_v27  ;;  %v8922_v43 = vmul.f32 %v6013_v35, %v5997_v60  ;;  %v8142_v31 = vld [vmem:[#allocation16 + $0x1c0] ss:$8 sps:$4 sm:$0xff]  }
 0x4a8   :  { %v6001_v15 = vsel %vm5969_vm10, %v7494_v36, %v5985_v32  ;;  %v6030_v48 = vmul.f32 %v6014_v37, %v5998_v26  ;;  %v8147_v58 = vld [vmem:[#allocation16 + $0x1d4] ss:$8 sps:$4 sm:$0xff]   ;;  %v8150_v34 = vld [vmem:[#allocation16 + $0x1e4] ss:$8 sps:$4 sm:$0xff]   ;;  %v8148_v36 = vld [vmem:[#allocation16 + $0x1e0] ss:$8 sps:$4 sm:$0xff]  }
 0x4a9   :  { %v8924_v20 = vmul.f32 %v6017_v24, %v6001_v15  ;;  %v6002_v49 = vsel %vm5970_vm11, %v7495_v27, %v5986_v56  ;;  %6513 = vmatpush1.bf16.msra.mxu0 %v8124_v13  ;;  %v5954_v63 = vpop.f32.mrb[28].mxu1  ;;  %v8153_v44 = vld [vmem:[#allocation16 + $0x1f4] ss:$8 sps:$4 sm:$0xff]   ;;  %v8151_v35 = vld [vmem:[#allocation16 + $0x1f0] ss:$8 sps:$4 sm:$0xff]  }
 0x4aa   :  { %v7496_v0 = vadd.f32 %v5954_v63, %v4250_v17  ;;  %v5956_v46 = vpop.f32.mrb[29].mxu1  ;;  %6514 = vmatprep.subr.bf16.mxu0 %v8129_v5  ;;  %v6034_v1 = vmul.f32 %v6018_v39, %v6002_v49  ;;  %v6115_v38 = vld [vmem:[#allocation17] sm:$0x3]  ;;  %v6593_v5 = vld [vmem:[#allocation19] sm:$0x3] }
 0x4ab   :  { %v6045_v52 = vpack.c.bf16 %v8924_v20, %v8922_v43  ;;  %v7497_v53 = vadd.f32 %v5956_v46, %v4254_v16  ;;  %v5958_v54 = vpop.f32.mrb[30].mxu1  ;;  %v6120_v27 = vrot.slane %v6115_v38, %v8755_v28  ;;  %v6124_v13 = vrot.slane %v6115_v38, %v8761_v51  ;;  %v6577_v43 = vld [vmem:[#allocation8] sm:$0xff]  ;;  %v6578_v63 = vld [vmem:[#allocation8 + $0x8] sm:$0xff] }
 0x4ac   :  { %vm5973_vm12 = vcmp.ge.f32.partialorder %v7496_v0, 0.0  ;;  %v5989_v57 = vmul.f32 0.2, %v7496_v0  ;;  %v7498_v21 = vadd.f32 %v5958_v54, %v4250_v17  ;;  %v5960_v40 = vpop.f32.mrb[31].mxu1  ;;  %v6046_v2 = vpack.c.bf16 %v6034_v1, %v6030_v48  ;;  %v6579_v1 = vld [vmem:[#allocation8 + $0x10] sm:$0xff]  ;;  %v6580_v54 = vld [vmem:[#allocation8 + $0x18] sm:$0xff] }
 0x4ad   :  { %vm5974_vm13 = vcmp.ge.f32.partialorder %v7497_v53, 0.0  ;;  %v5990_v55 = vmul.f32 0.2, %v7497_v53  ;;  %v7499_v45 = vadd.f32 %v5960_v40, %v4254_v16  ;;  %6515 = vmatpush1.bf16.msra.mxu0 %v8127_v30  ;;  %v6598_v30 = vrot.slane %v6593_v5, %v8755_v28 }
 0x4ae   :  { %v6005_v11 = vsel %vm5973_vm12, %v7496_v0, %v5989_v57  ;;  %vm5977_vm14 = vcmp.ge.f32.partialorder %v7498_v21, 0.0  ;;  %v5993_v8 = vmul.f32 0.2, %v7498_v21  ;;  %6532 = vmatprep.mubr.bf16.mxu0 %v6046_v2  ;;  %6516 = vmatprep.subr.bf16.mxu0 %v8132_v9  ;;  %v6602_v48 = vrot.slane %v6593_v5, %v8761_v51 }
 0x4af   :  { %v6006_v22 = vsel %vm5974_vm13, %v7497_v53, %v5990_v55  ;;  %vm5978_vm15 = vcmp.ge.f32.partialorder %v7499_v45, 0.0  ;;  %v5994_v47 = vmul.f32 0.2, %v7499_v45  ;;  %v6037_v59 = vmul.f32 %v6021_v7, %v6005_v11 }
 0x4b0   :  { %v6009_v4 = vsel %vm5977_vm14, %v7498_v21, %v5993_v8  ;;  %v6038_v18 = vmul.f32 %v6022_v42, %v6006_v22 }
 0x4b1   :  { %v6010_v12 = vsel %vm5978_vm15, %v7499_v45, %v5994_v47  ;;  %6517 = vmatpush1.bf16.msra.mxu0 %v8130_v62  ;;  %v6041_v19 = vmul.f32 %v6025_v6, %v6009_v4 }
 0x4b2   :  { %6518 = vmatprep.subr.bf16.mxu0 %v8135_v3  ;;  %v6042_v17 = vmul.f32 %v6026_v10, %v6010_v12 }
 0x4b3   :  { %v6049_v25 = vpack.c.bf16 %v6041_v19, %v6037_v59  ;;  %v6582_v59 = vld [vmem:[#allocation8 + $0x28] sm:$0xff] }
 0x4b4   :  { %v6050_v16 = vpack.c.bf16 %v6042_v17, %v6038_v18  ;;  %v6583_v18 = vld [vmem:[#allocation8 + $0x30] sm:$0xff] }
 0x4b5   :  { %6519 = vmatpush1.bf16.msra.mxu0 %v8133_v50  ;;  %v6581_v50 = vld [vmem:[#allocation8 + $0x20] sm:$0xff] }
 0x4b6   :  { %6520 = vmatprep.subr.bf16.mxu0 %v8138_v14 }
 0x4b9   :  { %6521 = vmatpush1.bf16.msra.mxu0 %v8136_v61  ;;  %v6584_v61 = vld [vmem:[#allocation8 + $0x38] sm:$0xff] }
 0x4ba   :  { %6522 = vmatprep.subr.bf16.mxu0 %v8141_v23 }
 0x4bd   :  { %6523 = vmatpush1.bf16.msra.mxu0 %v8139_v41 }
 0x4be   :  { %6524 = vmatprep.subr.bf16.mxu0 %v8144_v29 }
 0x4c1   :  { %6525 = vmatpush1.bf16.msra.mxu0 %v8142_v31 }
 0x4c2   :  { %6526 = vmatprep.subr.bf16.mxu0 %v8147_v58 }
 0x4c5   :  { %6527 = vmatpush1.bf16.msra.mxu0 %v8145_v33 }
 0x4c6   :  { %6528 = vmatprep.subr.bf16.mxu0 %v8150_v34 }
 0x4c9   :  { %6529 = vmatpush1.bf16.msra.mxu0 %v8148_v36 }
 0x4ca   :  { %6530 = vmatprep.subr.bf16.mxu0 %v8153_v44 }
 0x4cd   :  { %6531 = vmatpush1.bf16.msra.mxu0 %v8151_v35 }
 0x4d0   :  { %6533 = vmatmul.mubr.bf16.vlgmr.msra.gmra.mrb[24].mxu0 %v6045_v52 }
 0x4d1   :  { %6542 = vmatprep.mubr.bf16.mxu0 %v6050_v16 }
 0x4d8   :  { %6543 = vmatmul.mubr.bf16.gmra.mrb[28].mxu0 %v6049_v25 }
 0x5a3   :  { %v6534_v60 = vpop.f32.mrb[24].mxu0 }
 0x5a4   :  { %v7500_v32 = vadd.f32 %v6534_v60, %v6120_v27  ;;  %v6536_v24 = vpop.f32.mrb[25].mxu0 }
 0x5a5   :  { %v7501_v26 = vadd.f32 %v6536_v24, %v6124_v13  ;;  %v6538_v56 = vpop.f32.mrb[26].mxu0 }
 0x5a6   :  { %vm6553_vm0 = vcmp.ge.f32.partialorder %v7500_v32, 0.0  ;;  %v6561_v37 = vmul.f32 0.2, %v7500_v32  ;;  %v7502_v39 = vadd.f32 %v6538_v56, %v6120_v27  ;;  %v6540_v15 = vpop.f32.mrb[27].mxu0 }
 0x5a7   :  { %vm6554_vm1 = vcmp.ge.f32.partialorder %v7501_v26, 0.0  ;;  %v6562_v20 = vmul.f32 0.2, %v7501_v26  ;;  %v7503_v49 = vadd.f32 %v6540_v15, %v6124_v13 }
 0x5a8   :  { %vm6555_vm2 = vcmp.ge.f32.partialorder %v7502_v39, 0.0  ;;  %v6563_v0 = vmul.f32 0.2, %v7502_v39  ;;  %v6569_v46 = vsel %vm6553_vm0, %v7500_v32, %v6561_v37 }
 0x5a9   :  { %vm6556_vm3 = vcmp.ge.f32.partialorder %v7503_v49, 0.0  ;;  %v6564_v9 = vmul.f32 0.2, %v7503_v49  ;;  %v6570_v52 = vsel %vm6554_vm1, %v7501_v26, %v6562_v20  ;;  %v6585_v53 = vmul.f32 %v6577_v43, %v6569_v46 }
 0x5aa   :  { %v6571_v57 = vsel %vm6555_vm2, %v7502_v39, %v6563_v0  ;;  %v6586_v21 = vmul.f32 %v6578_v63, %v6570_v52 }
 0x5ab   :  { %v6572_v40 = vsel %vm6556_vm3, %v7503_v49, %v6564_v9  ;;  %v6544_v2 = vpop.f32.mrb[28].mxu0  ;;  %v6605_v55 = vmul.f32 %v6598_v30, %v6585_v53  ;;  %v6587_v45 = vmul.f32 %v6579_v1, %v6571_v57 }
 0x5ac   :  { %v7504_v62 = vadd.f32 %v6544_v2, %v6120_v27  ;;  %v6546_v7 = vpop.f32.mrb[29].mxu0  ;;  %v6606_v28 = vmul.f32 %v6602_v48, %v6586_v21  ;;  %v6588_v11 = vmul.f32 %v6580_v54, %v6572_v40 }
 0x5ad   :  { %v7505_v8 = vadd.f32 %v6546_v7, %v6124_v13  ;;  %v6548_v3 = vpop.f32.mrb[30].mxu0  ;;  %v6607_v6 = vmul.f32 %v6598_v30, %v6587_v45 }
 0x5ae   :  { %vm6557_vm4 = vcmp.ge.f32.partialorder %v7504_v62, 0.0  ;;  %v6565_v51 = vmul.f32 0.2, %v7504_v62  ;;  %v7506_v22 = vadd.f32 %v6548_v3, %v6120_v27  ;;  %v6550_v47 = vpop.f32.mrb[31].mxu0  ;;  %v6613_v42 = vadd.f32 %v6606_v28, %v6605_v55 }
 0x5af   :  { %vm6558_vm5 = vcmp.ge.f32.partialorder %v7505_v8, 0.0  ;;  %v6566_v10 = vmul.f32 0.2, %v7505_v8  ;;  %v7507_v4 = vadd.f32 %v6550_v47, %v6124_v13  ;;  %v6608_v12 = vmul.f32 %v6602_v48, %v6588_v11  ;;  %v7443_v13 = vld [vmem:[#allocation2] ss:$0 sm:$0xff] }
 0x5b0   :  { %vm6559_vm6 = vcmp.ge.f32.partialorder %v7506_v22, 0.0  ;;  %v6567_v19 = vmul.f32 0.2, %v7506_v22  ;;  %6614 = vadd.xlane.f32.xlu0 %v6613_v42  ;;  %v6573_v14 = vsel %vm6557_vm4, %v7504_v62, %v6565_v51 }
 0x5b1   :  { %vm6560_vm7 = vcmp.ge.f32.partialorder %v7507_v4, 0.0  ;;  %v6568_v17 = vmul.f32 0.2, %v7507_v4  ;;  %v6616_v25 = vadd.f32 %v6608_v12, %v6607_v6  ;;  %v6574_v16 = vsel %vm6558_vm5, %v7505_v8, %v6566_v10 }
 0x5b2   :  { %v6575_v23 = vsel %vm6559_vm6, %v7506_v22, %v6567_v19  ;;  %v6589_v41 = vmul.f32 %v6581_v50, %v6573_v14  ;;  %v6590_v29 = vmul.f32 %v6582_v59, %v6574_v16 }
 0x5b3   :  { %v6576_v31 = vsel %vm6560_vm7, %v7507_v4, %v6568_v17  ;;  %v6591_v58 = vmul.f32 %v6583_v18, %v6575_v23 }
 0x5b4   :  { %6617 = vadd.xlane.f32.xlu0 %v6616_v25  ;;  %v6609_v33 = vmul.f32 %v6598_v30, %v6589_v41  ;;  %v6610_v34 = vmul.f32 %v6602_v48, %v6590_v29  ;;  %v6592_v36 = vmul.f32 %v6584_v61, %v6576_v31 }
 0x5b5   :  { %v6611_v44 = vmul.f32 %v6598_v30, %v6591_v58 }
 0x5b6   :  { %v6619_v35 = vadd.f32 %v6610_v34, %v6609_v33  ;;  %v6612_v38 = vmul.f32 %v6602_v48, %v6592_v36 }
 0x5b8   :  { %6620 = vadd.xlane.f32.xlu1 %v6619_v35  ;;  %v6622_v27 = vadd.f32 %v6612_v38, %v6611_v44 }
 0x5bc   :  { %6623 = vadd.xlane.f32.xlu1 %v6622_v27 }
 0x63d   :  { %v6615_v60 = vpop.xlane.xlu0 %6614 }
 0x63e   :  { %v6632_v32 = vadd.f32 %v7443_v13, %v6615_v60 }
 0x640   :  { %v6636_v24 = vsub.f32 0.0, %v6632_v32 }
 0x641   :  { %v6618_v5 = vpop.xlane.xlu0 %6617 }
 0x642   :  { %v6640_v26 = vmul.f32 1.442695, %v6636_v24  ;;  %v6633_v56 = vadd.f32 %v7443_v13, %v6618_v5 }
 0x644   :  { %8154 = vpow2.f32 %v6640_v26  ;;  %v6637_v37 = vsub.f32 0.0, %v6633_v56 }
 0x645   :  { %v6621_v39 = vpop.xlane.xlu1 %6620 }
 0x646   :  { %v6642_v15 = vmul.f32 1.442695, %v6637_v37  ;;  %v6634_v43 = vadd.f32 %v7443_v13, %v6621_v39 }
 0x648   :  { %8156 = vpow2.f32 %v6642_v15  ;;  %v6638_v20 = vsub.f32 0.0, %v6634_v43 }
 0x649   :  { %v6624_v49 = vpop.xlane.xlu1 %6623 }
 0x64a   :  { %v6644_v63 = vmul.f32 1.442695, %v6638_v20  ;;  %v6635_v30 = vadd.f32 %v7443_v13, %v6624_v49 }
 0x64c   :  { %8158 = vpow2.f32 %v6644_v63  ;;  %v6639_v0 = vsub.f32 0.0, %v6635_v30 }
 0x64e   :  { %v8155_v46 = vpop.eup %8154  ;;  %v6646_v48 = vmul.f32 1.442695, %v6639_v0 }
 0x64f   :  { %v6648_v1 = vadd.f32 1.0, %v8155_v46 }
 0x650   :  { %8160 = vpow2.f32 %v6646_v48 }
 0x651   :  { %8162 = vrcp.f32 %v6648_v1 }
 0x652   :  { %v8157_v9 = vpop.eup %8156 }
 0x653   :  { %v6649_v52 = vadd.f32 1.0, %v8157_v9 }
 0x655   :  { %8164 = vrcp.f32 %v6649_v52 }
 0x656   :  { %v8159_v53 = vpop.eup %8158 }
 0x657   :  { %v6650_v54 = vadd.f32 1.0, %v8159_v53 }
 0x659   :  { %8166 = vrcp.f32 %v6650_v54 }
 0x65a   :  { %v8161_v57 = vpop.eup %8160 }
 0x65b   :  { %v8163_v21 = vpop.eup %8162  ;;  %v6651_v40 = vadd.f32 1.0, %v8161_v57 }
 0x65c   :  { %6661 = vst.msk [vmem:[%s8956_s12] sm:$0xff] %vm6660_vm8, %v8163_v21 }
 0x65d   :  { %8168 = vrcp.f32 %v6651_v40 }
 0x65f   :  { %v8165_v2 = vpop.eup %8164 }
 0x660   :  { %6662 = vst.msk [vmem:[%s8956_s12 + $0x8] sm:$0xff] %vm6660_vm8, %v8165_v2 }
 0x663   :  { %v8167_v55 = vpop.eup %8166 }
 0x664   :  { %6663 = vst.msk [vmem:[%s8956_s12 + $0x10] sm:$0xff] %vm6660_vm8, %v8167_v55 }
 0x667   :  { %v8169_v45 = vpop.eup %8168 }
 0x668   :  { %6664 = vst.msk [vmem:[%s8956_s12 + $0x18] sm:$0xff] %vm6660_vm8, %v8169_v45 }
 0x669   :  { %6669 = vsyncpa [#allocation4], 1 }
 0x66a   :  { %6670 = vsyncpa [#allocation6], 1 }
 0x66b   :  { %6671 = vsyncpa [#allocation9], 1 }
 0x66c   :  { %6672 = vsyncpa [#allocation12], 1 }
 0x66d   :  { %6673 = vsyncpa [#allocation15], 1 }
 0x66e   :  { %6674 = vsyncpa [#allocation18], 1 }

</bundles_post_ra>
